<compile_context>
chip_gen: v7x
topology: tpu7x:2x2x1
jax: 0.10.0
libtpu: 0.0.40
codegen_flags: <defaults>
</compile_context>

<pallas_src>
import jax
import jax.numpy as jnp
from jax import lax
from jax.experimental import pallas as pl
from jax.experimental.pallas import tpu as pltpu


def _round_up(x, m):
    return (x + m - 1) // m * m


def _detect_n_tiles():
    """2 lane tiles only on v7x (2 TensorCores/chip); 1 on v5e/v6e (single TC)."""
    try:
        kind = jax.devices()[0].device_kind.lower()
    except Exception:
        return 1
    return 2 if "v7" in kind else 1


_N_TILES = _detect_n_tiles()


def _make_kernel(mt, tap_offsets, cp):
    """Per-lane-tile kernel body; all slice offsets static, single fused matmul."""

    def kernel(zf_ref, w_ref, b_ref, o_ref, tap_ref):
        # zf_ref : (cp, LT)        flat zero-padded input window for this lane tile
        # w_ref  : (4*cp, 4*cp)    fused phase/tap weights (resident across tiles)
        # b_ref  : (4*cp, 1)       per-phase bias column
        # o_ref  : (4*cp, mt)      lane-dense output tile (4 phases x cp channels)
        # tap_ref: (4*cp, mt)      packed 4-tap operand (VMEM scratch)
        for t, d in enumerate(tap_offsets):                       # unrolled, static offsets
            tap_ref[t * cp:(t + 1) * cp, :] = zf_ref[:, d:d + mt]
        acc = jnp.dot(w_ref[...], tap_ref[...],
                      preferred_element_type=jnp.float32) + b_ref[...]
        o_ref[...] = 0.5 * jnp.tanh(0.5 * acc) + 0.5              # sigmoid on the EUP

    return kernel


@jax.jit
def conv_transpose2d_sigmoid(x, weight, bias):
    """sigmoid(ConvTranspose2d(x)) matching
    torch.nn.ConvTranspose2d(28, 28, (3,3), stride=(2,2), padding=(0,1), output_padding=(0,1)).

    x: (1, C_in, H, W) f32, weight: (C_in, C_out, kH, kW), bias: (C_out,)
    returns (1, C_out, H_out, W_out)."""
    f32 = jnp.float32
    N, C_in, H, W = x.shape
    _, C_out, kH, kW = weight.shape
    assert N == 1 and (kH, kW) == (3, 3), "kernel specialized for this module"

    sH = sW = 2
    pH, pW = 0, 1
    opH, opW = 0, 1
    H_out = (H - 1) * sH - 2 * pH + kH + opH          # 91
    W_out = (W - 1) * sW - 2 * pW + kW + opW          # 90

    CP = 32                        # channel pad (sublane multiple >= C_in, C_out)
    A = (H_out + 1) // 2           # a-range for phase outputs (46)
    WP = W + 1                     # padded image width = flat row stride (46)
    HP = H + 2                     # padded image height (47): one zero row top & bottom
    Q = (A - 1) * WP + W           # flat base positions actually needed (2115)

    NT = _N_TILES
    MT = _round_up(-(-Q // NT), 128)   # output lanes per tile (2176 / 1152)
    LT = MT + 128                      # per-tile input window incl. 47-lane tap halo
    L = (NT - 1) * MT + LT             # full flat padded-input length

    TAPS = (0, 1, WP, WP + 1)          # x[a-1,b], x[a-1,b+1], x[a,b], x[a,b+1]

    # ---- input: zero-pad (1 row top/bottom, 1 col right, channels -> CP), flatten row-major
    xp = jnp.pad(x[0].astype(f32), ((0, CP - C_in), (1, 1), (0, 1)))     # (CP, HP, WP)
    zf = jnp.pad(xp.reshape(CP, HP * WP), ((0, 0), (0, L - HP * WP)))    # (CP, L)
    zf_w = jnp.stack([zf[:, t * MT:t * MT + LT] for t in range(NT)], 0)  # (NT, CP, LT)

    # ---- fused phase/tap weights: Wbig[p*CP+co, t*CP+ci] = W[ci, co, u, v]
    # phase p in {0:(even,even), 1:(even,odd), 2:(odd,even), 3:(odd,odd)}; tap t indexes TAPS.
    w = weight.astype(f32)                                # (C_in, C_out, kH, kW)
    assign = (
        (0, 2, 0, 1), (0, 0, 2, 1),                              # (even oh, even ow)
        (1, 3, 0, 0), (1, 2, 0, 2), (1, 1, 2, 0), (1, 0, 2, 2),  # (even oh, odd  ow)
        (2, 2, 1, 1),                                            # (odd  oh, even ow)
        (3, 3, 1, 0), (3, 2, 1, 2),                              # (odd  oh, odd  ow)
    )
    w_big = jnp.zeros((4 * CP, 4 * CP), f32)
    for p, t, u, v in assign:
        w_big = w_big.at[p * CP:p * CP + C_out, t * CP:t * CP + C_in].set(w[:, :, u, v].T)

    b_col = jnp.tile(jnp.pad(bias.astype(f32), (0, CP - C_out)), 4).reshape(4 * CP, 1)

    kernel = _make_kernel(MT, TAPS, CP)
    out_flat = pl.pallas_call(
        kernel,
        out_shape=jax.ShapeDtypeStruct((4 * CP, NT * MT), f32),
        grid_spec=pltpu.PrefetchScalarGridSpec(
            num_scalar_prefetch=0,
            grid=(NT,),
            in_specs=[
                pl.BlockSpec((None, CP, LT), lambda t: (t, 0, 0)),    # per-tile input window
                pl.BlockSpec((4 * CP, 4 * CP), lambda t: (0, 0)),     # fused weights (resident)
                pl.BlockSpec((4 * CP, 1), lambda t: (0, 0)),          # bias column
            ],
            out_specs=pl.BlockSpec((4 * CP, MT), lambda t: (0, t)),   # lane-dense output tile
            scratch_shapes=[pltpu.VMEM((4 * CP, MT), f32)],
        ),
        compiler_params=pltpu.CompilerParams(
            dimension_semantics=("parallel",)),
    )(zf_w, w_big, b_col)

    # ---- un-interleave: rows (pr, pc, c), lanes (a, b)  ->  out[c, 2a+pr, 2b+pc]
    out = out_flat[:, :A * WP].reshape(2, 2, CP, A, WP)
    out = out.transpose(2, 3, 0, 4, 1).reshape(CP, 2 * A, 2 * WP)
    return out[None, :C_out, :H_out, :W_out]


def _reference(x, weight, bias):
    """Pure-JAX reference: conv_general_dilated formulation of ConvTranspose2d + sigmoid."""
    w_oihw = jnp.transpose(weight, (1, 0, 2, 3))[:, :, ::-1, ::-1]   # (C_out, C_in, kH, kW)
    y = lax.conv_general_dilated(
        x, w_oihw, window_strides=(1, 1),
        padding=((2, 2), (1, 2)),            # (kH-1-pH, kH-1-pH+opH), (kW-1-pW, kW-1-pW+opW)
        lhs_dilation=(2, 2), rhs_dilation=(1, 1),
        dimension_numbers=('NCHW', 'OIHW', 'NCHW'))
    y = y + bias[None, :, None, None]
    return 1.0 / (1.0 + jnp.exp(-y))


if __name__ == "__main__":
    key = jax.random.PRNGKey(0)
    kx, kw, kb = jax.random.split(key, 3)

    # Same shapes as the PyTorch module: x1 = randn(1, 28, 45, 45)
    x = jax.random.normal(kx, (1, 28, 45, 45), dtype=jnp.float32)
    # ConvTranspose2d weight layout is (in_channels, out_channels, kH, kW)
    weight = 0.1 * jax.random.normal(kw, (28, 28, 3, 3), dtype=jnp.float32)
    bias = 0.1 * jax.random.normal(kb, (28,), dtype=jnp.float32)

    out = jax.block_until_ready(conv_transpose2d_sigmoid(x, weight, bias))
    assert out.shape == (1, 28, 91, 90), out.shape

    ref = jax.block_until_ready(_reference(x, weight, bias))
    err = float(jnp.max(jnp.abs(out - ref)))
    assert err < 5e-5, err

    print("KERNEL_OK")
</pallas_src>

<mosaic_0001>
module attributes {stable_mosaic.version = 11 : i64} {
  func.func @kernel(%arg0: i32, %arg1: memref<1x32x2304xf32, #tpu.memory_space<vmem>>, %arg2: memref<128x128xf32, #tpu.memory_space<vmem>>, %arg3: memref<128x1xf32, #tpu.memory_space<vmem>>, %arg4: memref<128x2176xf32, #tpu.memory_space<vmem>>, %arg5: memref<128x2176xf32, #tpu.memory_space<vmem>>) attributes {dimension_semantics = [#tpu.dimension_semantics<parallel>], iteration_bounds = array<i64: 1>, scalar_prefetch = 0 : i64, scratch_operands = 1 : i64, tpu.core_type = #tpu.core_type<tc>, window_params = [{transform_indices = @transform_0, window_bounds = array<i64: 1, 32, 2304>}, {pipeline_mode = #tpu.pipeline_mode<synchronous>, transform_indices = @transform_1, window_bounds = array<i64: 128, 128>}, {pipeline_mode = #tpu.pipeline_mode<synchronous>, transform_indices = @transform_2, window_bounds = array<i64: 128, 1>}, {transform_indices = @transform_3, window_bounds = array<i64: 128, 2176>}]} {
    %c0 = arith.constant 0 : index
    %c0_0 = arith.constant 0 : index
    %c0_1 = arith.constant 0 : index
    %0 = vector.load %arg1[%c0, %c0_0, %c0_1] : memref<1x32x2304xf32, #tpu.memory_space<vmem>>, vector<1x32x2176xf32>
    %1 = vector.shape_cast %0 : vector<1x32x2176xf32> to vector<32x2176xf32>
    %c0_2 = arith.constant 0 : index
    %c0_3 = arith.constant 0 : index
    %2 = vector.load %arg5[%c0_2, %c0_3] : memref<128x2176xf32, #tpu.memory_space<vmem>>, vector<32x2176xf32>
    tpu.vector_store %arg5[%c0_2, %c0_3], %1 {strides = array<i32>} : memref<128x2176xf32, #tpu.memory_space<vmem>>, vector<32x2176xf32>,
    %c0_4 = arith.constant 0 : index
    %c0_5 = arith.constant 0 : index
    %c1 = arith.constant 1 : index
    %3 = vector.load %arg1[%c0_4, %c0_5, %c1] : memref<1x32x2304xf32, #tpu.memory_space<vmem>>, vector<1x32x2176xf32>
    %4 = vector.shape_cast %3 : vector<1x32x2176xf32> to vector<32x2176xf32>
    %c32 = arith.constant 32 : index
    %c0_6 = arith.constant 0 : index
    %5 = vector.load %arg5[%c32, %c0_6] : memref<128x2176xf32, #tpu.memory_space<vmem>>, vector<32x2176xf32>
    tpu.vector_store %arg5[%c32, %c0_6], %4 {strides = array<i32>} : memref<128x2176xf32, #tpu.memory_space<vmem>>, vector<32x2176xf32>,
    %c0_7 = arith.constant 0 : index
    %c0_8 = arith.constant 0 : index
    %c46 = arith.constant 46 : index
    %6 = vector.load %arg1[%c0_7, %c0_8, %c46] : memref<1x32x2304xf32, #tpu.memory_space<vmem>>, vector<1x32x2176xf32>
    %7 = vector.shape_cast %6 : vector<1x32x2176xf32> to vector<32x2176xf32>
    %c64 = arith.constant 64 : index
    %c0_9 = arith.constant 0 : index
    %8 = vector.load %arg5[%c64, %c0_9] : memref<128x2176xf32, #tpu.memory_space<vmem>>, vector<32x2176xf32>
    tpu.vector_store %arg5[%c64, %c0_9], %7 {strides = array<i32>} : memref<128x2176xf32, #tpu.memory_space<vmem>>, vector<32x2176xf32>,
    %c0_10 = arith.constant 0 : index
    %c0_11 = arith.constant 0 : index
    %c47 = arith.constant 47 : index
    %9 = vector.load %arg1[%c0_10, %c0_11, %c47] : memref<1x32x2304xf32, #tpu.memory_space<vmem>>, vector<1x32x2176xf32>
    %10 = vector.shape_cast %9 : vector<1x32x2176xf32> to vector<32x2176xf32>
    %c96 = arith.constant 96 : index
    %c0_12 = arith.constant 0 : index
    %11 = vector.load %arg5[%c96, %c0_12] : memref<128x2176xf32, #tpu.memory_space<vmem>>, vector<32x2176xf32>
    tpu.vector_store %arg5[%c96, %c0_12], %10 {strides = array<i32>} : memref<128x2176xf32, #tpu.memory_space<vmem>>, vector<32x2176xf32>,
    %c0_13 = arith.constant 0 : index
    %c0_14 = arith.constant 0 : index
    %12 = vector.load %arg2[%c0_13, %c0_14] : memref<128x128xf32, #tpu.memory_space<vmem>>, vector<128x128xf32>
    %c0_15 = arith.constant 0 : index
    %c0_16 = arith.constant 0 : index
    %13 = vector.load %arg5[%c0_15, %c0_16] : memref<128x2176xf32, #tpu.memory_space<vmem>>, vector<128x2176xf32>
    %cst = arith.constant dense<0.000000e+00> : vector<128x2176xf32>
    %14 = tpu.matmul %12, %13, %cst {dimension_numbers = #tpu.dot_dimension_numbers<[1], [0], [0], [1], [0, 0, 1, 1], [], []>} : vector<128x128xf32>, vector<128x2176xf32>, vector<128x2176xf32> -> vector<128x2176xf32>
    %c0_17 = arith.constant 0 : index
    %c0_18 = arith.constant 0 : index
    %15 = vector.load %arg3[%c0_17, %c0_18] : memref<128x1xf32, #tpu.memory_space<vmem>>, vector<128x1xf32>
    %16 = vector.broadcast %15 : vector<128x1xf32> to vector<128x2176xf32>
    %17 = arith.addf %14, %16 : vector<128x2176xf32>
    %cst_19 = arith.constant 5.000000e-01 : f32
    %18 = vector.broadcast %cst_19 : f32 to vector<128x2176xf32>
    %19 = arith.mulf %18, %17 : vector<128x2176xf32>
    %20 = math.tanh %19 : vector<128x2176xf32>
    %cst_20 = arith.constant 5.000000e-01 : f32
    %21 = vector.broadcast %cst_20 : f32 to vector<128x2176xf32>
    %22 = arith.mulf %21, %20 : vector<128x2176xf32>
    %cst_21 = arith.constant 5.000000e-01 : f32
    %23 = vector.broadcast %cst_21 : f32 to vector<128x2176xf32>
    %24 = arith.addf %22, %23 : vector<128x2176xf32>
    %c0_22 = arith.constant 0 : index
    %c0_23 = arith.constant 0 : index
    %25 = vector.load %arg4[%c0_22, %c0_23] : memref<128x2176xf32, #tpu.memory_space<vmem>>, vector<128x2176xf32>
    tpu.vector_store %arg4[%c0_22, %c0_23], %24 {strides = array<i32>} : memref<128x2176xf32, #tpu.memory_space<vmem>>, vector<128x2176xf32>,
    return
  }
  func.func @transform_0(%arg0: i32) -> (i32, i32, i32) {
    %c0_i32 = arith.constant 0 : i32
    %c0_i32_0 = arith.constant 0 : i32
    %c0_i32_1 = arith.constant 0 : i32
    return %arg0, %c0_i32, %c0_i32_0 : i32, i32, i32
  }
  func.func @transform_1(%arg0: i32) -> (i32, i32) {
    %c0_i32 = arith.constant 0 : i32
    %c0_i32_0 = arith.constant 0 : i32
    %c0_i32_1 = arith.constant 0 : i32
    return %c0_i32, %c0_i32_0 : i32, i32
  }
  func.func @transform_2(%arg0: i32) -> (i32, i32) {
    %c0_i32 = arith.constant 0 : i32
    %c0_i32_0 = arith.constant 0 : i32
    %c0_i32_1 = arith.constant 0 : i32
    return %c0_i32, %c0_i32_0 : i32, i32
  }
  func.func @transform_3(%arg0: i32) -> (i32, i32) {
    %c0_i32 = arith.constant 0 : i32
    %c0_i32_0 = arith.constant 0 : i32
    return %c0_i32, %arg0 : i32, i32
  }
}

</mosaic_0001>

<bundles_post_ra>
// kernel: tile.8
= control target key start
LH: loop header
LB: loop body
LE: loop exit
PB: predicated region body
PF: predicated region fallthrough
CT: control target
= control target key end

     0   :  { %s22_s0 = inlined_call_operand.vmem [shape: f32[32], index: 0, kind: input, shape index: {}]   ;;  %s23_s1 = inlined_call_operand.vmem [shape: f32[4,32], index: 1, kind: output, shape index: {}]  }
   0x1   :  { %v4_v0 = vld [vmem:[%s22_s0] ss:$0 sm:$0xff] }
   0x2   :  { %5 = vst [vmem:[%s23_s1] sm:$0xf] %v4_v0 }

// kernel: tile.0
= control target key start
LH: loop header
LB: loop body
LE: loop exit
PB: predicated region body
PF: predicated region fallthrough
CT: control target
= control target key end

     0   :  { %s546_s8 = smov 125   ;;  %s547_s9 = smov 126   ;;  %vm7_vm0 = vcmask 7168   ;;  %s1101_s0 = inlined_call_operand.vmem [shape: f32[4,32], index: 0, kind: input, shape index: {}]   ;;  %s1102_s1 = inlined_call_operand.vmem [shape: f32[128,1], index: 1, kind: output, shape index: {}]  }
   0x1   :  { %v4_v0 = vld [vmem:[%s1101_s0] sm:$0xf]  ;;  %s545_s0 = smov 127   ;;  %s548_s10 = smov 124  }
   0x2   :  { %5 = vst [vmem:[#allocation0] sm:$0xf] %v4_v0  ;;  %s549_s11 = smov 123   ;;  %s550_s12 = smov 122  }
   0x3   :  { %s551_s13 = smov 121   ;;  %s552_s14 = smov 120  }
   0x4   :  { %s553_s15 = smov 119   ;;  %s554_s16 = smov 118  }
   0x5   :  { %s555_s17 = smov 117   ;;  %s556_s18 = smov 116  }
   0x6   :  { %s557_s19 = smov 115   ;;  %s558_s20 = smov 114  }
   0x7   :  { %s559_s21 = smov 113   ;;  %s560_s22 = smov 112  }
   0x8   :  { %s561_s23 = smov 111   ;;  %s562_s24 = smov 110  }
   0x9   :  { %v15_v1 = vld [vmem:[#allocation0] sm:$0xf]   ;;  %s563_s25 = smov 109   ;;  %s564_s26 = smov 108  }
   0xa   :  { %v39_v2 = vld [vmem:[#allocation0] sm:$0xf]   ;;  %16 = vrot.lane.b32.xlu0 %v15_v1, %s545_s0  ;;  %s565_s27 = smov 107   ;;  %s566_s28 = smov 106  }
   0xb   :  { %40 = vrot.lane.b32.xlu1 %v39_v2, %s546_s8  ;;  %v27_v3 = vld [vmem:[#allocation0] sm:$0xf]   ;;  %s567_s29 = smov 105   ;;  %s568_s30 = smov 104  }
   0xc   :  { %v51_v4 = vld [vmem:[#allocation0] sm:$0xf]  }
   0xd   :  { %v63_v5 = vld [vmem:[#allocation0] sm:$0xf]  }
   0xe   :  { %28 = vrot.lane.b32.xlu0 %v27_v3, %s547_s9  ;;  %v75_v6 = vld [vmem:[#allocation0] sm:$0xf]   ;;  %s569_s9 = smov 103  }
   0xf   :  { %52 = vrot.lane.b32.xlu1 %v51_v4, %s548_s10  ;;  %v87_v7 = vld [vmem:[#allocation0] sm:$0xf]   ;;  %s570_s10 = smov 102  }
  0x10   :  { %v99_v8 = vld [vmem:[#allocation0] sm:$0xf]  }
  0x11   :  { %v111_v9 = vld [vmem:[#allocation0] sm:$0xf]  }
  0x12   :  { %64 = vrot.lane.b32.xlu0 %v63_v5, %s549_s11  ;;  %v123_v10 = vld [vmem:[#allocation0] sm:$0xf]   ;;  %s571_s11 = smov 101  }
  0x13   :  { %76 = vrot.lane.b32.xlu1 %v75_v6, %s550_s12  ;;  %v135_v11 = vld [vmem:[#allocation0] sm:$0xf]   ;;  %s572_s12 = smov 100  }
  0x14   :  { %v147_v12 = vld [vmem:[#allocation0] sm:$0xf]  }
  0x15   :  { %v159_v13 = vld [vmem:[#allocation0] sm:$0xf]  }
  0x16   :  { %88 = vrot.lane.b32.xlu0 %v87_v7, %s551_s13  ;;  %v171_v14 = vld [vmem:[#allocation0] sm:$0xf]   ;;  %s573_s13 = smov 99  }
  0x17   :  { %100 = vrot.lane.b32.xlu1 %v99_v8, %s552_s14  ;;  %v183_v15 = vld [vmem:[#allocation0] sm:$0xf]   ;;  %s574_s14 = smov 98  }
  0x18   :  { %v195_v16 = vld [vmem:[#allocation0] sm:$0xf]  }
  0x19   :  { %v207_v17 = vld [vmem:[#allocation0] sm:$0xf]  }
  0x1a   :  { %112 = vrot.lane.b32.xlu0 %v111_v9, %s553_s15  ;;  %v219_v18 = vld [vmem:[#allocation0] sm:$0xf]   ;;  %s575_s15 = smov 97  }
  0x1b   :  { %124 = vrot.lane.b32.xlu1 %v123_v10, %s554_s16  ;;  %v231_v19 = vld [vmem:[#allocation0] sm:$0xf]  }
  0x1c   :  { %v243_v20 = vld [vmem:[#allocation0] sm:$0xf]  }
  0x1d   :  { %v255_v21 = vld [vmem:[#allocation0] sm:$0xf]  }
  0x1e   :  { %136 = vrot.lane.b32.xlu0 %v135_v11, %s555_s17  ;;  %v267_v22 = vld [vmem:[#allocation0] sm:$0xf]  }
  0x1f   :  { %148 = vrot.lane.b32.xlu1 %v147_v12, %s556_s18  ;;  %v279_v23 = vld [vmem:[#allocation0] sm:$0xf]  }
  0x20   :  { %v291_v24 = vld [vmem:[#allocation0] sm:$0xf]  }
  0x21   :  { %v303_v25 = vld [vmem:[#allocation0] sm:$0xf]  }
  0x22   :  { %160 = vrot.lane.b32.xlu0 %v159_v13, %s557_s19  ;;  %v315_v26 = vld [vmem:[#allocation0] sm:$0xf]  }
  0x23   :  { %172 = vrot.lane.b32.xlu1 %v171_v14, %s558_s20  ;;  %v6_v27 = vld [vmem:[#allocation0] sm:$0xf]  }
  0x24   :  { %8 = vst.msk [vmem:[%s1102_s1] sm:$0x1] %vm7_vm0, %v6_v27   ;;  %387 = vst.msk [vmem:[%s1102_s1 + $0x1f] sm:$0x2] %vm7_vm0, %v6_v27   ;;  %v327_v28 = vld [vmem:[#allocation0] sm:$0xf]  }
  0x25   :  { %388 = vst.msk [vmem:[%s1102_s1 + $0x3e] sm:$0x4] %vm7_vm0, %v6_v27   ;;  %389 = vst.msk [vmem:[%s1102_s1 + $0x5d] sm:$0x8] %vm7_vm0, %v6_v27   ;;  %v339_v29 = vld [vmem:[#allocation0] sm:$0xf]  }
  0x26   :  { %184 = vrot.lane.b32.xlu0 %v183_v15, %s559_s21  ;;  %v351_v30 = vld [vmem:[#allocation0] sm:$0xf]  }
  0x27   :  { %196 = vrot.lane.b32.xlu1 %v195_v16, %s560_s22  ;;  %v363_v31 = vld [vmem:[#allocation0] sm:$0xf]  }
  0x28   :  { %v375_v32 = vld [vmem:[#allocation0] sm:$0xf]  }
  0x2a   :  { %208 = vrot.lane.b32.xlu0 %v207_v17, %s561_s23 }
  0x2b   :  { %220 = vrot.lane.b32.xlu1 %v219_v18, %s562_s24 }
  0x2e   :  { %232 = vrot.lane.b32.xlu0 %v231_v19, %s563_s25 }
  0x2f   :  { %244 = vrot.lane.b32.xlu1 %v243_v20, %s564_s26 }
  0x32   :  { %256 = vrot.lane.b32.xlu0 %v255_v21, %s565_s27 }
  0x33   :  { %268 = vrot.lane.b32.xlu1 %v267_v22, %s566_s28 }
  0x36   :  { %280 = vrot.lane.b32.xlu0 %v279_v23, %s567_s29 }
  0x37   :  { %292 = vrot.lane.b32.xlu1 %v291_v24, %s568_s30 }
  0x3a   :  { %304 = vrot.lane.b32.xlu0 %v303_v25, %s569_s9 }
  0x3b   :  { %316 = vrot.lane.b32.xlu1 %v315_v26, %s570_s10 }
  0x3e   :  { %328 = vrot.lane.b32.xlu0 %v327_v28, %s571_s11 }
  0x3f   :  { %340 = vrot.lane.b32.xlu1 %v339_v29, %s572_s12 }
  0x42   :  { %352 = vrot.lane.b32.xlu0 %v351_v30, %s573_s13 }
  0x43   :  { %364 = vrot.lane.b32.xlu1 %v363_v31, %s574_s14 }
  0x46   :  { %376 = vrot.lane.b32.xlu0 %v375_v32, %s575_s15 }
  0x7c   :  { %v17_v33 = vpop.permute.xlu0 %16  }
  0x7d   :  { %v41_v34 = vpop.permute.xlu1 %40   ;;  %390 = vst.msk [vmem:[%s1102_s1 + $0x1] sm:$0x1] %vm7_vm0, %v17_v33   ;;  %391 = vst.msk [vmem:[%s1102_s1 + $0x20] sm:$0x2] %vm7_vm0, %v17_v33  }
  0x7e   :  { %392 = vst.msk [vmem:[%s1102_s1 + $0x3f] sm:$0x4] %vm7_vm0, %v17_v33   ;;  %393 = vst.msk [vmem:[%s1102_s1 + $0x5e] sm:$0x8] %vm7_vm0, %v17_v33  }
  0x7f   :  { %398 = vst.msk [vmem:[%s1102_s1 + $0x3] sm:$0x1] %vm7_vm0, %v41_v34   ;;  %399 = vst.msk [vmem:[%s1102_s1 + $0x22] sm:$0x2] %vm7_vm0, %v41_v34  }
  0x80   :  { %400 = vst.msk [vmem:[%s1102_s1 + $0x41] sm:$0x4] %vm7_vm0, %v41_v34   ;;  %401 = vst.msk [vmem:[%s1102_s1 + $0x60] sm:$0x8] %vm7_vm0, %v41_v34   ;;  %v29_v35 = vpop.permute.xlu0 %28  }
  0x81   :  { %v53_v36 = vpop.permute.xlu1 %52   ;;  %394 = vst.msk [vmem:[%s1102_s1 + $0x2] sm:$0x1] %vm7_vm0, %v29_v35   ;;  %395 = vst.msk [vmem:[%s1102_s1 + $0x21] sm:$0x2] %vm7_vm0, %v29_v35  }
  0x82   :  { %396 = vst.msk [vmem:[%s1102_s1 + $0x40] sm:$0x4] %vm7_vm0, %v29_v35   ;;  %397 = vst.msk [vmem:[%s1102_s1 + $0x5f] sm:$0x8] %vm7_vm0, %v29_v35  }
  0x83   :  { %402 = vst.msk [vmem:[%s1102_s1 + $0x4] sm:$0x1] %vm7_vm0, %v53_v36   ;;  %403 = vst.msk [vmem:[%s1102_s1 + $0x23] sm:$0x2] %vm7_vm0, %v53_v36  }
  0x84   :  { %404 = vst.msk [vmem:[%s1102_s1 + $0x42] sm:$0x4] %vm7_vm0, %v53_v36   ;;  %405 = vst.msk [vmem:[%s1102_s1 + $0x61] sm:$0x8] %vm7_vm0, %v53_v36   ;;  %v65_v37 = vpop.permute.xlu0 %64  }
  0x85   :  { %v77_v38 = vpop.permute.xlu1 %76   ;;  %406 = vst.msk [vmem:[%s1102_s1 + $0x5] sm:$0x1] %vm7_vm0, %v65_v37   ;;  %407 = vst.msk [vmem:[%s1102_s1 + $0x24] sm:$0x2] %vm7_vm0, %v65_v37  }
  0x86   :  { %408 = vst.msk [vmem:[%s1102_s1 + $0x43] sm:$0x4] %vm7_vm0, %v65_v37   ;;  %409 = vst.msk [vmem:[%s1102_s1 + $0x62] sm:$0x8] %vm7_vm0, %v65_v37  }
  0x87   :  { %410 = vst.msk [vmem:[%s1102_s1 + $0x6] sm:$0x1] %vm7_vm0, %v77_v38   ;;  %411 = vst.msk [vmem:[%s1102_s1 + $0x25] sm:$0x2] %vm7_vm0, %v77_v38  }
  0x88   :  { %412 = vst.msk [vmem:[%s1102_s1 + $0x44] sm:$0x4] %vm7_vm0, %v77_v38   ;;  %413 = vst.msk [vmem:[%s1102_s1 + $0x63] sm:$0x8] %vm7_vm0, %v77_v38   ;;  %v89_v39 = vpop.permute.xlu0 %88  }
  0x89   :  { %v101_v40 = vpop.permute.xlu1 %100   ;;  %414 = vst.msk [vmem:[%s1102_s1 + $0x7] sm:$0x1] %vm7_vm0, %v89_v39   ;;  %415 = vst.msk [vmem:[%s1102_s1 + $0x26] sm:$0x2] %vm7_vm0, %v89_v39  }
  0x8a   :  { %416 = vst.msk [vmem:[%s1102_s1 + $0x45] sm:$0x4] %vm7_vm0, %v89_v39   ;;  %417 = vst.msk [vmem:[%s1102_s1 + $0x64] sm:$0x8] %vm7_vm0, %v89_v39  }
  0x8b   :  { %418 = vst.msk [vmem:[%s1102_s1 + $0x8] sm:$0x1] %vm7_vm0, %v101_v40   ;;  %419 = vst.msk [vmem:[%s1102_s1 + $0x27] sm:$0x2] %vm7_vm0, %v101_v40  }
  0x8c   :  { %420 = vst.msk [vmem:[%s1102_s1 + $0x46] sm:$0x4] %vm7_vm0, %v101_v40   ;;  %421 = vst.msk [vmem:[%s1102_s1 + $0x65] sm:$0x8] %vm7_vm0, %v101_v40   ;;  %v113_v41 = vpop.permute.xlu0 %112  }
  0x8d   :  { %v125_v42 = vpop.permute.xlu1 %124   ;;  %422 = vst.msk [vmem:[%s1102_s1 + $0x9] sm:$0x1] %vm7_vm0, %v113_v41   ;;  %423 = vst.msk [vmem:[%s1102_s1 + $0x28] sm:$0x2] %vm7_vm0, %v113_v41  }
  0x8e   :  { %424 = vst.msk [vmem:[%s1102_s1 + $0x47] sm:$0x4] %vm7_vm0, %v113_v41   ;;  %425 = vst.msk [vmem:[%s1102_s1 + $0x66] sm:$0x8] %vm7_vm0, %v113_v41  }
  0x8f   :  { %426 = vst.msk [vmem:[%s1102_s1 + $0xa] sm:$0x1] %vm7_vm0, %v125_v42   ;;  %427 = vst.msk [vmem:[%s1102_s1 + $0x29] sm:$0x2] %vm7_vm0, %v125_v42  }
  0x90   :  { %428 = vst.msk [vmem:[%s1102_s1 + $0x48] sm:$0x4] %vm7_vm0, %v125_v42   ;;  %429 = vst.msk [vmem:[%s1102_s1 + $0x67] sm:$0x8] %vm7_vm0, %v125_v42   ;;  %v137_v43 = vpop.permute.xlu0 %136  }
  0x91   :  { %v149_v44 = vpop.permute.xlu1 %148   ;;  %430 = vst.msk [vmem:[%s1102_s1 + $0xb] sm:$0x1] %vm7_vm0, %v137_v43   ;;  %431 = vst.msk [vmem:[%s1102_s1 + $0x2a] sm:$0x2] %vm7_vm0, %v137_v43  }
  0x92   :  { %432 = vst.msk [vmem:[%s1102_s1 + $0x49] sm:$0x4] %vm7_vm0, %v137_v43   ;;  %433 = vst.msk [vmem:[%s1102_s1 + $0x68] sm:$0x8] %vm7_vm0, %v137_v43  }
  0x93   :  { %434 = vst.msk [vmem:[%s1102_s1 + $0xc] sm:$0x1] %vm7_vm0, %v149_v44   ;;  %435 = vst.msk [vmem:[%s1102_s1 + $0x2b] sm:$0x2] %vm7_vm0, %v149_v44  }
  0x94   :  { %436 = vst.msk [vmem:[%s1102_s1 + $0x4a] sm:$0x4] %vm7_vm0, %v149_v44   ;;  %437 = vst.msk [vmem:[%s1102_s1 + $0x69] sm:$0x8] %vm7_vm0, %v149_v44   ;;  %v161_v45 = vpop.permute.xlu0 %160  }
  0x95   :  { %v173_v46 = vpop.permute.xlu1 %172   ;;  %438 = vst.msk [vmem:[%s1102_s1 + $0xd] sm:$0x1] %vm7_vm0, %v161_v45   ;;  %439 = vst.msk [vmem:[%s1102_s1 + $0x2c] sm:$0x2] %vm7_vm0, %v161_v45  }
  0x96   :  { %440 = vst.msk [vmem:[%s1102_s1 + $0x4b] sm:$0x4] %vm7_vm0, %v161_v45   ;;  %441 = vst.msk [vmem:[%s1102_s1 + $0x6a] sm:$0x8] %vm7_vm0, %v161_v45  }
  0x97   :  { %442 = vst.msk [vmem:[%s1102_s1 + $0xe] sm:$0x1] %vm7_vm0, %v173_v46   ;;  %443 = vst.msk [vmem:[%s1102_s1 + $0x2d] sm:$0x2] %vm7_vm0, %v173_v46  }
  0x98   :  { %444 = vst.msk [vmem:[%s1102_s1 + $0x4c] sm:$0x4] %vm7_vm0, %v173_v46   ;;  %445 = vst.msk [vmem:[%s1102_s1 + $0x6b] sm:$0x8] %vm7_vm0, %v173_v46   ;;  %v185_v47 = vpop.permute.xlu0 %184  }
  0x99   :  { %v197_v48 = vpop.permute.xlu1 %196   ;;  %446 = vst.msk [vmem:[%s1102_s1 + $0xf] sm:$0x1] %vm7_vm0, %v185_v47   ;;  %447 = vst.msk [vmem:[%s1102_s1 + $0x2e] sm:$0x2] %vm7_vm0, %v185_v47  }
  0x9a   :  { %448 = vst.msk [vmem:[%s1102_s1 + $0x4d] sm:$0x4] %vm7_vm0, %v185_v47   ;;  %449 = vst.msk [vmem:[%s1102_s1 + $0x6c] sm:$0x8] %vm7_vm0, %v185_v47  }
  0x9b   :  { %450 = vst.msk [vmem:[%s1102_s1 + $0x10] sm:$0x1] %vm7_vm0, %v197_v48   ;;  %451 = vst.msk [vmem:[%s1102_s1 + $0x2f] sm:$0x2] %vm7_vm0, %v197_v48  }
  0x9c   :  { %452 = vst.msk [vmem:[%s1102_s1 + $0x4e] sm:$0x4] %vm7_vm0, %v197_v48   ;;  %453 = vst.msk [vmem:[%s1102_s1 + $0x6d] sm:$0x8] %vm7_vm0, %v197_v48   ;;  %v209_v49 = vpop.permute.xlu0 %208  }
  0x9d   :  { %v221_v50 = vpop.permute.xlu1 %220   ;;  %454 = vst.msk [vmem:[%s1102_s1 + $0x11] sm:$0x1] %vm7_vm0, %v209_v49   ;;  %455 = vst.msk [vmem:[%s1102_s1 + $0x30] sm:$0x2] %vm7_vm0, %v209_v49  }
  0x9e   :  { %456 = vst.msk [vmem:[%s1102_s1 + $0x4f] sm:$0x4] %vm7_vm0, %v209_v49   ;;  %457 = vst.msk [vmem:[%s1102_s1 + $0x6e] sm:$0x8] %vm7_vm0, %v209_v49  }
  0x9f   :  { %458 = vst.msk [vmem:[%s1102_s1 + $0x12] sm:$0x1] %vm7_vm0, %v221_v50   ;;  %459 = vst.msk [vmem:[%s1102_s1 + $0x31] sm:$0x2] %vm7_vm0, %v221_v50  }
  0xa0   :  { %460 = vst.msk [vmem:[%s1102_s1 + $0x50] sm:$0x4] %vm7_vm0, %v221_v50   ;;  %461 = vst.msk [vmem:[%s1102_s1 + $0x6f] sm:$0x8] %vm7_vm0, %v221_v50   ;;  %v233_v51 = vpop.permute.xlu0 %232  }
  0xa1   :  { %v245_v52 = vpop.permute.xlu1 %244   ;;  %462 = vst.msk [vmem:[%s1102_s1 + $0x13] sm:$0x1] %vm7_vm0, %v233_v51   ;;  %463 = vst.msk [vmem:[%s1102_s1 + $0x32] sm:$0x2] %vm7_vm0, %v233_v51  }
  0xa2   :  { %464 = vst.msk [vmem:[%s1102_s1 + $0x51] sm:$0x4] %vm7_vm0, %v233_v51   ;;  %465 = vst.msk [vmem:[%s1102_s1 + $0x70] sm:$0x8] %vm7_vm0, %v233_v51  }
  0xa3   :  { %466 = vst.msk [vmem:[%s1102_s1 + $0x14] sm:$0x1] %vm7_vm0, %v245_v52   ;;  %467 = vst.msk [vmem:[%s1102_s1 + $0x33] sm:$0x2] %vm7_vm0, %v245_v52  }
  0xa4   :  { %468 = vst.msk [vmem:[%s1102_s1 + $0x52] sm:$0x4] %vm7_vm0, %v245_v52   ;;  %469 = vst.msk [vmem:[%s1102_s1 + $0x71] sm:$0x8] %vm7_vm0, %v245_v52   ;;  %v257_v53 = vpop.permute.xlu0 %256  }
  0xa5   :  { %v269_v54 = vpop.permute.xlu1 %268   ;;  %470 = vst.msk [vmem:[%s1102_s1 + $0x15] sm:$0x1] %vm7_vm0, %v257_v53   ;;  %471 = vst.msk [vmem:[%s1102_s1 + $0x34] sm:$0x2] %vm7_vm0, %v257_v53  }
  0xa6   :  { %472 = vst.msk [vmem:[%s1102_s1 + $0x53] sm:$0x4] %vm7_vm0, %v257_v53   ;;  %473 = vst.msk [vmem:[%s1102_s1 + $0x72] sm:$0x8] %vm7_vm0, %v257_v53  }
  0xa7   :  { %474 = vst.msk [vmem:[%s1102_s1 + $0x16] sm:$0x1] %vm7_vm0, %v269_v54   ;;  %475 = vst.msk [vmem:[%s1102_s1 + $0x35] sm:$0x2] %vm7_vm0, %v269_v54  }
  0xa8   :  { %476 = vst.msk [vmem:[%s1102_s1 + $0x54] sm:$0x4] %vm7_vm0, %v269_v54   ;;  %477 = vst.msk [vmem:[%s1102_s1 + $0x73] sm:$0x8] %vm7_vm0, %v269_v54   ;;  %v281_v55 = vpop.permute.xlu0 %280  }
  0xa9   :  { %v293_v56 = vpop.permute.xlu1 %292   ;;  %478 = vst.msk [vmem:[%s1102_s1 + $0x17] sm:$0x1] %vm7_vm0, %v281_v55   ;;  %479 = vst.msk [vmem:[%s1102_s1 + $0x36] sm:$0x2] %vm7_vm0, %v281_v55  }
  0xaa   :  { %480 = vst.msk [vmem:[%s1102_s1 + $0x55] sm:$0x4] %vm7_vm0, %v281_v55   ;;  %481 = vst.msk [vmem:[%s1102_s1 + $0x74] sm:$0x8] %vm7_vm0, %v281_v55  }
  0xab   :  { %482 = vst.msk [vmem:[%s1102_s1 + $0x18] sm:$0x1] %vm7_vm0, %v293_v56   ;;  %483 = vst.msk [vmem:[%s1102_s1 + $0x37] sm:$0x2] %vm7_vm0, %v293_v56  }
  0xac   :  { %484 = vst.msk [vmem:[%s1102_s1 + $0x56] sm:$0x4] %vm7_vm0, %v293_v56   ;;  %485 = vst.msk [vmem:[%s1102_s1 + $0x75] sm:$0x8] %vm7_vm0, %v293_v56   ;;  %v305_v57 = vpop.permute.xlu0 %304  }
  0xad   :  { %v317_v58 = vpop.permute.xlu1 %316   ;;  %486 = vst.msk [vmem:[%s1102_s1 + $0x19] sm:$0x1] %vm7_vm0, %v305_v57   ;;  %487 = vst.msk [vmem:[%s1102_s1 + $0x38] sm:$0x2] %vm7_vm0, %v305_v57  }
  0xae   :  { %488 = vst.msk [vmem:[%s1102_s1 + $0x57] sm:$0x4] %vm7_vm0, %v305_v57   ;;  %489 = vst.msk [vmem:[%s1102_s1 + $0x76] sm:$0x8] %vm7_vm0, %v305_v57  }
  0xaf   :  { %490 = vst.msk [vmem:[%s1102_s1 + $0x1a] sm:$0x1] %vm7_vm0, %v317_v58   ;;  %491 = vst.msk [vmem:[%s1102_s1 + $0x39] sm:$0x2] %vm7_vm0, %v317_v58  }
  0xb0   :  { %492 = vst.msk [vmem:[%s1102_s1 + $0x58] sm:$0x4] %vm7_vm0, %v317_v58   ;;  %493 = vst.msk [vmem:[%s1102_s1 + $0x77] sm:$0x8] %vm7_vm0, %v317_v58   ;;  %v329_v59 = vpop.permute.xlu0 %328  }
  0xb1   :  { %v341_v60 = vpop.permute.xlu1 %340   ;;  %494 = vst.msk [vmem:[%s1102_s1 + $0x1b] sm:$0x1] %vm7_vm0, %v329_v59   ;;  %495 = vst.msk [vmem:[%s1102_s1 + $0x3a] sm:$0x2] %vm7_vm0, %v329_v59  }
  0xb2   :  { %496 = vst.msk [vmem:[%s1102_s1 + $0x59] sm:$0x4] %vm7_vm0, %v329_v59   ;;  %497 = vst.msk [vmem:[%s1102_s1 + $0x78] sm:$0x8] %vm7_vm0, %v329_v59  }
  0xb3   :  { %498 = vst.msk [vmem:[%s1102_s1 + $0x1c] sm:$0x1] %vm7_vm0, %v341_v60   ;;  %499 = vst.msk [vmem:[%s1102_s1 + $0x3b] sm:$0x2] %vm7_vm0, %v341_v60  }
  0xb4   :  { %500 = vst.msk [vmem:[%s1102_s1 + $0x5a] sm:$0x4] %vm7_vm0, %v341_v60   ;;  %501 = vst.msk [vmem:[%s1102_s1 + $0x79] sm:$0x8] %vm7_vm0, %v341_v60   ;;  %v353_v61 = vpop.permute.xlu0 %352  }
  0xb5   :  { %v365_v62 = vpop.permute.xlu1 %364   ;;  %502 = vst.msk [vmem:[%s1102_s1 + $0x1d] sm:$0x1] %vm7_vm0, %v353_v61   ;;  %503 = vst.msk [vmem:[%s1102_s1 + $0x3c] sm:$0x2] %vm7_vm0, %v353_v61  }
  0xb6   :  { %504 = vst.msk [vmem:[%s1102_s1 + $0x5b] sm:$0x4] %vm7_vm0, %v353_v61   ;;  %505 = vst.msk [vmem:[%s1102_s1 + $0x7a] sm:$0x8] %vm7_vm0, %v353_v61  }
  0xb7   :  { %506 = vst.msk [vmem:[%s1102_s1 + $0x1e] sm:$0x1] %vm7_vm0, %v365_v62   ;;  %507 = vst.msk [vmem:[%s1102_s1 + $0x3d] sm:$0x2] %vm7_vm0, %v365_v62  }
  0xb8   :  { %508 = vst.msk [vmem:[%s1102_s1 + $0x5c] sm:$0x4] %vm7_vm0, %v365_v62   ;;  %509 = vst.msk [vmem:[%s1102_s1 + $0x7b] sm:$0x8] %vm7_vm0, %v365_v62   ;;  %v377_v63 = vpop.permute.xlu0 %376  }
  0xb9   :  { %510 = vst.msk [vmem:[%s1102_s1 + $0x1f] sm:$0x1] %vm7_vm0, %v377_v63   ;;  %511 = vst.msk [vmem:[%s1102_s1 + $0x3e] sm:$0x2] %vm7_vm0, %v377_v63  }
  0xba   :  { %512 = vst.msk [vmem:[%s1102_s1 + $0x5d] sm:$0x4] %vm7_vm0, %v377_v63   ;;  %513 = vst.msk [vmem:[%s1102_s1 + $0x7c] sm:$0x8] %vm7_vm0, %v377_v63  }

// kernel: conv_transpose2d_sigmoid.1
= control target key start
LH: loop header
LB: loop body
LE: loop exit
PB: predicated region body
PF: predicated region fallthrough
CT: control target
= control target key end

     0   :  { %s6318_s28 = smov 127   ;;  %s6319_s26 = smov 82   ;;  %v10215_v41 = vmov 0.0   ;;  %vm438_vm0 = vcmask 1039360   ;;  %vm931_vm1 = vcmask 670720   ;;  %vm1424_vm2 = vcmask 662528   ;;  %s10188_s0 = inlined_call_operand.vmem [shape: f32[1,32,2304], index: 0, kind: input, shape index: {}]   ;;  %s10189_s1 = inlined_call_operand.vmem [shape: f32[128,128], index: 1, kind: input, shape index: {}]   ;;  %s10190_s2 = inlined_call_operand.vmem [shape: f32[128,1], index: 2, kind: input, shape index: {}]   ;;  %s10191_s3 = inlined_call_operand.vmem [shape: f32[128,2176], index: 3, kind: output, shape index: {}]  }
   0x1   :  { %v169_v0 = vld [vmem:[%s10188_s0 + $0x98] sm:$0xff]  ;;  %v170_v1 = vld [vmem:[%s10188_s0 + $0xa0] sm:$0xff]  ;;  %v151_v2 = vld [vmem:[%s10188_s0 + $0x8] sm:$0xff]  ;;  %s6320_s27 = smov 81   ;;  %2077 = vmatprep.mubr.f32.mxu0 %v10215_v41  ;;  %2238 = vmatprep.mubr.f32.mxu1 %v10215_v41 }
   0x2   :  { %v6352_v3 = vpack.i.bf16 %v170_v1, %v169_v0  ;;  %v152_v4 = vld [vmem:[%s10188_s0 + $0x10] sm:$0xff]  ;;  %v171_v5 = vld [vmem:[%s10188_s0 + $0xa8] sm:$0xff]  ;;  %v4898_v7 = vpack.c.bf16 %v169_v0, %v151_v2  ;;  %v153_v9 = vld [vmem:[%s10188_s0 + $0x18] sm:$0xff] }
   0x3   :  { %v172_v6 = vld [vmem:[%s10188_s0 + $0xb0] sm:$0xff]  ;;  %v5207_v8 = vpack.i.bf16 %v152_v4, %v151_v2  ;;  %v154_v10 = vld [vmem:[%s10188_s0 + $0x20] sm:$0xff]  ;;  %v4932_v11 = vpack.c.bf16 %v170_v1, %v152_v4  ;;  %v4930_v15 = vpack.c.bf16 %v171_v5, %v153_v9  ;;  %v187_v17 = vld [vmem:[%s10188_s0 + $0x128] sm:$0xff] }
   0x4   :  { %5218 = vrot.lane.b32.xlu1 %v6352_v3, %s6318_s28  ;;  %v5222_v12 = vpack.i.bf16 %v172_v6, %v171_v5  ;;  %v150_v13 = vld [vmem:[%s10188_s0] sm:$0xff]  ;;  %v168_v14 = vld [vmem:[%s10188_s0 + $0x90] sm:$0xff]  ;;  %4899 = vmatprep.subr.bf16.mxu0 %v4898_v7  ;;  %v5212_v16 = vpack.i.bf16 %v154_v10, %v153_v9  ;;  %v205_v19 = vld [vmem:[%s10188_s0 + $0x1b8] sm:$0xff] }
   0x5   :  { %5208 = vrot.lane.b32.xlu0 %v5207_v8, %s6318_s28  ;;  %v188_v18 = vld [vmem:[%s10188_s0 + $0x130] sm:$0xff]  ;;  %v4900_v20 = vpack.c.bf16 %v168_v14, %v150_v13  ;;  %v206_v21 = vld [vmem:[%s10188_s0 + $0x1c0] sm:$0xff]  ;;  %4931 = vmatprep.subr.bf16.mxu1 %v4930_v15  ;;  %v4902_v24 = vpack.c.bf16 %v205_v19, %v187_v17  ;;  %v189_v25 = vld [vmem:[%s10188_s0 + $0x138] sm:$0xff]  ;;  %v5227_v31 = vpack.i.bf16 %v168_v14, %v150_v13 }
   0x6   :  { %v186_v22 = vld [vmem:[%s10188_s0 + $0x120] sm:$0xff]  ;;  %v204_v23 = vld [vmem:[%s10188_s0 + $0x1b0] sm:$0xff]  ;;  %v207_v26 = vld [vmem:[%s10188_s0 + $0x1c8] sm:$0xff]  ;;  %4933 = vmatpush1.bf16.msra.mxu1 %v4932_v11  ;;  %v4936_v28 = vpack.c.bf16 %v206_v21, %v188_v18  ;;  %v5232_v29 = vpack.i.bf16 %v188_v18, %v187_v17  ;;  %v5242_v33 = vpack.i.bf16 %v206_v21, %v205_v19 }
   0x7   :  { %4901 = vmatpush1.bf16.msra.mxu0 %v4900_v20  ;;  %v4904_v27 = vpack.c.bf16 %v204_v23, %v186_v22  ;;  %v4934_v30 = vpack.c.bf16 %v207_v26, %v189_v25  ;;  %v190_v32 = vld [vmem:[%s10188_s0 + $0x140] sm:$0xff]  ;;  %v208_v35 = vld [vmem:[%s10188_s0 + $0x1d0] sm:$0xff]  ;;  %v5252_v36 = vpack.i.bf16 %v204_v23, %v186_v22  ;;  %v6437_v38 = vld [vmem:[%s10188_s0 + $0x28] sm:$0xff] }
   0x8   :  { %5223 = vrot.lane.b32.xlu1 %v5222_v12, %s6318_s28  ;;  %4903 = vmatprep.subr.bf16.mxu0 %v4902_v24  ;;  %v5237_v34 = vpack.i.bf16 %v190_v32, %v189_v25  ;;  %v5247_v37 = vpack.i.bf16 %v208_v35, %v207_v26  ;;  %v6442_v39 = vld [vmem:[%s10188_s0 + $0xb8] sm:$0xff]  ;;  %v158_v43 = vld [vmem:[%s10188_s0 + $0x40] sm:$0xff]  ;;  %v6461_v44 = vld [vmem:[%s10188_s0 + $0x148] sm:$0xff] }
   0x9   :  { %5213 = vrot.lane.b32.xlu0 %v5212_v16, %s6318_s28  ;;  %4935 = vmatprep.subr.bf16.mxu1 %v4934_v30  ;;  %v4962_v40 = vpack.c.bf16 %v6442_v39, %v6437_v38  ;;  %v6452_v42 = vld [vmem:[%s10188_s0 + $0x38] sm:$0xff]  ;;  %v6471_v46 = vld [vmem:[%s10188_s0 + $0x30] sm:$0xff]  ;;  %v6476_v47 = vld [vmem:[%s10188_s0 + $0xc0] sm:$0xff] }
   0xa   :  { %4937 = vmatpush1.bf16.msra.mxu1 %v4936_v28  ;;  %v6466_v45 = vld [vmem:[%s10188_s0 + $0x1d8] sm:$0xff]  ;;  %v6481_v48 = vld [vmem:[%s10188_s0 + $0xc8] sm:$0xff]  ;;  %v4996_v51 = vpack.c.bf16 %v6476_v47, %v6471_v46  ;;  %v5362_v52 = vpack.i.bf16 %v158_v43, %v6452_v42  ;;  %v5357_v53 = vpack.i.bf16 %v6471_v46, %v6437_v38  ;;  %v176_v54 = vld [vmem:[%s10188_s0 + $0xd0] sm:$0xff]  ;;  %v5367_v56 = vpack.i.bf16 %v6476_v47, %v6442_v39 }
   0xb   :  { %4905 = vmatpush1.bf16.msra.mxu0 %v4904_v27  ;;  %v4966_v49 = vpack.c.bf16 %v6466_v45, %v6461_v44  ;;  %v4994_v50 = vpack.c.bf16 %v6481_v48, %v6452_v42  ;;  %v5372_v55 = vpack.i.bf16 %v176_v54, %v6481_v48  ;;  %v193_v57 = vld [vmem:[%s10188_s0 + $0x158] sm:$0xff]  ;;  %v194_v58 = vld [vmem:[%s10188_s0 + $0x160] sm:$0xff]  ;;  %v192_v59 = vld [vmem:[%s10188_s0 + $0x150] sm:$0xff] }
   0xc   :  { %5233 = vrot.lane.b32.xlu1 %v5232_v29, %s6318_s28  ;;  %v5382_v60 = vpack.i.bf16 %v194_v58, %v193_v57  ;;  %v5377_v61 = vpack.i.bf16 %v192_v59, %v6461_v44  ;;  %v211_v62 = vld [vmem:[%s10188_s0 + $0x1e8] sm:$0xff]  ;;  %v212_v63 = vld [vmem:[%s10188_s0 + $0x1f0] sm:$0xff]  ;;  %v210_v0 = vld [vmem:[%s10188_s0 + $0x1e0] sm:$0xff] }
   0xd   :  { %5228 = vrot.lane.b32.xlu0 %v5227_v31, %s6318_s28  ;;  %v5392_v1 = vpack.i.bf16 %v212_v63, %v211_v62  ;;  %v5387_v2 = vpack.i.bf16 %v210_v0, %v6466_v45  ;;  %v162_v4 = vld [vmem:[%s10188_s0 + $0x60] sm:$0xff]  ;;  %v159_v5 = vld [vmem:[%s10188_s0 + $0x48] sm:$0xff]  ;;  %v160_v6 = vld [vmem:[%s10188_s0 + $0x50] sm:$0xff] }
   0xe   :  { %v179_v9 = vld [vmem:[%s10188_s0 + $0xe8] sm:$0xff]  ;;  %v180_v10 = vld [vmem:[%s10188_s0 + $0xf0] sm:$0xff]  ;;  %v177_v11 = vld [vmem:[%s10188_s0 + $0xd8] sm:$0xff] }
   0xf   :  { %v6574_v13 = vpack.i.bf16 %v180_v10, %v179_v9  ;;  %v197_v15 = vld [vmem:[%s10188_s0 + $0x178] sm:$0xff]  ;;  %v195_v17 = vld [vmem:[%s10188_s0 + $0x168] sm:$0xff]  ;;  %v196_v18 = vld [vmem:[%s10188_s0 + $0x170] sm:$0xff] }
  0x10   :  { %5243 = vrot.lane.b32.xlu1 %v5242_v33, %s6318_s28  ;;  %v6598_v20 = vpack.i.bf16 %v196_v18, %v195_v17  ;;  %v215_v21 = vld [vmem:[%s10188_s0 + $0x208] sm:$0xff]  ;;  %v216_v22 = vld [vmem:[%s10188_s0 + $0x210] sm:$0xff]  ;;  %v213_v24 = vld [vmem:[%s10188_s0 + $0x1f8] sm:$0xff] }
  0x11   :  { %5238 = vrot.lane.b32.xlu0 %v5237_v34, %s6318_s28  ;;  %v214_v25 = vld [vmem:[%s10188_s0 + $0x200] sm:$0xff]  ;;  %v6901_v38 = vld [vmem:[%s10189_s1 + $0x8] sm:$0xff]  ;;  %v54_v46 = vld [vmem:[%s10188_s0 + $0x150] sm:$0xff] }
  0x12   :  { %v6618_v32 = vpack.i.bf16 %v214_v25, %v213_v24  ;;  %v71_v47 = vld [vmem:[%s10188_s0 + $0x1e0] sm:$0xff] }
  0x14   :  { %5253 = vrot.lane.b32.xlu1 %v5252_v36, %s6318_s28 }
  0x15   :  { %5248 = vrot.lane.b32.xlu0 %v5247_v37, %s6318_s28 }
  0x18   :  { %5263 = vrot.lane.b32.xlu1 %v5212_v16, %s6319_s26 }
  0x19   :  { %5258 = vrot.lane.b32.xlu0 %v5207_v8, %s6319_s26 }
  0x1c   :  { %5273 = vrot.lane.b32.xlu1 %v5222_v12, %s6319_s26 }
  0x1d   :  { %5268 = vrot.lane.b32.xlu0 %v6352_v3, %s6319_s26 }
  0x20   :  { %5283 = vrot.lane.b32.xlu1 %v5232_v29, %s6319_s26 }
  0x21   :  { %5278 = vrot.lane.b32.xlu0 %v5227_v31, %s6319_s26 }
  0x24   :  { %5293 = vrot.lane.b32.xlu1 %v5242_v33, %s6319_s26 }
  0x25   :  { %5288 = vrot.lane.b32.xlu0 %v5237_v34, %s6319_s26 }
  0x28   :  { %5303 = vrot.lane.b32.xlu1 %v5252_v36, %s6319_s26 }
  0x29   :  { %5298 = vrot.lane.b32.xlu0 %v5247_v37, %s6319_s26 }
  0x2c   :  { %5313 = vrot.lane.b32.xlu1 %v5212_v16, %s6320_s27  ;;  %v198_v16 = vld [vmem:[%s10188_s0 + $0x180] sm:$0xff] }
  0x2d   :  { %5308 = vrot.lane.b32.xlu0 %v5207_v8, %s6320_s27  ;;  %v6558_v8 = vpack.i.bf16 %v160_v6, %v159_v5  ;;  %v6594_v19 = vpack.i.bf16 %v198_v16, %v197_v15 }
  0x30   :  { %5323 = vrot.lane.b32.xlu1 %v5222_v12, %s6320_s27  ;;  %v178_v12 = vld [vmem:[%s10188_s0 + $0xe0] sm:$0xff] }
  0x31   :  { %5318 = vrot.lane.b32.xlu0 %v6352_v3, %s6320_s27  ;;  %v161_v3 = vld [vmem:[%s10188_s0 + $0x58] sm:$0xff]  ;;  %v6578_v14 = vpack.i.bf16 %v178_v12, %v177_v11 }
  0x32   :  { %v6555_v7 = vpack.i.bf16 %v162_v4, %v161_v3 }
  0x34   :  { %5333 = vrot.lane.b32.xlu1 %v5232_v29, %s6320_s27 }
  0x35   :  { %5328 = vrot.lane.b32.xlu0 %v5227_v31, %s6320_s27  ;;  %v6614_v31 = vpack.i.bf16 %v216_v22, %v215_v21 }
  0x38   :  { %5343 = vrot.lane.b32.xlu1 %v5242_v33, %s6320_s27 }
  0x39   :  { %5338 = vrot.lane.b32.xlu0 %v5237_v34, %s6320_s27 }
  0x3c   :  { %5353 = vrot.lane.b32.xlu1 %v5252_v36, %s6320_s27 }
  0x3d   :  { %5348 = vrot.lane.b32.xlu0 %v5247_v37, %s6320_s27 }
  0x40   :  { %5363 = vrot.lane.b32.xlu1 %v5362_v52, %s6318_s28 }
  0x41   :  { %5358 = vrot.lane.b32.xlu0 %v5357_v53, %s6318_s28 }
  0x44   :  { %5373 = vrot.lane.b32.xlu1 %v5372_v55, %s6318_s28 }
  0x45   :  { %5368 = vrot.lane.b32.xlu0 %v5367_v56, %s6318_s28 }
  0x48   :  { %5383 = vrot.lane.b32.xlu1 %v5382_v60, %s6318_s28 }
  0x49   :  { %5378 = vrot.lane.b32.xlu0 %v5377_v61, %s6318_s28 }
  0x4c   :  { %5393 = vrot.lane.b32.xlu1 %v5392_v1, %s6318_s28 }
  0x4d   :  { %5388 = vrot.lane.b32.xlu0 %v5387_v2, %s6318_s28 }
  0x50   :  { %5403 = vrot.lane.b32.xlu1 %v5362_v52, %s6319_s26 }
  0x51   :  { %5398 = vrot.lane.b32.xlu0 %v5357_v53, %s6319_s26 }
  0x54   :  { %5413 = vrot.lane.b32.xlu1 %v5372_v55, %s6319_s26 }
  0x55   :  { %5408 = vrot.lane.b32.xlu0 %v5367_v56, %s6319_s26 }
  0x58   :  { %5423 = vrot.lane.b32.xlu1 %v5382_v60, %s6319_s26 }
  0x59   :  { %5418 = vrot.lane.b32.xlu0 %v5377_v61, %s6319_s26 }
  0x5c   :  { %5433 = vrot.lane.b32.xlu1 %v5392_v1, %s6319_s26 }
  0x5d   :  { %5428 = vrot.lane.b32.xlu0 %v5387_v2, %s6319_s26 }
  0x60   :  { %5443 = vrot.lane.b32.xlu1 %v5362_v52, %s6320_s27 }
  0x61   :  { %5438 = vrot.lane.b32.xlu0 %v5357_v53, %s6320_s27 }
  0x64   :  { %5453 = vrot.lane.b32.xlu1 %v5372_v55, %s6320_s27 }
  0x65   :  { %5448 = vrot.lane.b32.xlu0 %v5367_v56, %s6320_s27 }
  0x68   :  { %5463 = vrot.lane.b32.xlu1 %v5382_v60, %s6320_s27 }
  0x69   :  { %5458 = vrot.lane.b32.xlu0 %v5377_v61, %s6320_s27 }
  0x6c   :  { %5473 = vrot.lane.b32.xlu1 %v5392_v1, %s6320_s27 }
  0x6d   :  { %5468 = vrot.lane.b32.xlu0 %v5387_v2, %s6320_s27 }
  0x70   :  { %5483 = vrot.lane.b32.xlu1 %v6555_v7, %s6318_s28 }
  0x71   :  { %5478 = vrot.lane.b32.xlu0 %v6558_v8, %s6318_s28 }
  0x74   :  { %5493 = vrot.lane.b32.xlu1 %v6574_v13, %s6318_s28 }
  0x75   :  { %5488 = vrot.lane.b32.xlu0 %v6578_v14, %s6318_s28 }
  0x76   :  { %v5219_v23 = vpop.permute.xlu1 %5218 }
  0x77   :  { %v5221_v26 = vunpack.i.h.bf16 %v5219_v23  ;;  %v5220_v27 = vunpack.i.l.bf16 %v5219_v23  ;;  %v5209_v28 = vpop.permute.xlu0 %5208 }
  0x78   :  { %v5211_v29 = vunpack.i.h.bf16 %v5209_v28  ;;  %v5210_v30 = vunpack.i.l.bf16 %v5209_v28  ;;  %5503 = vrot.lane.b32.xlu1 %v6594_v19, %s6318_s28 }
  0x79   :  { %5498 = vrot.lane.b32.xlu0 %v6598_v20, %s6318_s28  ;;  %v457_v33 = vsel %vm438_vm0, %v5220_v27, %v5221_v26 }
  0x7a   :  { %v6621_v34 = vpop.permute.xlu1 %5223  ;;  %v440_v35 = vsel %vm438_vm0, %v5210_v30, %v5211_v29 }
  0x7b   :  { %v5226_v36 = vunpack.i.h.bf16 %v6621_v34  ;;  %v5225_v37 = vunpack.i.l.bf16 %v6621_v34  ;;  %v6626_v43 = vpop.permute.xlu0 %5213  ;;  %v4906_v52 = vpack.c.bf16 %v457_v33, %v440_v35  ;;  %v6947_v34 = vld [vmem:[%s10189_s1 + $0x10] sm:$0xff] }
  0x7c   :  { %v5216_v53 = vunpack.i.h.bf16 %v6626_v43  ;;  %v5215_v54 = vunpack.i.l.bf16 %v6626_v43  ;;  %5513 = vrot.lane.b32.xlu1 %v6614_v31, %s6318_s28 }
  0x7d   :  { %5508 = vrot.lane.b32.xlu0 %v6618_v32, %s6318_s28  ;;  %4907 = vmatprep.subr.bf16.mxu0 %v4906_v52  ;;  %v459_v55 = vsel %vm438_vm0, %v5225_v37, %v5226_v36  ;;  %v458_v56 = vsel %vm438_vm0, %v5221_v26, %v5225_v37 }
  0x7e   :  { %v5234_v57 = vpop.permute.xlu1 %5233  ;;  %v442_v58 = vsel %vm438_vm0, %v5215_v54, %v5216_v53  ;;  %v441_v59 = vsel %vm438_vm0, %v5211_v29, %v5215_v54 }
  0x7f   :  { %v5229_v60 = vpop.permute.xlu0 %5228  ;;  %v4938_v61 = vpack.c.bf16 %v459_v55, %v442_v58  ;;  %v4940_v62 = vpack.c.bf16 %v458_v56, %v441_v59  ;;  %v5236_v1 = vunpack.i.h.bf16 %v5234_v57  ;;  %v5235_v2 = vunpack.i.l.bf16 %v5234_v57 }
  0x80   :  { %v5231_v63 = vunpack.i.h.bf16 %v5229_v60  ;;  %v5230_v0 = vunpack.i.l.bf16 %v5229_v60  ;;  %5523 = vrot.lane.b32.xlu1 %v6555_v7, %s6319_s26 }
  0x81   :  { %5518 = vrot.lane.b32.xlu0 %v6558_v8, %s6319_s26  ;;  %4939 = vmatprep.subr.bf16.mxu1 %v4938_v61  ;;  %v474_v16 = vsel %vm438_vm0, %v5235_v2, %v5236_v1 }
  0x82   :  { %4941 = vmatpush1.bf16.msra.mxu1 %v4940_v62  ;;  %v5244_v3 = vpop.permute.xlu1 %5243  ;;  %v439_v4 = vsel %vm438_vm0, %v5230_v0, %v5210_v30  ;;  %v456_v5 = vsel %vm438_vm0, %v5231_v63, %v5220_v27  ;;  %v6322_v62 = vmov 0  }
  0x83   :  { %v5246_v6 = vunpack.i.h.bf16 %v5244_v3  ;;  %v5245_v9 = vunpack.i.l.bf16 %v5244_v3  ;;  %v6648_v10 = vpop.permute.xlu0 %5238  ;;  %v4908_v11 = vpack.c.bf16 %v456_v5, %v439_v4  ;;  %5747 = vset.pattern.permute.xlu0 %v6322_v62  ;;  %5748 = vset.pattern.permute.xlu1 %v6322_v62 }
  0x84   :  { %5533 = vrot.lane.b32.xlu1 %v6574_v13, %s6319_s26  ;;  %v5241_v12 = vunpack.i.h.bf16 %v6648_v10  ;;  %v5240_v15 = vunpack.i.l.bf16 %v6648_v10 }
  0x85   :  { %5528 = vrot.lane.b32.xlu0 %v6578_v14, %s6319_s26  ;;  %4909 = vmatpush1.bf16.msra.mxu0 %v4908_v11  ;;  %v491_v17 = vsel %vm438_vm0, %v5245_v9, %v5246_v6 }
  0x86   :  { %v5254_v18 = vpop.permute.xlu1 %5253  ;;  %v4910_v21 = vpack.c.bf16 %v491_v17, %v474_v16  ;;  %v476_v29 = vsel %vm438_vm0, %v5240_v15, %v5241_v12  ;;  %v475_v37 = vsel %vm438_vm0, %v5236_v1, %v5240_v15 }
  0x87   :  { %v5256_v22 = vunpack.i.h.bf16 %v5254_v18  ;;  %v5255_v23 = vunpack.i.l.bf16 %v5254_v18  ;;  %v6658_v24 = vpop.permute.xlu0 %5248 }
  0x88   :  { %v5251_v25 = vunpack.i.h.bf16 %v6658_v24  ;;  %v5250_v26 = vunpack.i.l.bf16 %v6658_v24  ;;  %4911 = vmatprep.subr.bf16.mxu0 %v4910_v21  ;;  %5543 = vrot.lane.b32.xlu1 %v6594_v19, %s6319_s26 }
  0x89   :  { %5538 = vrot.lane.b32.xlu0 %v6598_v20, %s6319_s26  ;;  %v473_v27 = vsel %vm438_vm0, %v5255_v23, %v5235_v2  ;;  %v490_v28 = vsel %vm438_vm0, %v5256_v22, %v5245_v9 }
  0x8a   :  { %v6671_v30 = vpop.permute.xlu1 %5263  ;;  %v4912_v33 = vpack.c.bf16 %v490_v28, %v473_v27  ;;  %v493_v35 = vsel %vm438_vm0, %v5250_v26, %v5251_v25  ;;  %v492_v52 = vsel %vm438_vm0, %v5246_v6, %v5250_v26 }
  0x8b   :  { %v5259_v54 = vpop.permute.xlu0 %5258  ;;  %v4942_v55 = vpack.c.bf16 %v493_v35, %v476_v29  ;;  %v4944_v56 = vpack.c.bf16 %v492_v52, %v475_v37  ;;  %v5266_v57 = vunpack.i.h.bf16 %v6671_v30  ;;  %v5265_v58 = vunpack.i.l.bf16 %v6671_v30 }
  0x8c   :  { %4913 = vmatpush1.bf16.msra.mxu0 %v4912_v33  ;;  %5553 = vrot.lane.b32.xlu1 %v6614_v31, %s6319_s26  ;;  %v5261_v59 = vunpack.i.h.bf16 %v5259_v54  ;;  %v5260_v60 = vunpack.i.l.bf16 %v5259_v54 }
  0x8d   :  { %5548 = vrot.lane.b32.xlu0 %v6618_v32, %s6319_s26  ;;  %4943 = vmatprep.subr.bf16.mxu1 %v4942_v55  ;;  %v935_v5 = vsel %vm931_vm1, %v5265_v58, %v5266_v57 }
  0x8e   :  { %4945 = vmatpush1.bf16.msra.mxu1 %v4944_v56  ;;  %v6684_v61 = vpop.permute.xlu1 %5273  ;;  %v933_v4 = vsel %vm931_vm1, %v5260_v60, %v5261_v59  ;;  %v934_v16 = vsel %vm931_vm1, %v5261_v59, %v5265_v58  ;;  %v165_v56 = vld [vmem:[%s10188_s0 + $0x78] sm:$0xff] }
  0x8f   :  { %v5276_v63 = vunpack.i.h.bf16 %v6684_v61  ;;  %v5275_v0 = vunpack.i.l.bf16 %v6684_v61  ;;  %v5269_v1 = vpop.permute.xlu0 %5268 }
  0x90   :  { %v5271_v2 = vunpack.i.h.bf16 %v5269_v1  ;;  %v5270_v3 = vunpack.i.l.bf16 %v5269_v1  ;;  %5563 = vrot.lane.b32.xlu1 %v6555_v7, %s6320_s27 }
  0x91   :  { %5558 = vrot.lane.b32.xlu0 %v6558_v8, %s6320_s27  ;;  %v952_v6 = vsel %vm931_vm1, %v5275_v0, %v5276_v63 }
  0x92   :  { %v5284_v9 = vpop.permute.xlu1 %5283  ;;  %v950_v11 = vsel %vm931_vm1, %v5270_v3, %v5271_v2  ;;  %v4946_v15 = vpack.c.bf16 %v952_v6, %v935_v5  ;;  %v951_v7 = vsel %vm931_vm1, %v5271_v2, %v5275_v0  ;;  %v181_v5 = vld [vmem:[%s10188_s0 + $0xf8] sm:$0xff] }
  0x93   :  { %v5279_v17 = vpop.permute.xlu0 %5278  ;;  %v4914_v8 = vpack.c.bf16 %v950_v11, %v933_v4  ;;  %v4948_v18 = vpack.c.bf16 %v951_v7, %v934_v16  ;;  %v5286_v23 = vunpack.i.h.bf16 %v5284_v9  ;;  %v5285_v26 = vunpack.i.l.bf16 %v5284_v9  ;;  %v183_v16 = vld [vmem:[%s10188_s0 + $0x108] sm:$0xff] }
  0x94   :  { %v5281_v21 = vunpack.i.h.bf16 %v5279_v17  ;;  %v5280_v22 = vunpack.i.l.bf16 %v5279_v17  ;;  %4947 = vmatprep.subr.bf16.mxu1 %v4946_v15  ;;  %5573 = vrot.lane.b32.xlu1 %v6574_v13, %s6320_s27 }
  0x95   :  { %5568 = vrot.lane.b32.xlu0 %v6578_v14, %s6320_s27  ;;  %4915 = vmatprep.subr.bf16.mxu0 %v4914_v8  ;;  %v967_v14 = vsel %vm931_vm1, %v5285_v26, %v5286_v23 }
  0x96   :  { %4949 = vmatpush1.bf16.msra.mxu1 %v4948_v18  ;;  %v5294_v27 = vpop.permute.xlu1 %5293  ;;  %v932_v28 = vsel %vm931_vm1, %v5280_v22, %v5260_v60  ;;  %v949_v29 = vsel %vm931_vm1, %v5281_v21, %v5270_v3  ;;  %v163_v60 = vld [vmem:[%s10188_s0 + $0x68] sm:$0xff] }
  0x97   :  { %v5296_v33 = vunpack.i.h.bf16 %v5294_v27  ;;  %v5295_v35 = vunpack.i.l.bf16 %v5294_v27  ;;  %v6708_v37 = vpop.permute.xlu0 %5288  ;;  %v4916_v52 = vpack.c.bf16 %v949_v29, %v932_v28 }
  0x98   :  { %5583 = vrot.lane.b32.xlu1 %v6594_v19, %s6320_s27  ;;  %v5291_v13 = vunpack.i.h.bf16 %v6708_v37  ;;  %v5290_v54 = vunpack.i.l.bf16 %v6708_v37  ;;  %v166_v19 = vld [vmem:[%s10188_s0 + $0x80] sm:$0xff]  ;;  %v7103_v37 = vld [vmem:[%s10189_s1 + $0x38] sm:$0xff] }
  0x99   :  { %5578 = vrot.lane.b32.xlu0 %v6598_v20, %s6320_s27  ;;  %4917 = vmatpush1.bf16.msra.mxu0 %v4916_v52  ;;  %v984_v55 = vsel %vm931_vm1, %v5295_v35, %v5296_v33  ;;  %v164_v20 = vld [vmem:[%s10188_s0 + $0x70] sm:$0xff]  ;;  %v6736_v4 = vpack.i.bf16 %v166_v19, %v165_v56  ;;  %v199_v56 = vld [vmem:[%s10188_s0 + $0x188] sm:$0xff] }
  0x9a   :  { %v5304_v58 = vpop.permute.xlu1 %5303  ;;  %v4918_v59 = vpack.c.bf16 %v984_v55, %v967_v14  ;;  %v6743_v6 = vpack.i.bf16 %v164_v20, %v163_v60  ;;  %v969_v15 = vsel %vm931_vm1, %v5290_v54, %v5291_v13  ;;  %v968_v18 = vsel %vm931_vm1, %v5286_v23, %v5290_v54  ;;  %v201_v23 = vld [vmem:[%s10188_s0 + $0x198] sm:$0xff]  ;;  %v200_v19 = vld [vmem:[%s10188_s0 + $0x190] sm:$0xff] }
  0x9b   :  { %v5306_v62 = vunpack.i.h.bf16 %v5304_v58  ;;  %v5305_v0 = vunpack.i.l.bf16 %v5304_v58  ;;  %v6730_v1 = vpop.permute.xlu0 %5298 }
  0x9c   :  { %v5301_v2 = vunpack.i.h.bf16 %v6730_v1  ;;  %v5300_v3 = vunpack.i.l.bf16 %v6730_v1  ;;  %4919 = vmatprep.subr.bf16.mxu0 %v4918_v59  ;;  %5593 = vrot.lane.b32.xlu1 %v6614_v31, %s6320_s27  ;;  %v182_v31 = vld [vmem:[%s10188_s0 + $0x100] sm:$0xff] }
  0x9d   :  { %5588 = vrot.lane.b32.xlu0 %v6618_v32, %s6320_s27  ;;  %v966_v9 = vsel %vm931_vm1, %v5305_v0, %v5285_v26  ;;  %v983_v11 = vsel %vm931_vm1, %v5306_v62, %v5295_v35  ;;  %v184_v32 = vld [vmem:[%s10188_s0 + $0x110] sm:$0xff]  ;;  %v6768_v28 = vpack.i.bf16 %v182_v31, %v181_v5 }
  0x9e   :  { %v6759_v7 = vpop.permute.xlu1 %5313  ;;  %v4920_v17 = vpack.c.bf16 %v983_v11, %v966_v9  ;;  %v986_v8 = vsel %vm931_vm1, %v5300_v3, %v5301_v2  ;;  %v985_v21 = vsel %vm931_vm1, %v5296_v33, %v5300_v3  ;;  %v6770_v29 = vpack.i.bf16 %v184_v32, %v183_v16  ;;  %v202_v33 = vld [vmem:[%s10188_s0 + $0x1a0] sm:$0xff]  ;;  %v220_v31 = vld [vmem:[%s10188_s0 + $0x230] sm:$0xff] }
  0x9f   :  { %v5309_v22 = vpop.permute.xlu0 %5308  ;;  %v4950_v26 = vpack.c.bf16 %v986_v8, %v969_v15  ;;  %v4952_v27 = vpack.c.bf16 %v985_v21, %v968_v18  ;;  %v5316_v35 = vunpack.i.h.bf16 %v6759_v7  ;;  %v5315_v52 = vunpack.i.l.bf16 %v6759_v7  ;;  %v219_v15 = vld [vmem:[%s10188_s0 + $0x228] sm:$0xff]  ;;  %v217_v21 = vld [vmem:[%s10188_s0 + $0x218] sm:$0xff] }
  0xa0   :  { %4921 = vmatpush1.bf16.msra.mxu0 %v4920_v17  ;;  %5603 = vrot.lane.b32.xlu1 %v6736_v4, %s6318_s28  ;;  %v5311_v14 = vunpack.i.h.bf16 %v5309_v22  ;;  %v5310_v55 = vunpack.i.l.bf16 %v5309_v22  ;;  %v6794_v0 = vpack.i.bf16 %v202_v33, %v201_v23  ;;  %v6798_v3 = vpack.i.bf16 %v200_v19, %v199_v56  ;;  %v218_v22 = vld [vmem:[%s10188_s0 + $0x220] sm:$0xff] }
  0xa1   :  { %5598 = vrot.lane.b32.xlu0 %v6743_v6, %s6318_s28  ;;  %4951 = vmatprep.subr.bf16.mxu1 %v4950_v26  ;;  %v1428_v9 = vsel %vm1424_vm2, %v5315_v52, %v5316_v35 }
  0xa2   :  { %4953 = vmatpush1.bf16.msra.mxu1 %v4952_v27  ;;  %v6782_v54 = vpop.permute.xlu1 %5323  ;;  %v1426_v5 = vsel %vm1424_vm2, %v5310_v55, %v5311_v14  ;;  %v1427_v8 = vsel %vm1424_vm2, %v5311_v14, %v5315_v52  ;;  %v6824_v52 = vpack.i.bf16 %v220_v31, %v219_v15 }
  0xa3   :  { %v5326_v58 = vunpack.i.h.bf16 %v6782_v54  ;;  %v5325_v59 = vunpack.i.l.bf16 %v6782_v54  ;;  %v5319_v60 = vpop.permute.xlu0 %5318 }
  0xa4   :  { %v5321_v20 = vunpack.i.h.bf16 %v5319_v60  ;;  %v5320_v62 = vunpack.i.l.bf16 %v5319_v60  ;;  %5613 = vrot.lane.b32.xlu1 %v6770_v29, %s6318_s28 }
  0xa5   :  { %5608 = vrot.lane.b32.xlu0 %v6768_v28, %s6318_s28  ;;  %v1445_v11 = vsel %vm1424_vm2, %v5325_v59, %v5326_v58 }
  0xa6   :  { %v5334_v16 = vpop.permute.xlu1 %5333  ;;  %v1443_v32 = vsel %vm1424_vm2, %v5320_v62, %v5321_v20  ;;  %v4954_v17 = vpack.c.bf16 %v1445_v11, %v1428_v9  ;;  %v1444_v18 = vsel %vm1424_vm2, %v5321_v20, %v5325_v59  ;;  %v6828_v59 = vpack.i.bf16 %v218_v22, %v217_v21 }
  0xa7   :  { %v5329_v26 = vpop.permute.xlu0 %5328  ;;  %v4922_v27 = vpack.c.bf16 %v1443_v32, %v1426_v5  ;;  %v4956_v23 = vpack.c.bf16 %v1444_v18, %v1427_v8  ;;  %v5336_v14 = vunpack.i.h.bf16 %v5334_v16  ;;  %v5335_v19 = vunpack.i.l.bf16 %v5334_v16 }
  0xa8   :  { %v5331_v33 = vunpack.i.h.bf16 %v5329_v26  ;;  %v5330_v56 = vunpack.i.l.bf16 %v5329_v26  ;;  %4955 = vmatprep.subr.bf16.mxu1 %v4954_v17  ;;  %5623 = vrot.lane.b32.xlu1 %v6794_v0, %s6318_s28 }
  0xa9   :  { %5618 = vrot.lane.b32.xlu0 %v6798_v3, %s6318_s28  ;;  %4923 = vmatprep.subr.bf16.mxu0 %v4922_v27 }
  0xaa   :  { %4957 = vmatpush1.bf16.msra.mxu1 %v4956_v23  ;;  %v5344_v60 = vpop.permute.xlu1 %5343  ;;  %v1425_v20 = vsel %vm1424_vm2, %v5330_v56, %v5310_v55  ;;  %v1442_v5 = vsel %vm1424_vm2, %v5331_v33, %v5320_v62  ;;  %v1460_v55 = vsel %vm1424_vm2, %v5335_v19, %v5336_v14 }
  0xab   :  { %v5346_v9 = vunpack.i.h.bf16 %v5344_v60  ;;  %v5345_v11 = vunpack.i.l.bf16 %v5344_v60  ;;  %v6832_v32 = vpop.permute.xlu0 %5338  ;;  %v4924_v15 = vpack.c.bf16 %v1442_v5, %v1425_v20  ;;  %v18_v60 = vld [vmem:[%s10188_s0 + $0x20] sm:$0xff]  ;;  %v35_v20 = vld [vmem:[%s10188_s0 + $0xb0] sm:$0xff] }
  0xac   :  { %5633 = vrot.lane.b32.xlu1 %v6824_v52, %s6318_s28  ;;  %v5341_v31 = vunpack.i.h.bf16 %v6832_v32  ;;  %v5340_v16 = vunpack.i.l.bf16 %v6832_v32  ;;  %v7207_v32 = vld [vmem:[%s10189_s1 + $0x58] sm:$0xff] }
  0xad   :  { %5628 = vrot.lane.b32.xlu0 %v6828_v59, %s6318_s28  ;;  %4925 = vmatpush1.bf16.msra.mxu0 %v4924_v15  ;;  %v1477_v62 = vsel %vm1424_vm2, %v5345_v11, %v5346_v9  ;;  %10265 = vst [vmem:[#allocation5_spill] sm:$0xff] %v7207_v32 }
  0xae   :  { %v5354_v17 = vpop.permute.xlu1 %5353  ;;  %v4926_v8 = vpack.c.bf16 %v1477_v62, %v1460_v55  ;;  %v1462_v56 = vsel %vm1424_vm2, %v5340_v16, %v5341_v31 }
  0xaf   :  { %v5356_v18 = vunpack.i.h.bf16 %v5354_v17  ;;  %v5355_v21 = vunpack.i.l.bf16 %v5354_v17  ;;  %v6842_v22 = vpop.permute.xlu0 %5348 }
  0xb0   :  { %v5351_v26 = vunpack.i.h.bf16 %v6842_v22  ;;  %v5350_v27 = vunpack.i.l.bf16 %v6842_v22  ;;  %4927 = vmatprep.subr.bf16.mxu0 %v4926_v8  ;;  %5643 = vrot.lane.b32.xlu1 %v6736_v4, %s6319_s26  ;;  %v25_v22 = vld [vmem:[%s10188_s0 + $0x58] sm:$0xff] }
  0xb1   :  { %5638 = vrot.lane.b32.xlu0 %v6743_v6, %s6319_s26  ;;  %v1459_v23 = vsel %vm1424_vm2, %v5355_v21, %v5335_v19  ;;  %v1476_v33 = vsel %vm1424_vm2, %v5356_v18, %v5345_v11  ;;  %v1461_v19 = vsel %vm1424_vm2, %v5336_v14, %v5340_v16  ;;  %v6873_v18 = vld [vmem:[%s10189_s1] sm:$0xff]  ;;  %v4964_v21 = vpack.c.bf16 %v35_v20, %v18_v60  ;;  %v69_v16 = vld [vmem:[%s10188_s0 + $0x1d0] sm:$0xff] }
  0xb2   :  { %v4928_v5 = vpack.c.bf16 %v1476_v33, %v1459_v23  ;;  %v1479_v15 = vsel %vm1424_vm2, %v5350_v27, %v5351_v26  ;;  %v1478_v11 = vsel %vm1424_vm2, %v5346_v9, %v5350_v27  ;;  %v6866_v55 = vpop.permute.xlu1 %5363  ;;  %v52_v9 = vld [vmem:[%s10188_s0 + $0x140] sm:$0xff] }
  0xb3   :  { %v6868_v62 = vpop.permute.xlu0 %5358  ;;  %v4958_v17 = vpack.c.bf16 %v1479_v15, %v1462_v56  ;;  %v4960_v8 = vpack.c.bf16 %v1478_v11, %v1461_v19  ;;  %v10202_v56 = vunpack.i.h.bf16 %v6866_v55  ;;  %v4968_v39 = vpack.c.bf16 %v69_v16, %v52_v9  ;;  %v72_v15 = vld [vmem:[%s10188_s0 + $0x1e8] sm:$0xff] }
  0xb4   :  { %4929 = vmatpush1.bf16.msra.mxu0 %v4928_v5  ;;  %5653 = vrot.lane.b32.xlu1 %v6770_v29, %s6319_s26  ;;  %v5361_v14 = vunpack.i.h.bf16 %v6868_v62  ;;  %v5360_v27 = vunpack.i.l.bf16 %v6868_v62  ;;  %v55_v5 = vld [vmem:[%s10188_s0 + $0x158] sm:$0xff] }
  0xb5   :  { %5648 = vrot.lane.b32.xlu0 %v6768_v28, %s6319_s26  ;;  %4959 = vmatprep.subr.bf16.mxu1 %v4958_v17  ;;  %v4998_v45 = vpack.c.bf16 %v72_v15, %v55_v5 }
  0xb6   :  { %4961 = vmatpush1.bf16.msra.mxu1 %v4960_v8  ;;  %4963 = vmatprep.subr.bf16.mxu0 %v4962_v40  ;;  %v6890_v23 = vpop.permute.xlu1 %5373  ;;  %v5365_v40 = vunpack.i.l.bf16 %v6866_v55  ;;  %v443_v19 = vsel %vm438_vm0, %v5216_v53, %v5360_v27  ;;  %v5000_v53 = vpack.c.bf16 %v71_v47, %v54_v46 }
  0xb7   :  { %v5369_v33 = vpop.permute.xlu0 %5368  ;;  %2078 = vmatmul.mubr.f32.vlgmr.msra.gmra.mrb[0].mxu0 %v6873_v18  ;;  %4995 = vmatprep.subr.bf16.mxu1 %v4994_v50  ;;  %v5376_v42 = vunpack.i.h.bf16 %v6890_v23  ;;  %v5375_v48 = vunpack.i.l.bf16 %v6890_v23  ;;  %v444_v50 = vsel %vm438_vm0, %v5360_v27, %v5361_v14 }
  0xb8   :  { %v5371_v60 = vunpack.i.h.bf16 %v5369_v33  ;;  %v5370_v20 = vunpack.i.l.bf16 %v5369_v33  ;;  %4965 = vmatpush1.bf16.msra.mxu0 %v4964_v21  ;;  %2083 = vmatprep.mubr.f32.mxu0 %v10215_v41  ;;  %v445_v16 = vsel %vm438_vm0, %v5361_v14, %v5365_v40 }
  0xb9   :  { %5658 = vrot.lane.b32.xlu0 %v6798_v3, %s6319_s26  ;;  %2239 = vmatmul.mubr.f32.vlgmr.msra.gmra.mrb[0].mxu1 %v6873_v18 }
  0xba   :  { %v460_v11 = vsel %vm438_vm0, %v5226_v36, %v5370_v20  ;;  %4997 = vmatpush1.bf16.msra.mxu1 %v4996_v51  ;;  %2244 = vmatprep.mubr.f32.mxu1 %v10215_v41  ;;  %v6926_v62 = vpop.permute.xlu1 %5383  ;;  %v461_v17 = vsel %vm438_vm0, %v5370_v20, %v5371_v60  ;;  %v463_v36 = vsel %vm438_vm0, %v5375_v48, %v5376_v42 }
  0xbb   :  { %v4972_v8 = vpack.c.bf16 %v460_v11, %v443_v19  ;;  %v6929_v21 = vpop.permute.xlu0 %5378  ;;  %2084 = vmatmul.mubr.f32.gmra.mrb[2].mxu0 %v6901_v38  ;;  %4967 = vmatprep.subr.bf16.mxu0 %v4966_v49  ;;  %v4970_v44 = vpack.c.bf16 %v461_v17, %v444_v50  ;;  %v446_v49 = vsel %vm438_vm0, %v5365_v40, %v10202_v56  ;;  %v10200_v15 = vunpack.i.h.bf16 %v6926_v62  ;;  %v6979_v40 = vld [vmem:[%s10189_s1 + $0x18] sm:$0xff] }
  0xbc   :  { %v5381_v51 = vunpack.i.h.bf16 %v6929_v21  ;;  %5663 = vrot.lane.b32.xlu1 %v6794_v0, %s6319_s26  ;;  %4969 = vmatpush1.bf16.msra.mxu0 %v4968_v39  ;;  %v5380_v43 = vunpack.i.l.bf16 %v6929_v21  ;;  %v462_v27 = vsel %vm438_vm0, %v5371_v60, %v5375_v48  ;;  %v5002_v50 = vpack.c.bf16 %v463_v36, %v446_v49 }
  0xbd   :  { %5668 = vrot.lane.b32.xlu0 %v6828_v59, %s6319_s26  ;;  %2245 = vmatmul.mubr.f32.gmra.mrb[2].mxu1 %v6901_v38  ;;  %v5385_v19 = vunpack.i.l.bf16 %v6926_v62  ;;  %v5004_v21 = vpack.c.bf16 %v462_v27, %v445_v16 }
  0xbe   :  { %2089 = vmatprep.mubr.f32.mxu0 %v10215_v41  ;;  %2250 = vmatprep.mubr.f32.mxu1 %v10215_v41  ;;  %v6961_v9 = vpop.permute.xlu1 %5393  ;;  %v478_v5 = vsel %vm438_vm0, %v5380_v43, %v5381_v51  ;;  %v477_v48 = vsel %vm438_vm0, %v5241_v12, %v5380_v43 }
  0xbf   :  { %v5389_v33 = vpop.permute.xlu0 %5388  ;;  %2090 = vmatmul.mubr.f32.gmra.mrb[4].mxu0 %v6947_v34  ;;  %4971 = vmatprep.subr.bf16.mxu0 %v4970_v44  ;;  %v10201_v14 = vunpack.i.h.bf16 %v6961_v9  ;;  %v5395_v60 = vunpack.i.l.bf16 %v6961_v9  ;;  %v480_v12 = vsel %vm438_vm0, %v5385_v19, %v10200_v15 }
  0xc0   :  { %v5391_v20 = vunpack.i.h.bf16 %v5389_v33  ;;  %v5390_v39 = vunpack.i.l.bf16 %v5389_v33  ;;  %4999 = vmatprep.subr.bf16.mxu1 %v4998_v45  ;;  %5673 = vrot.lane.b32.xlu1 %v6824_v52, %s6319_s26 }
  0xc1   :  { %5678 = vrot.lane.b32.xlu0 %v6743_v6, %s6320_s27  ;;  %2251 = vmatmul.mubr.f32.gmra.mrb[4].mxu1 %v6947_v34  ;;  %v497_v24 = vsel %vm438_vm0, %v5395_v60, %v10201_v14 }
  0xc2   :  { %v494_v11 = vsel %vm438_vm0, %v5251_v25, %v5390_v39  ;;  %4973 = vmatpush1.bf16.msra.mxu0 %v4972_v8  ;;  %5001 = vmatpush1.bf16.msra.mxu1 %v5000_v53  ;;  %v495_v6 = vsel %vm438_vm0, %v5390_v39, %v5391_v20  ;;  %v6988_v17 = vpop.permute.xlu1 %5403  ;;  %v7007_v8 = vld [vmem:[%s10189_s1 + $0x20] sm:$0xff]  ;;  %v496_v45 = vsel %vm438_vm0, %v5391_v20, %v5395_v60  ;;  %v167_v60 = vld [vmem:[%s10188_s0 + $0x88] sm:$0xff] }
  0xc3   :  { %v4976_v46 = vpack.c.bf16 %v494_v11, %v477_v48  ;;  %v5399_v47 = vpop.permute.xlu0 %5398  ;;  %2095 = vmatprep.mubr.f32.mxu0 %v10215_v41  ;;  %2256 = vmatprep.mubr.f32.mxu1 %v10215_v41  ;;  %v4974_v10 = vpack.c.bf16 %v495_v6, %v478_v5  ;;  %v10198_v49 = vunpack.i.h.bf16 %v6988_v17  ;;  %v5405_v36 = vunpack.i.l.bf16 %v6988_v17  ;;  %v185_v48 = vld [vmem:[%s10188_s0 + $0x118] sm:$0xff] }
  0xc4   :  { %v5401_v44 = vunpack.i.h.bf16 %v5399_v47  ;;  %2096 = vmatmul.mubr.f32.gmra.mrb[6].mxu0 %v6979_v40  ;;  %5003 = vmatprep.subr.bf16.mxu1 %v5002_v50  ;;  %v5400_v25 = vunpack.i.l.bf16 %v5399_v47  ;;  %v5006_v27 = vpack.c.bf16 %v497_v24, %v480_v12  ;;  %v7032_v50 = vld [vmem:[%s10189_s1 + $0x28] sm:$0xff] }
  0xc5   :  { %5683 = vrot.lane.b32.xlu1 %v6736_v4, %s6320_s27  ;;  %5688 = vrot.lane.b32.xlu0 %v6768_v28, %s6320_s27  ;;  %v479_v28 = vsel %vm438_vm0, %v5381_v51, %v5385_v19  ;;  %v939_v30 = vsel %vm931_vm1, %v5405_v36, %v10198_v49  ;;  %v7368_v49 = vld [vmem:[%s10188_s0 + $0x200] sm:$0xff] }
  0xc6   :  { %2257 = vmatmul.mubr.f32.gmra.mrb[6].mxu1 %v6979_v40  ;;  %4975 = vmatprep.subr.bf16.mxu0 %v4974_v10  ;;  %v7009_v4 = vpop.permute.xlu1 %5413  ;;  %v937_v33 = vsel %vm931_vm1, %v5400_v25, %v5401_v44  ;;  %v5008_v19 = vpack.c.bf16 %v496_v45, %v479_v28  ;;  %v936_v61 = vsel %vm931_vm1, %v5266_v57, %v5400_v25  ;;  %v203_v57 = vld [vmem:[%s10188_s0 + $0x1a8] sm:$0xff] }
  0xc7   :  { %5005 = vmatpush1.bf16.msra.mxu1 %v5004_v21  ;;  %4977 = vmatpush1.bf16.msra.mxu0 %v4976_v46  ;;  %v5409_v43 = vpop.permute.xlu0 %5408  ;;  %v10199_v51 = vunpack.i.h.bf16 %v7009_v4  ;;  %v5415_v20 = vunpack.i.l.bf16 %v7009_v4  ;;  %v221_v21 = vld [vmem:[%s10188_s0 + $0x238] sm:$0xff]  ;;  %v938_v24 = vsel %vm931_vm1, %v5401_v44, %v5405_v36  ;;  %v7075_v28 = vpack.i.bf16 %v185_v48, %v167_v60 }
  0xc8   :  { %v5411_v53 = vunpack.i.h.bf16 %v5409_v43  ;;  %v5410_v16 = vunpack.i.l.bf16 %v5409_v43  ;;  %2101 = vmatprep.mubr.f32.mxu0 %v10215_v41  ;;  %2262 = vmatprep.mubr.f32.mxu1 %v10215_v41 }
  0xc9   :  { %2102 = vmatmul.mubr.f32.gmra.mrb[8].mxu0 %v7007_v8  ;;  %5693 = vrot.lane.b32.xlu1 %v6770_v29, %s6320_s27  ;;  %v956_v12 = vsel %vm931_vm1, %v5415_v20, %v10199_v51 }
  0xca   :  { %v953_v39 = vsel %vm931_vm1, %v5276_v63, %v5410_v16  ;;  %5698 = vrot.lane.b32.xlu0 %v6798_v3, %s6320_s27  ;;  %2263 = vmatmul.mubr.f32.gmra.mrb[8].mxu1 %v7007_v8  ;;  %v954_v29 = vsel %vm931_vm1, %v5410_v16, %v5411_v53  ;;  %v7035_v5 = vpop.permute.xlu1 %5423  ;;  %v955_v25 = vsel %vm931_vm1, %v5411_v53, %v5415_v20 }
  0xcb   :  { %v5419_v63 = vpop.permute.xlu0 %5418  ;;  %2107 = vmatprep.mubr.f32.mxu0 %v10215_v41  ;;  %2268 = vmatprep.mubr.f32.mxu1 %v10215_v41  ;;  %v4978_v3 = vpack.c.bf16 %v954_v29, %v937_v33  ;;  %v4980_v11 = vpack.c.bf16 %v953_v39, %v936_v61  ;;  %v10197_v47 = vunpack.i.h.bf16 %v7035_v5  ;;  %v5425_v10 = vunpack.i.l.bf16 %v7035_v5 }
  0xcc   :  { %v5421_v6 = vunpack.i.h.bf16 %v5419_v63  ;;  %5007 = vmatprep.subr.bf16.mxu1 %v5006_v27  ;;  %v5420_v46 = vunpack.i.l.bf16 %v5419_v63  ;;  %v7081_v53 = vpack.i.bf16 %v221_v21, %v203_v57  ;;  %v5010_v27 = vpack.c.bf16 %v956_v12, %v939_v30 }
  0xcd   :  { %2108 = vmatmul.mubr.f32.gmra.mrb[10].mxu0 %v7032_v50  ;;  %5703 = vrot.lane.b32.xlu1 %v6794_v0, %s6320_s27  ;;  %v7073_v0 = vld [vmem:[%s10189_s1 + $0x30] sm:$0xff]  ;;  %v5012_v20 = vpack.c.bf16 %v955_v25, %v938_v24  ;;  %v973_v29 = vsel %vm931_vm1, %v5425_v10, %v10197_v47 }
  0xce   :  { %5708 = vrot.lane.b32.xlu0 %v6828_v59, %s6320_s27  ;;  %2269 = vmatmul.mubr.f32.gmra.mrb[10].mxu1 %v7032_v50  ;;  %v7077_v45 = vpop.permute.xlu1 %5433  ;;  %v971_v33 = vsel %vm931_vm1, %v5420_v46, %v5421_v6  ;;  %v970_v39 = vsel %vm931_vm1, %v5291_v13, %v5420_v46  ;;  %v7363_v47 = vld [vmem:[%s10188_s0 + $0x170] sm:$0xff] }
  0xcf   :  { %4979 = vmatprep.subr.bf16.mxu0 %v4978_v3  ;;  %5009 = vmatpush1.bf16.msra.mxu1 %v5008_v19  ;;  %v5429_v43 = vpop.permute.xlu0 %5428  ;;  %v10196_v44 = vunpack.i.h.bf16 %v7077_v45  ;;  %v5435_v36 = vunpack.i.l.bf16 %v7077_v45  ;;  %v972_v3 = vsel %vm931_vm1, %v5421_v6, %v5425_v10  ;;  %v7124_v6 = vld [vmem:[%s10189_s1 + $0x40] sm:$0xff] }
  0xd0   :  { %4981 = vmatpush1.bf16.msra.mxu0 %v4980_v11  ;;  %v5431_v59 = vunpack.i.h.bf16 %v5429_v43  ;;  %v5430_v16 = vunpack.i.l.bf16 %v5429_v43  ;;  %2113 = vmatprep.mubr.f32.mxu0 %v10215_v41 }
  0xd1   :  { %2114 = vmatmul.mubr.f32.gmra.mrb[12].mxu0 %v7073_v0  ;;  %2274 = vmatprep.mubr.f32.mxu1 %v10215_v41  ;;  %v990_v1 = vsel %vm931_vm1, %v5435_v36, %v10196_v44  ;;  %v7342_v44 = vld [vmem:[%s10188_s0 + $0x1f0] sm:$0xff] }
  0xd2   :  { %v987_v19 = vsel %vm931_vm1, %v5301_v2, %v5430_v16  ;;  %5713 = vrot.lane.b32.xlu1 %v6824_v52, %s6320_s27  ;;  %5718 = vrot.lane.b32.xlu0 %v7075_v28, %s6318_s28  ;;  %v988_v13 = vsel %vm931_vm1, %v5430_v16, %v5431_v59  ;;  %v7106_v61 = vpop.permute.xlu1 %5443  ;;  %v989_v60 = vsel %vm931_vm1, %v5431_v59, %v5435_v36 }
  0xd3   :  { %v4984_v2 = vpack.c.bf16 %v987_v19, %v970_v39  ;;  %2275 = vmatmul.mubr.f32.gmra.mrb[12].mxu1 %v7073_v0  ;;  %v5439_v52 = vpop.permute.xlu0 %5438  ;;  %2119 = vmatprep.mubr.f32.mxu0 %v10215_v41  ;;  %v4982_v63 = vpack.c.bf16 %v988_v13, %v971_v33  ;;  %v10194_v30 = vunpack.i.h.bf16 %v7106_v61  ;;  %v5445_v57 = vunpack.i.l.bf16 %v7106_v61  ;;  %v7153_v39 = vld [vmem:[%s10189_s1 + $0x48] sm:$0xff] }
  0xd4   :  { %v5441_v48 = vunpack.i.h.bf16 %v5439_v52  ;;  %v5440_v11 = vunpack.i.l.bf16 %v5439_v52  ;;  %2280 = vmatprep.mubr.f32.mxu1 %v10215_v41  ;;  %5011 = vmatprep.subr.bf16.mxu1 %v5010_v27  ;;  %v5014_v21 = vpack.c.bf16 %v990_v1, %v973_v29  ;;  %v5016_v10 = vpack.c.bf16 %v989_v60, %v972_v3  ;;  %10263 = vst [vmem:[#allocation3_spill] sm:$0xff] %v7153_v39 }
  0xd5   :  { %2120 = vmatmul.mubr.f32.gmra.mrb[14].mxu0 %v7103_v37  ;;  %4983 = vmatprep.subr.bf16.mxu0 %v4982_v63  ;;  %v1432_v33 = vsel %vm1424_vm2, %v5445_v57, %v10194_v30 }
  0xd6   :  { %5723 = vrot.lane.b32.xlu1 %v7081_v53, %s6318_s28  ;;  %5013 = vmatpush1.bf16.msra.mxu1 %v5012_v20  ;;  %v7126_v46 = vpop.permute.xlu1 %5453  ;;  %v1429_v43 = vsel %vm1424_vm2, %v5316_v35, %v5440_v11  ;;  %v1430_v16 = vsel %vm1424_vm2, %v5440_v11, %v5441_v48  ;;  %v1431_v27 = vsel %vm1424_vm2, %v5441_v48, %v5445_v57  ;;  %v7171_v48 = vld [vmem:[%s10189_s1 + $0x50] sm:$0xff] }
  0xd7   :  { %2281 = vmatmul.mubr.f32.gmra.mrb[14].mxu1 %v7103_v37  ;;  %4985 = vmatpush1.bf16.msra.mxu0 %v4984_v2  ;;  %v5449_v12 = vpop.permute.xlu0 %5448  ;;  %v10195_v24 = vunpack.i.h.bf16 %v7126_v46  ;;  %v5455_v25 = vunpack.i.l.bf16 %v7126_v46  ;;  %10264 = vst [vmem:[#allocation4_spill] sm:$0xff] %v7171_v48 }
  0xd8   :  { %v5451_v36 = vunpack.i.h.bf16 %v5449_v12  ;;  %v5450_v59 = vunpack.i.l.bf16 %v5449_v12  ;;  %2125 = vmatprep.mubr.f32.mxu0 %v10215_v41  ;;  %2286 = vmatprep.mubr.f32.mxu1 %v10215_v41 }
  0xd9   :  { %2126 = vmatmul.mubr.f32.gmra.mrb[16].mxu0 %v7124_v6  ;;  %5015 = vmatprep.subr.bf16.mxu1 %v5014_v21  ;;  %v1449_v7 = vsel %vm1424_vm2, %v5455_v25, %v10195_v24  ;;  %v7337_v24 = vld [vmem:[%s10188_s0 + $0x160] sm:$0xff] }
  0xda   :  { %v1446_v35 = vsel %vm1424_vm2, %v5326_v58, %v5450_v59  ;;  %v1448_v20 = vsel %vm1424_vm2, %v5451_v36, %v5455_v25  ;;  %2131 = vmatprep.mubr.f32.mxu0 %v10215_v41  ;;  %5728 = vrot.lane.b32.xlu0 %v7075_v28, %s6319_s26  ;;  %v1447_v29 = vsel %vm1424_vm2, %v5450_v59, %v5451_v36  ;;  %v7158_v19 = vpop.permute.xlu1 %5463  ;;  %v23_v59 = vld [vmem:[%s10188_s0 + $0x48] sm:$0xff] }
  0xdb   :  { %v4988_v13 = vpack.c.bf16 %v1446_v35, %v1429_v43  ;;  %2287 = vmatmul.mubr.f32.gmra.mrb[16].mxu1 %v7124_v6  ;;  %v5459_v54 = vpop.permute.xlu0 %5458  ;;  %v4986_v58 = vpack.c.bf16 %v1447_v29, %v1430_v16  ;;  %v10193_v1 = vunpack.i.h.bf16 %v7158_v19  ;;  %5733 = vrot.lane.b32.xlu1 %v7081_v53, %s6319_s26  ;;  %v5020_v2 = vpack.c.bf16 %v1448_v20, %v1431_v27  ;;  %v40_v16 = vld [vmem:[%s10188_s0 + $0xd8] sm:$0xff] }
  0xdc   :  { %v5461_v52 = vunpack.i.h.bf16 %v5459_v54  ;;  %2292 = vmatprep.mubr.f32.mxu1 %v10215_v41  ;;  %5017 = vmatpush1.bf16.msra.mxu1 %v5016_v10  ;;  %v5465_v63 = vunpack.i.l.bf16 %v7158_v19  ;;  %v5018_v3 = vpack.c.bf16 %v1449_v7, %v1432_v33  ;;  %v5460_v60 = vunpack.i.l.bf16 %v5459_v54 }
  0xdd   :  { %2132 = vmatmul.mubr.f32.gmra.mrb[18].mxu0 %v7153_v39  ;;  %4987 = vmatprep.subr.bf16.mxu0 %v4986_v58 }
  0xde   :  { %4989 = vmatpush1.bf16.msra.mxu0 %v4988_v13  ;;  %2137 = vmatprep.mubr.f32.mxu0 %v10215_v41  ;;  %v7173_v11 = vpop.permute.xlu1 %5473  ;;  %v1466_v12 = vsel %vm1424_vm2, %v5465_v63, %v10193_v1  ;;  %v1464_v36 = vsel %vm1424_vm2, %v5460_v60, %v5461_v52  ;;  %v1463_v27 = vsel %vm1424_vm2, %v5341_v31, %v5460_v60  ;;  %v7320_v1 = vld [vmem:[%s10189_s1 + $0x78] sm:$0xff] }
  0xdf   :  { %2293 = vmatmul.mubr.f32.gmra.mrb[18].mxu1 %v7153_v39  ;;  %v5469_v57 = vpop.permute.xlu0 %5468  ;;  %v10192_v21 = vunpack.i.h.bf16 %v7173_v11  ;;  %v5475_v10 = vunpack.i.l.bf16 %v7173_v11  ;;  %5019 = vmatprep.subr.bf16.mxu1 %v5018_v3  ;;  %v1465_v33 = vsel %vm1424_vm2, %v5461_v52, %v5465_v63  ;;  %v7229_v3 = vld [vmem:[%s10189_s1 + $0x60] sm:$0xff] }
  0xe0   :  { %v5471_v25 = vunpack.i.h.bf16 %v5469_v57  ;;  %v5470_v43 = vunpack.i.l.bf16 %v5469_v57  ;;  %2298 = vmatprep.mubr.f32.mxu1 %v10215_v41  ;;  %5021 = vmatpush1.bf16.msra.mxu1 %v5020_v2  ;;  %v5026_v2 = vpack.c.bf16 %v40_v16, %v23_v59  ;;  %10266 = vst [vmem:[#allocation6_spill] sm:$0xff] %v7229_v3  ;;  %v1917_v57 = vld [vmem:[%s10190_s2] sm:$0xff]  ;;  %v7263_v59 = vld [vmem:[%s10189_s1 + $0x70] sm:$0xff] }
  0xe1   :  { %2138 = vmatmul.mubr.f32.gmra.mrb[20].mxu0 %v7171_v48  ;;  %v1483_v7 = vsel %vm1424_vm2, %v5475_v10, %v10192_v21  ;;  %5738 = vrot.lane.b32.xlu0 %v7075_v28, %s6320_s27  ;;  %10268 = vst [vmem:[#allocation8_spill] sm:$0xff] %v7263_v59  ;;  %v1919_v16 = vld [vmem:[%s10190_s2 + $0x10] sm:$0xff] }
  0xe2   :  { %v1480_v35 = vsel %vm1424_vm2, %v5351_v26, %v5470_v43  ;;  %v1482_v20 = vsel %vm1424_vm2, %v5471_v25, %v5475_v10  ;;  %2143 = vmatprep.mubr.f32.mxu0 %v10215_v41  ;;  %v1481_v31 = vsel %vm1424_vm2, %v5470_v43, %v5471_v25  ;;  %v7210_v29 = vpop.permute.xlu1 %5483  ;;  %v5022_v13 = vpack.c.bf16 %v1483_v7, %v1466_v12  ;;  %v42_v26 = vld [vmem:[%s10188_s0 + $0xe8] sm:$0xff]  ;;  %v7275_v7 = vld [vmem:[%s10188_s0 + $0x40] sm:$0xff] }
  0xe3   :  { %v4992_v28 = vpack.c.bf16 %v1480_v35, %v1463_v27  ;;  %2299 = vmatmul.mubr.f32.gmra.mrb[20].mxu1 %v7171_v48  ;;  %v7219_v54 = vpop.permute.xlu0 %5478  ;;  %v4990_v58 = vpack.c.bf16 %v1481_v31, %v1464_v36  ;;  %5743 = vrot.lane.b32.xlu1 %v7081_v53, %s6320_s27  ;;  %v5024_v52 = vpack.c.bf16 %v1482_v20, %v1465_v33  ;;  %v1918_v10 = vld [vmem:[%s10190_s2 + $0x8] sm:$0xff]  ;;  %v1920_v36 = vld [vmem:[%s10190_s2 + $0x18] sm:$0xff]  ;;  %v10203_v27 = vunpack.i.h.bf16 %v7210_v29  ;;  %v7280_v35 = vld [vmem:[%s10188_s0 + $0xd0] sm:$0xff] }
  0xe4   :  { %2304 = vmatprep.mubr.f32.mxu1 %v10215_v41  ;;  %5023 = vmatprep.subr.bf16.mxu1 %v5022_v13  ;;  %v5058_v63 = vpack.c.bf16 %v42_v26, %v25_v22  ;;  %v7248_v12 = vld [vmem:[%s10189_s1 + $0x68] sm:$0xff]  ;;  %v5481_v31 = vunpack.i.h.bf16 %v7219_v54  ;;  %v5485_v13 = vunpack.i.l.bf16 %v7210_v29  ;;  %v5480_v21 = vunpack.i.l.bf16 %v7219_v54 }
  0xe5   :  { %2144 = vmatmul.mubr.f32.gmra.mrb[22].mxu0 %v7207_v32  ;;  %4991 = vmatprep.subr.bf16.mxu0 %v4990_v58  ;;  %10267 = vst [vmem:[#allocation7_spill] sm:$0xff] %v7248_v12  ;;  %v7285_v20 = vld [vmem:[%s10188_s0 + $0x168] sm:$0xff]  ;;  %v7297_v58 = vld [vmem:[%s10188_s0 + $0x50] sm:$0xff] }
  0xe6   :  { %4993 = vmatpush1.bf16.msra.mxu0 %v4992_v28  ;;  %2149 = vmatprep.mubr.f32.mxu0 %v10215_v41  ;;  %v7231_v60 = vpop.permute.xlu1 %5493  ;;  %v7373_v51 = vsel %vm438_vm0, %v5485_v13, %v10203_v27 }
  0xe7   :  { %2305 = vmatmul.mubr.f32.gmra.mrb[22].mxu1 %v7207_v32  ;;  %v7234_v53 = vpop.permute.xlu0 %5488  ;;  %5027 = vmatprep.subr.bf16.mxu0 %v5026_v2  ;;  %v10204_v22 = vunpack.i.h.bf16 %v7231_v60  ;;  %v5495_v26 = vunpack.i.l.bf16 %v7231_v60  ;;  %v7302_v2 = vld [vmem:[%s10188_s0 + $0xe0] sm:$0xff]  ;;  %v10269_v32 = vunpack.i.h.bf16 %v6866_v55  ;;  %v10270_v55 = vmov 0.0  }
  0xe8   :  { %2310 = vmatprep.mubr.f32.mxu1 %v10215_v41  ;;  %5025 = vmatpush1.bf16.msra.mxu1 %v5024_v52  ;;  %v7307_v52 = vld [vmem:[%s10188_s0 + $0x1f8] sm:$0xff] }
  0xe9   :  { %2150 = vmatmul.mubr.f32.gmra.mrb[24].mxu0 %v7229_v3  ;;  %5059 = vmatprep.subr.bf16.mxu1 %v5058_v63  ;;  %v5491_v63 = vunpack.i.h.bf16 %v7234_v53  ;;  %v5030_v30 = vpack.c.bf16 %v7307_v52, %v7285_v20  ;;  %v7353_v20 = vsel %vm438_vm0, %v5480_v21, %v5481_v31  ;;  %v7358_v52 = vld [vmem:[%s10188_s0 + $0x208] sm:$0xff]  ;;  %v7378_v54 = vsel %vm438_vm0, %v5495_v26, %v10204_v22  ;;  %v1924_v22 = vld [vmem:[%s10190_s2 + $0x38] sm:$0xff] }
  0xea   :  { %2155 = vmatprep.mubr.f32.mxu0 %v10215_v41  ;;  %v7250_v25 = vpop.permute.xlu1 %5503  ;;  %1935 = vperm.xlu0 %5747, %v1917_v57   ;;  %v5490_v57 = vunpack.i.l.bf16 %v7234_v53  ;;  %v1921_v53 = vld [vmem:[%s10190_s2 + $0x20] sm:$0xff]  ;;  %v7415_v48 = vsel %vm438_vm0, %v10269_v32, %v5480_v21  ;;  %v10271_v21 = vunpack.i.h.bf16 %v6961_v9 }
  0xeb   :  { %2311 = vmatmul.mubr.f32.gmra.mrb[24].mxu1 %v7229_v3  ;;  %v7253_v43 = vpop.permute.xlu0 %5498  ;;  %1940 = vperm.xlu1 %5748, %v1918_v10   ;;  %v1922_v10 = vld [vmem:[%s10190_s2 + $0x28] sm:$0xff]  ;;  %v5505_v56 = vunpack.i.l.bf16 %v7250_v25  ;;  %v5064_v3 = vpack.c.bf16 %v7368_v49, %v7363_v47 }
  0xec   :  { %2316 = vmatprep.mubr.f32.mxu1 %v10215_v41  ;;  %v7383_v15 = vsel %vm438_vm0, %v5376_v42, %v5490_v57  ;;  %v7389_v27 = vsel %vm438_vm0, %v5490_v57, %v5491_v63  ;;  %v1923_v57 = vld [vmem:[%s10190_s2 + $0x30] sm:$0xff]  ;;  %v5500_v39 = vunpack.i.l.bf16 %v7253_v43 }
  0xed   :  { %2156 = vmatmul.mubr.f32.gmra.mrb[26].mxu0 %v7248_v12  ;;  %v5036_v49 = vpack.c.bf16 %v7383_v15, %v7415_v48  ;;  %v5034_v47 = vpack.c.bf16 %v7389_v27, %v7353_v20  ;;  %v10272_v15 = vunpack.i.h.bf16 %v7250_v25 }
  0xee   :  { %2161 = vmatprep.mubr.f32.mxu0 %v10215_v41  ;;  %v7270_v33 = vpop.permute.xlu1 %5513  ;;  %1950 = vperm.xlu0 %5747, %v1920_v36  }
  0xef   :  { %2317 = vmatmul.mubr.f32.gmra.mrb[26].mxu1 %v7248_v12  ;;  %v7292_v28 = vpop.permute.xlu0 %5508  ;;  %1945 = vperm.xlu1 %5748, %v1919_v16   ;;  %v5028_v16 = vpack.c.bf16 %v7280_v35, %v7275_v7  ;;  %v7347_v7 = vld [vmem:[%s10188_s0 + $0x178] sm:$0xff]  ;;  %v5515_v14 = vunpack.i.l.bf16 %v7270_v33  ;;  %v5032_v12 = vpack.c.bf16 %v7342_v44, %v7337_v24  ;;  %v5066_v24 = vpack.c.bf16 %v7378_v54, %v7373_v51 }
  0xf0   :  { %2322 = vmatprep.mubr.f32.mxu1 %v10215_v41  ;;  %v5510_v23 = vunpack.i.l.bf16 %v7292_v28  ;;  %v5062_v42 = vpack.c.bf16 %v7358_v52, %v7347_v7  ;;  %v7444_v48 = vsel %vm438_vm0, %v5505_v56, %v10272_v15  ;;  %v10273_v27 = vunpack.i.h.bf16 %v7270_v33 }
  0xf1   :  { %2162 = vmatmul.mubr.f32.gmra.mrb[28].mxu0 %v7263_v59 }
  0xf2   :  { %2167 = vmatprep.mubr.f32.mxu0 %v10215_v41  ;;  %v7326_v36 = vpop.permute.xlu1 %5523  ;;  %1960 = vperm.xlu0 %5747, %v1922_v10   ;;  %v5501_v10 = vunpack.i.h.bf16 %v7253_v43  ;;  %v7437_v32 = vsel %vm438_vm0, %v10271_v21, %v5510_v23 }
  0xf3   :  { %2323 = vmatmul.mubr.f32.gmra.mrb[28].mxu1 %v7263_v59  ;;  %v7350_v35 = vpop.permute.xlu0 %5518  ;;  %1955 = vperm.xlu1 %5748, %v1921_v53   ;;  %v5511_v53 = vunpack.i.h.bf16 %v7292_v28  ;;  %v7418_v28 = vsel %vm438_vm0, %v5481_v31, %v5485_v13  ;;  %v7449_v31 = vsel %vm438_vm0, %v5515_v14, %v10273_v27  ;;  %v5526_v9 = vunpack.i.h.bf16 %v7326_v36 }
  0xf4   :  { %2328 = vmatprep.mubr.f32.mxu1 %v10215_v41  ;;  %v482_v43 = vsel %vm438_vm0, %v5500_v39, %v5501_v10  ;;  %v5521_v51 = vunpack.i.h.bf16 %v7350_v35  ;;  %v5525_v13 = vunpack.i.l.bf16 %v7326_v36  ;;  %v10292_v36 = vld [vmem:[#allocation7_spill] sm:$0xff] }
  0xf5   :  { %2168 = vmatmul.mubr.f32.gmra.mrb[30].mxu0 %v7320_v1  ;;  %v7478_v15 = vsel %vm438_vm0, %v5511_v53, %v5515_v14  ;;  %v10276_v14 = vunpack.i.h.bf16 %v7009_v4  ;;  %v10277_v4 = vunpack.i.h.bf16 %v6988_v17 }
  0xf6   :  { %2399 = vmatprep.mubr.f32.mxu0 %v10215_v41  ;;  %v7404_v59 = vpop.permute.xlu1 %5533  ;;  %v7421_v41 = vsel %vm438_vm0, %v5491_v63, %v5495_v26  ;;  %1970 = vperm.xlu0 %5747, %v1924_v22   ;;  %v499_v26 = vsel %vm438_vm0, %v5510_v23, %v5511_v53  ;;  %v7469_v23 = vsel %vm438_vm0, %v5501_v10, %v5505_v56 }
  0xf7   :  { %2329 = vmatmul.mubr.f32.gmra.mrb[30].mxu1 %v7320_v1  ;;  %v7425_v44 = vpop.permute.xlu0 %5528  ;;  %1965 = vperm.xlu1 %5748, %v1923_v57   ;;  %v5536_v7 = vunpack.i.h.bf16 %v7404_v59  ;;  %v5535_v20 = vunpack.i.l.bf16 %v7404_v59  ;;  %v10274_v57 = vunpack.i.h.bf16 %v6926_v62  ;;  %v5038_v62 = vpack.c.bf16 %v499_v26, %v482_v43 }
  0xf8   :  { %2560 = vmatprep.mubr.f32.mxu1 %v10270_v55  ;;  %v5531_v63 = vunpack.i.h.bf16 %v7425_v44  ;;  %v5530_v54 = vunpack.i.l.bf16 %v7425_v44  ;;  %v5520_v44 = vunpack.i.l.bf16 %v7350_v35  ;;  %v7512_v27 = vsel %vm931_vm1, %v5521_v51, %v5525_v13 }
  0xf9   :  { %2400 = vmatmul.mubr.f32.vlgmr.msra.gmra.mrb[32].mxu0 %v6873_v18  ;;  %v481_v21 = vsel %vm438_vm0, %v10274_v57, %v5500_v39  ;;  %v960_v10 = vsel %vm931_vm1, %v5535_v20, %v5536_v7 }
  0xfa   :  { %5029 = vmatpush1.bf16.msra.mxu0 %v5028_v16  ;;  %2405 = vmatprep.mubr.f32.mxu0 %v10270_v55  ;;  %v7455_v22 = vpop.permute.xlu1 %5543  ;;  %v5068_v16 = vpack.c.bf16 %v7421_v41, %v7418_v28  ;;  %v5070_v41 = vpack.c.bf16 %v7449_v31, %v7444_v48  ;;  %v941_v39 = vsel %vm931_vm1, %v5520_v44, %v5521_v51 }
  0xfb   :  { %2561 = vmatmul.mubr.f32.vlgmr.msra.gmra.mrb[32].mxu1 %v6873_v18  ;;  %v5539_v52 = vpop.permute.xlu0 %5538  ;;  %5031 = vmatprep.subr.bf16.mxu0 %v5030_v30  ;;  %v10275_v18 = vpack.c.bf16 %v7302_v2, %v7297_v58  ;;  %v5040_v30 = vpack.c.bf16 %v7437_v32, %v481_v21  ;;  %v7490_v58 = vsel %vm931_vm1, %v5525_v13, %v5526_v9  ;;  %v5546_v53 = vunpack.i.h.bf16 %v7455_v22 }
  0xfc   :  { %2566 = vmatprep.mubr.f32.mxu1 %v10270_v55  ;;  %v7495_v2 = vsel %vm931_vm1, %v10276_v14, %v5530_v54  ;;  %v958_v35 = vsel %vm931_vm1, %v5530_v54, %v5531_v63  ;;  %v5545_v28 = vunpack.i.l.bf16 %v7455_v22  ;;  %v5540_v43 = vunpack.i.l.bf16 %v5539_v52  ;;  %v7839_v22 = vld [vmem:[%s10188_s0 + $0x190] sm:$0xff] }
  0xfd   :  { %5061 = vmatpush1.bf16.msra.mxu1 %v10275_v18  ;;  %2406 = vmatmul.mubr.f32.gmra.mrb[34].mxu0 %v6901_v38  ;;  %v7515_v31 = vsel %vm931_vm1, %v5531_v63, %v5535_v20  ;;  %v5042_v51 = vpack.c.bf16 %v958_v35, %v941_v39  ;;  %v5074_v13 = vpack.c.bf16 %v960_v10, %v7490_v58  ;;  %v10279_v21 = vunpack.i.h.bf16 %v7077_v45 }
  0xfe   :  { %5063 = vmatprep.subr.bf16.mxu1 %v5062_v42  ;;  %5033 = vmatpush1.bf16.msra.mxu0 %v5032_v12  ;;  %v7484_v56 = vpop.permute.xlu1 %5553  ;;  %v5541_v42 = vunpack.i.h.bf16 %v5539_v52  ;;  %v977_v20 = vsel %vm931_vm1, %v5545_v28, %v5546_v53  ;;  %v10278_v52 = vunpack.i.h.bf16 %v7035_v5  ;;  %v5076_v14 = vpack.c.bf16 %v7515_v31, %v7512_v27 }
  0xff   :  { %2411 = vmatprep.mubr.f32.mxu0 %v10270_v55  ;;  %2567 = vmatmul.mubr.f32.gmra.mrb[34].mxu1 %v6901_v38  ;;  %v5549_v12 = vpop.permute.xlu0 %5548  ;;  %v5072_v38 = vpack.c.bf16 %v7478_v15, %v7469_v23  ;;  %v5555_v26 = vunpack.i.l.bf16 %v7484_v56 }
 0x100   :  { %5035 = vmatprep.subr.bf16.mxu0 %v5034_v47  ;;  %v5551_v32 = vunpack.i.h.bf16 %v5549_v12  ;;  %2572 = vmatprep.mubr.f32.mxu1 %v10270_v55  ;;  %v940_v47 = vsel %vm931_vm1, %v10277_v4, %v5520_v44  ;;  %v5550_v48 = vunpack.i.l.bf16 %v5549_v12  ;;  %v7537_v57 = vsel %vm931_vm1, %v5541_v42, %v5545_v28 }
 0x101   :  { %5065 = vmatpush1.bf16.msra.mxu1 %v5064_v3  ;;  %2412 = vmatmul.mubr.f32.gmra.mrb[36].mxu0 %v6947_v34  ;;  %v5556_v3 = vunpack.i.h.bf16 %v7484_v56  ;;  %v5044_v54 = vpack.c.bf16 %v7495_v2, %v940_v47  ;;  %v7844_v56 = vld [vmem:[%s10188_s0 + $0x220] sm:$0xff] }
 0x102   :  { %5067 = vmatprep.subr.bf16.mxu1 %v5066_v24  ;;  %5037 = vmatpush1.bf16.msra.mxu0 %v5036_v49  ;;  %v7520_v17 = vpop.permute.xlu1 %5563  ;;  %v975_v49 = vsel %vm931_vm1, %v5540_v43, %v5541_v42  ;;  %v992_v63 = vsel %vm931_vm1, %v5550_v48, %v5551_v32  ;;  %v991_v23 = vsel %vm931_vm1, %v10279_v21, %v5550_v48 }
 0x103   :  { %2417 = vmatprep.mubr.f32.mxu0 %v10270_v55  ;;  %2573 = vmatmul.mubr.f32.gmra.mrb[36].mxu1 %v6947_v34  ;;  %v7524_v24 = vpop.permute.xlu0 %5558  ;;  %v974_v34 = vsel %vm931_vm1, %v10278_v52, %v5540_v43  ;;  %v7545_v44 = vsel %vm931_vm1, %v5551_v32, %v5555_v26  ;;  %v5566_v5 = vunpack.i.h.bf16 %v7520_v17  ;;  %v5565_v18 = vunpack.i.l.bf16 %v7520_v17 }
 0x104   :  { %5039 = vmatprep.subr.bf16.mxu0 %v5038_v62  ;;  %2578 = vmatprep.mubr.f32.mxu1 %v10270_v55  ;;  %v994_v45 = vsel %vm931_vm1, %v5555_v26, %v5556_v3  ;;  %v5560_v62 = vunpack.i.l.bf16 %v7524_v24  ;;  %v5046_v58 = vpack.c.bf16 %v992_v63, %v975_v49  ;;  %v5048_v2 = vpack.c.bf16 %v991_v23, %v974_v34 }
 0x105   :  { %5069 = vmatpush1.bf16.msra.mxu1 %v5068_v16  ;;  %v5561_v16 = vunpack.i.h.bf16 %v7524_v24  ;;  %2418 = vmatmul.mubr.f32.gmra.mrb[38].mxu0 %v6979_v40  ;;  %v5080_v10 = vpack.c.bf16 %v7545_v44, %v7537_v57  ;;  %v5078_v42 = vpack.c.bf16 %v994_v45, %v977_v20  ;;  %v10280_v43 = vunpack.i.h.bf16 %v7126_v46 }
 0x106   :  { %5071 = vmatprep.subr.bf16.mxu1 %v5070_v41  ;;  %5041 = vmatpush1.bf16.msra.mxu0 %v5040_v30  ;;  %v7550_v15 = vpop.permute.xlu1 %5573 }
 0x107   :  { %2423 = vmatprep.mubr.f32.mxu0 %v10270_v55  ;;  %2579 = vmatmul.mubr.f32.gmra.mrb[38].mxu1 %v6979_v40  ;;  %v5569_v41 = vpop.permute.xlu0 %5568  ;;  %v5576_v30 = vunpack.i.h.bf16 %v7550_v15  ;;  %v5575_v39 = vunpack.i.l.bf16 %v7550_v15  ;;  %v1434_v40 = vsel %vm1424_vm2, %v5560_v62, %v5561_v16  ;;  %v1435_v47 = vsel %vm1424_vm2, %v5561_v16, %v5565_v18 }
 0x108   :  { %5043 = vmatprep.subr.bf16.mxu0 %v5042_v51  ;;  %v5571_v12 = vunpack.i.h.bf16 %v5569_v41  ;;  %v5570_v35 = vunpack.i.l.bf16 %v5569_v41  ;;  %2584 = vmatprep.mubr.f32.mxu1 %v10270_v55 }
 0x109   :  { %5073 = vmatpush1.bf16.msra.mxu1 %v5072_v38  ;;  %2424 = vmatmul.mubr.f32.gmra.mrb[40].mxu0 %v7007_v8  ;;  %v1436_v38 = vsel %vm1424_vm2, %v5565_v18, %v5566_v5  ;;  %v1453_v4 = vsel %vm1424_vm2, %v5575_v39, %v5576_v30  ;;  %v10282_v18 = vunpack.i.h.bf16 %v7158_v19 }
 0x10a   :  { %5075 = vmatprep.subr.bf16.mxu1 %v5074_v13  ;;  %5045 = vmatpush1.bf16.msra.mxu0 %v5044_v54  ;;  %v7567_v28 = vpop.permute.xlu1 %5583  ;;  %v1451_v32 = vsel %vm1424_vm2, %v5570_v35, %v5571_v12  ;;  %v1450_v48 = vsel %vm1424_vm2, %v10280_v43, %v5570_v35  ;;  %v1452_v27 = vsel %vm1424_vm2, %v5571_v12, %v5575_v39  ;;  %v10283_v39 = vunpack.i.h.bf16 %v7173_v11  ;;  %v1926_v43 = vld [vmem:[%s10190_s2 + $0x48] sm:$0xff] }
 0x10b   :  { %2429 = vmatprep.mubr.f32.mxu0 %v10270_v55  ;;  %2585 = vmatmul.mubr.f32.gmra.mrb[40].mxu1 %v7007_v8  ;;  %v5579_v31 = vpop.permute.xlu0 %5578  ;;  %v10222_v54 = vunpack.i.h.bf16 %v7567_v28  ;;  %v5585_v24 = vunpack.i.l.bf16 %v7567_v28  ;;  %v5050_v51 = vpack.c.bf16 %v1451_v32, %v1434_v40  ;;  %v5082_v46 = vpack.c.bf16 %v1453_v4, %v1436_v38  ;;  %v44_v32 = vld [vmem:[%s10188_s0 + $0xf8] sm:$0xff]  ;;  %v46_v38 = vld [vmem:[%s10188_s0 + $0x108] sm:$0xff] }
 0x10c   :  { %5047 = vmatprep.subr.bf16.mxu0 %v5046_v58  ;;  %v5581_v26 = vunpack.i.h.bf16 %v5579_v31  ;;  %2590 = vmatprep.mubr.f32.mxu1 %v10270_v55  ;;  %v5580_v13 = vunpack.i.l.bf16 %v5579_v31  ;;  %v10281_v8 = vunpack.i.h.bf16 %v7106_v61  ;;  %v5084_v52 = vpack.c.bf16 %v1452_v27, %v1435_v47  ;;  %v1927_v27 = vld [vmem:[%s10190_s2 + $0x50] sm:$0xff] }
 0x10d   :  { %5077 = vmatpush1.bf16.msra.mxu1 %v5076_v14  ;;  %2430 = vmatmul.mubr.f32.gmra.mrb[42].mxu0 %v7032_v50  ;;  %v1470_v44 = vsel %vm1424_vm2, %v5585_v24, %v10222_v54 }
 0x10e   :  { %5079 = vmatprep.subr.bf16.mxu1 %v5078_v42  ;;  %v1433_v49 = vsel %vm1424_vm2, %v10281_v8, %v5560_v62  ;;  %5049 = vmatpush1.bf16.msra.mxu0 %v5048_v2  ;;  %v7590_v63 = vpop.permute.xlu1 %5593  ;;  %v1468_v61 = vsel %vm1424_vm2, %v5580_v13, %v5581_v26  ;;  %v1467_v45 = vsel %vm1424_vm2, %v10282_v18, %v5580_v13  ;;  %v27_v42 = vld [vmem:[%s10188_s0 + $0x68] sm:$0xff]  ;;  %v10285_v13 = vunpack.i.h.bf16 %v7231_v60  ;;  %v1929_v60 = vld [vmem:[%s10190_s2 + $0x60] sm:$0xff] }
 0x10f   :  { %2435 = vmatprep.mubr.f32.mxu0 %v10270_v55  ;;  %v5052_v20 = vpack.c.bf16 %v1450_v48, %v1433_v49  ;;  %2591 = vmatmul.mubr.f32.gmra.mrb[42].mxu1 %v7032_v50  ;;  %v5589_v34 = vpop.permute.xlu0 %5588  ;;  %v10221_v57 = vunpack.i.h.bf16 %v7590_v63  ;;  %v5595_v21 = vunpack.i.l.bf16 %v7590_v63  ;;  %v1925_v50 = vld [vmem:[%s10190_s2 + $0x40] sm:$0xff]  ;;  %v1469_v62 = vsel %vm1424_vm2, %v5581_v26, %v5585_v24  ;;  %v1928_v49 = vld [vmem:[%s10190_s2 + $0x58] sm:$0xff] }
 0x110   :  { %5051 = vmatprep.subr.bf16.mxu0 %v5050_v51  ;;  %v5591_v23 = vunpack.i.h.bf16 %v5589_v34  ;;  %v5590_v16 = vunpack.i.l.bf16 %v5589_v34  ;;  %2596 = vmatprep.mubr.f32.mxu1 %v10270_v55  ;;  %v5090_v31 = vpack.c.bf16 %v44_v32, %v27_v42 }
 0x111   :  { %5081 = vmatpush1.bf16.msra.mxu1 %v5080_v10  ;;  %2436 = vmatmul.mubr.f32.gmra.mrb[44].mxu0 %v7073_v0  ;;  %v1487_v41 = vsel %vm1424_vm2, %v5595_v21, %v10221_v57 }
 0x112   :  { %5083 = vmatprep.subr.bf16.mxu1 %v5082_v46  ;;  %v1484_v58 = vsel %vm1424_vm2, %v10283_v39, %v5590_v16  ;;  %5053 = vmatpush1.bf16.msra.mxu0 %v5052_v20  ;;  %v1486_v14 = vsel %vm1424_vm2, %v5591_v23, %v5595_v21  ;;  %v1485_v19 = vsel %vm1424_vm2, %v5590_v16, %v5591_v23  ;;  %v7617_v2 = vpop.permute.xlu1 %5603  ;;  %v1931_v16 = vld [vmem:[%s10190_s2 + $0x70] sm:$0xff]  ;;  %v1932_v39 = vld [vmem:[%s10190_s2 + $0x78] sm:$0xff] }
 0x113   :  { %2441 = vmatprep.mubr.f32.mxu0 %v10270_v55  ;;  %v5056_v12 = vpack.c.bf16 %v1484_v58, %v1467_v45  ;;  %2597 = vmatmul.mubr.f32.gmra.mrb[44].mxu1 %v7073_v0  ;;  %v7620_v35 = vpop.permute.xlu0 %5598  ;;  %v5054_v10 = vpack.c.bf16 %v1485_v19, %v1468_v61  ;;  %v5088_v40 = vpack.c.bf16 %v1486_v14, %v1469_v62  ;;  %v29_v0 = vld [vmem:[%s10188_s0 + $0x78] sm:$0xff]  ;;  %v10289_v45 = vunpack.i.h.bf16 %v7270_v33  ;;  %v10290_v33 = vld [vmem:[#allocation5_spill] sm:$0xff] }
 0x114   :  { %1975 = vperm.xlu1 %5748, %v1925_v50   ;;  %2602 = vmatprep.mubr.f32.mxu1 %v10270_v55  ;;  %v5086_v11 = vpack.c.bf16 %v1487_v41, %v1470_v44  ;;  %v5600_v4 = vunpack.i.l.bf16 %v7620_v35  ;;  %v5122_v24 = vpack.c.bf16 %v46_v38, %v29_v0  ;;  %v10287_v44 = vld [vmem:[#allocation4_spill] sm:$0xff]  ;;  %v10288_v50 = vunpack.i.h.bf16 %v7250_v25 }
 0x115   :  { %5085 = vmatpush1.bf16.msra.mxu1 %v5084_v52  ;;  %2442 = vmatmul.mubr.f32.gmra.mrb[46].mxu0 %v7103_v37  ;;  %v10286_v52 = vld [vmem:[#allocation3_spill] sm:$0xff]  ;;  %v80_v25 = vld [vmem:[%s10188_s0 + $0x228] sm:$0xff] }
 0x116   :  { %5055 = vmatprep.subr.bf16.mxu0 %v5054_v10  ;;  %2447 = vmatprep.mubr.f32.mxu0 %v10270_v55  ;;  %v7638_v47 = vpop.permute.xlu1 %5613 }
 0x117   :  { %5057 = vmatpush1.bf16.msra.mxu0 %v5056_v12  ;;  %2603 = vmatmul.mubr.f32.gmra.mrb[46].mxu1 %v7103_v37  ;;  %v7644_v48 = vpop.permute.xlu0 %5608  ;;  %v10284_v37 = vunpack.i.h.bf16 %v7210_v29 }
 0x118   :  { %5087 = vmatprep.subr.bf16.mxu1 %v5086_v11  ;;  %v5610_v26 = vunpack.i.l.bf16 %v7644_v48  ;;  %2608 = vmatprep.mubr.f32.mxu1 %v10270_v55 }
 0x119   :  { %5089 = vmatpush1.bf16.msra.mxu1 %v5088_v40  ;;  %2448 = vmatmul.mubr.f32.gmra.mrb[48].mxu0 %v7124_v6  ;;  %v7657_v51 = vsel %vm438_vm0, %v10284_v37, %v5600_v4  ;;  %v10291_v40 = vld [vmem:[#allocation6_spill] sm:$0xff] }
 0x11a   :  { %1980 = vperm.xlu0 %5747, %v1926_v43   ;;  %v7664_v46 = vsel %vm438_vm0, %v10285_v13, %v5610_v26  ;;  %2453 = vmatprep.mubr.f32.mxu0 %v10270_v55  ;;  %v7667_v8 = vpop.permute.xlu1 %5623  ;;  %v7772_v43 = vld [vmem:[%s10188_s0 + $0xf0] sm:$0xff] }
 0x11b   :  { %1985 = vperm.xlu1 %5748, %v1927_v27   ;;  %2609 = vmatmul.mubr.f32.gmra.mrb[48].mxu1 %v7124_v6  ;;  %v7675_v20 = vpop.permute.xlu0 %5618  ;;  %v1930_v6 = vld [vmem:[%s10190_s2 + $0x68] sm:$0xff]  ;;  %v7786_v13 = vld [vmem:[%s10188_s0 + $0x70] sm:$0xff] }
 0x11c   :  { %5091 = vmatprep.subr.bf16.mxu0 %v5090_v31  ;;  %2614 = vmatprep.mubr.f32.mxu1 %v10270_v55  ;;  %v5620_v34 = vunpack.i.l.bf16 %v7675_v20  ;;  %v7777_v27 = vld [vmem:[%s10188_s0 + $0x188] sm:$0xff]  ;;  %v5601_v31 = vunpack.i.h.bf16 %v7620_v35 }
 0x11d   :  { %5123 = vmatprep.subr.bf16.mxu1 %v5122_v24  ;;  %2454 = vmatmul.mubr.f32.gmra.mrb[50].mxu0 %v10286_v52  ;;  %v5611_v24 = vunpack.i.h.bf16 %v7644_v48 }
 0x11e   :  { %1990 = vperm.xlu0 %5747, %v1928_v49   ;;  %2459 = vmatprep.mubr.f32.mxu0 %v10270_v55  ;;  %v7684_v21 = vpop.permute.xlu1 %5633  ;;  %v7703_v18 = vsel %vm438_vm0, %v10288_v50, %v5620_v34  ;;  %v7791_v49 = vld [vmem:[%s10188_s0 + $0x100] sm:$0xff]  ;;  %v7807_v50 = vld [vmem:[%s10188_s0 + $0x210] sm:$0xff]  ;;  %v7860_v54 = vsel %vm438_vm0, %v5600_v4, %v5601_v31 }
 0x11f   :  { %1995 = vperm.xlu1 %5748, %v1929_v60   ;;  %2615 = vmatmul.mubr.f32.gmra.mrb[50].mxu1 %v10286_v52  ;;  %v7690_v23 = vpop.permute.xlu0 %5628  ;;  %v78_v60 = vld [vmem:[%s10188_s0 + $0x218] sm:$0xff]  ;;  %v10223_v52 = vunpack.i.h.bf16 %v7617_v2 }
 0x120   :  { %v5630_v61 = vunpack.i.l.bf16 %v7690_v23  ;;  %2620 = vmatprep.mubr.f32.mxu1 %v10270_v55  ;;  %v5094_v57 = vpack.c.bf16 %v78_v60, %v7777_v27 }
 0x121   :  { %2460 = vmatmul.mubr.f32.gmra.mrb[52].mxu0 %v10287_v44 }
 0x122   :  { %2000 = vperm.xlu0 %5747, %v1930_v6   ;;  %v7710_v62 = vsel %vm438_vm0, %v10289_v45, %v5630_v61  ;;  %2465 = vmatprep.mubr.f32.mxu0 %v10270_v55  ;;  %v7713_v41 = vpop.permute.xlu1 %5643  ;;  %v5605_v6 = vunpack.i.l.bf16 %v7617_v2  ;;  %v7812_v45 = vld [vmem:[%s10188_s0 + $0x198] sm:$0xff] }
 0x123   :  { %2005 = vperm.xlu1 %5748, %v1931_v16   ;;  %2621 = vmatmul.mubr.f32.gmra.mrb[52].mxu1 %v10287_v44  ;;  %v7721_v58 = vpop.permute.xlu0 %5638  ;;  %v10293_v16 = vld [vmem:[#allocation8_spill] sm:$0xff]  ;;  %v7802_v44 = vld [vmem:[%s10188_s0 + $0x180] sm:$0xff] }
 0x124   :  { %2626 = vmatprep.mubr.f32.mxu1 %v10270_v55  ;;  %v5640_v14 = vunpack.i.l.bf16 %v7721_v58 }
 0x125   :  { %2466 = vmatmul.mubr.f32.gmra.mrb[54].mxu0 %v10290_v33 }
 0x126   :  { %2010 = vperm.xlu0 %5747, %v1932_v39   ;;  %2471 = vmatprep.mubr.f32.mxu0 %v10270_v55  ;;  %v7732_v10 = vpop.permute.xlu1 %5653  ;;  %v7740_v11 = vsel %vm931_vm1, %v5526_v9, %v5640_v14  ;;  %v10224_v39 = vunpack.i.h.bf16 %v7638_v47 }
 0x127   :  { %2627 = vmatmul.mubr.f32.gmra.mrb[54].mxu1 %v10290_v33  ;;  %v7728_v19 = vpop.permute.xlu0 %5648  ;;  %v5615_v33 = vunpack.i.l.bf16 %v7638_v47  ;;  %v5655_v29 = vunpack.i.l.bf16 %v7732_v10 }
 0x128   :  { %v10225_v12 = vunpack.i.l.bf16 %v7728_v19  ;;  %2632 = vmatprep.mubr.f32.mxu1 %v10270_v55 }
 0x129   :  { %2472 = vmatmul.mubr.f32.gmra.mrb[56].mxu0 %v10291_v40  ;;  %v7875_v4 = vsel %vm438_vm0, %v5611_v24, %v5615_v33  ;;  %v7887_v27 = vsel %vm438_vm0, %v5615_v33, %v10224_v39  ;;  %v5641_v33 = vunpack.i.h.bf16 %v7721_v58 }
 0x12a   :  { %v7747_v42 = vsel %vm931_vm1, %v5536_v7, %v10225_v12  ;;  %2477 = vmatprep.mubr.f32.mxu0 %v10270_v55  ;;  %v7767_v7 = vld [vmem:[%s10188_s0 + $0x60] sm:$0xff] }
 0x12b   :  { %2633 = vmatmul.mubr.f32.gmra.mrb[56].mxu1 %v10291_v40  ;;  %v7753_v0 = vpop.permute.xlu0 %5658 }
 0x12c   :  { %2638 = vmatprep.mubr.f32.mxu1 %v10270_v55  ;;  %v10220_v9 = vunpack.i.l.bf16 %v7753_v0 }
 0x12d   :  { %2478 = vmatmul.mubr.f32.gmra.mrb[58].mxu0 %v10292_v36 }
 0x12e   :  { %v7758_v38 = vpop.permute.xlu1 %5663  ;;  %2483 = vmatprep.mubr.f32.mxu0 %v10270_v55  ;;  %v7821_v40 = vsel %vm931_vm1, %v5546_v53, %v10220_v9  ;;  %v5124_v9 = vpack.c.bf16 %v7791_v49, %v7786_v13  ;;  %v7866_v53 = vsel %vm438_vm0, %v5601_v31, %v5605_v6  ;;  %v5626_v31 = vunpack.i.h.bf16 %v7667_v8 }
 0x12f   :  { %2639 = vmatmul.mubr.f32.gmra.mrb[58].mxu1 %v10292_v36  ;;  %v7762_v59 = vpop.permute.xlu0 %5668 }
 0x130   :  { %v10219_v37 = vunpack.i.l.bf16 %v7762_v59  ;;  %2644 = vmatprep.mubr.f32.mxu1 %v10270_v55 }
 0x131   :  { %2484 = vmatmul.mubr.f32.gmra.mrb[60].mxu0 %v10293_v16 }
 0x132   :  { %v7828_v36 = vsel %vm931_vm1, %v5556_v3, %v10219_v37  ;;  %v7830_v32 = vpop.permute.xlu1 %5673  ;;  %2489 = vmatprep.mubr.f32.mxu0 %v10270_v55  ;;  %v5092_v37 = vpack.c.bf16 %v7772_v43, %v7767_v7  ;;  %v5096_v7 = vpack.c.bf16 %v7807_v50, %v7802_v44  ;;  %v5126_v43 = vpack.c.bf16 %v80_v25, %v7812_v45 }
 0x133   :  { %2645 = vmatmul.mubr.f32.gmra.mrb[60].mxu1 %v10293_v16  ;;  %v7849_v3 = vpop.permute.xlu0 %5678  ;;  %v469_v16 = vsel %vm438_vm0, %v5610_v26, %v5611_v24  ;;  %v7882_v26 = vsel %vm438_vm0, %v5605_v6, %v10223_v52  ;;  %v5621_v25 = vunpack.i.h.bf16 %v7675_v20  ;;  %v5625_v24 = vunpack.i.l.bf16 %v7667_v8 }
 0x134   :  { %2650 = vmatprep.mubr.f32.mxu1 %v10270_v55  ;;  %v5680_v48 = vunpack.i.l.bf16 %v7849_v3  ;;  %v5098_v60 = vpack.c.bf16 %v469_v16, %v7860_v54  ;;  %v5631_v6 = vunpack.i.h.bf16 %v7690_v23  ;;  %v5636_v44 = vunpack.i.h.bf16 %v7684_v21  ;;  %v7910_v54 = vld [vmem:[%s10189_s1] sm:$0xff] }
 0x135   :  { %2490 = vmatmul.mubr.f32.gmra.mrb[62].mxu0 %v7320_v1  ;;  %v5635_v50 = vunpack.i.l.bf16 %v7684_v21  ;;  %v5645_v52 = vunpack.i.l.bf16 %v7713_v41  ;;  %v5651_v16 = vunpack.i.h.bf16 %v7728_v19  ;;  %v5130_v17 = vpack.c.bf16 %v7887_v27, %v7882_v26 }
 0x136   :  { %2721 = vmatprep.mubr.f32.mxu0 %v10270_v55  ;;  %v7920_v35 = vsel %vm1424_vm2, %v5566_v5, %v5680_v48  ;;  %v7938_v5 = vsel %vm438_vm0, %v5625_v24, %v5626_v31  ;;  %v7941_v15 = vsel %vm438_vm0, %v5621_v25, %v5625_v24  ;;  %v945_v23 = vsel %vm931_vm1, %v5640_v14, %v5641_v33 }
 0x137   :  { %2651 = vmatmul.mubr.f32.gmra.mrb[62].mxu1 %v7320_v1  ;;  %v7893_v13 = vpop.permute.xlu1 %5683  ;;  %v7895_v49 = vpop.permute.xlu0 %5688  ;;  %v5646_v1 = vunpack.i.h.bf16 %v7713_v41  ;;  %v7953_v26 = vsel %vm438_vm0, %v5631_v6, %v5635_v50  ;;  %v505_v20 = vsel %vm438_vm0, %v5635_v50, %v5636_v44  ;;  %v10307_v8 = vunpack.i.h.bf16 %v7732_v10 }
 0x138   :  { %v5690_v45 = vunpack.i.l.bf16 %v7895_v49  ;;  %2882 = vmatprep.mubr.f32.mxu1 %v10270_v55  ;;  %v5136_v14 = vpack.c.bf16 %v7953_v26, %v7941_v15 }
 0x139   :  { %2722 = vmatmul.mubr.f32.vlgmr.msra.gmra.mrb[64].mxu0 %v7910_v54 }
 0x13a   :  { %v7927_v39 = vsel %vm1424_vm2, %v5576_v30, %v5690_v45  ;;  %5093 = vmatpush1.bf16.msra.mxu0 %v5092_v37  ;;  %2727 = vmatprep.mubr.f32.mxu0 %v10270_v55  ;;  %v503_v37 = vsel %vm438_vm0, %v5630_v61, %v5631_v6  ;;  %v10294_v61 = vunpack.i.l.bf16 %v7728_v19  ;;  %v5132_v6 = vpack.c.bf16 %v7875_v4, %v7866_v53 }
 0x13b   :  { %v5116_v12 = vpack.c.bf16 %v7927_v39, %v7920_v35  ;;  %2883 = vmatmul.mubr.f32.vlgmr.msra.gmra.mrb[64].mxu1 %v7910_v54  ;;  %5095 = vmatprep.subr.bf16.mxu0 %v5094_v57  ;;  %v486_v57 = vsel %vm438_vm0, %v5620_v34, %v5621_v25  ;;  %v7955_v27 = vpop.permute.xlu1 %5693  ;;  %v7969_v34 = vsel %vm931_vm1, %v5645_v52, %v5646_v1  ;;  %v10295_v25 = vunpack.i.h.bf16 %v7732_v10  ;;  %v8181_v39 = vld [vmem:[%s10189_s1 + $0x48] sm:$0xff]  ;;  %v8190_v35 = vld [vmem:[%s10189_s1 + $0x50] sm:$0xff] }
 0x13c   :  { %5125 = vmatpush1.bf16.msra.mxu1 %v5124_v9  ;;  %v7943_v30 = vpop.permute.xlu0 %5698  ;;  %2888 = vmatprep.mubr.f32.mxu1 %v10270_v55  ;;  %v7960_v9 = vld [vmem:[%s10189_s1 + $0x8] sm:$0xff]  ;;  %v5102_v58 = vpack.c.bf16 %v503_v37, %v486_v57  ;;  %v7991_v19 = vsel %vm931_vm1, %v5641_v33, %v5645_v52  ;;  %v10296_v53 = vpack.c.bf16 %v7844_v56, %v7839_v22  ;;  %v8008_v52 = vld [vmem:[%s10189_s1 + $0x10] sm:$0xff]  ;;  %v5666_v56 = vunpack.i.h.bf16 %v7758_v38 }
 0x13d   :  { %2728 = vmatmul.mubr.f32.gmra.mrb[66].mxu0 %v7960_v9  ;;  %5127 = vmatprep.subr.bf16.mxu1 %v5126_v43  ;;  %v962_v43 = vsel %vm931_vm1, %v10294_v61, %v5651_v16  ;;  %v7981_v24 = vsel %vm931_vm1, %v5655_v29, %v10295_v25  ;;  %v5700_v50 = vunpack.i.l.bf16 %v7943_v30  ;;  %v5671_v61 = vunpack.i.h.bf16 %v7762_v59 }
 0x13e   :  { %5097 = vmatpush1.bf16.msra.mxu0 %v5096_v7  ;;  %2733 = vmatprep.mubr.f32.mxu0 %v10270_v55  ;;  %v5661_v7 = vunpack.i.h.bf16 %v7753_v0  ;;  %v5134_v4 = vpack.c.bf16 %v505_v20, %v7938_v5  ;;  %v5106_v33 = vpack.c.bf16 %v962_v43, %v945_v23  ;;  %v5138_v22 = vpack.c.bf16 %v7981_v24, %v7969_v34 }
 0x13f   :  { %2889 = vmatmul.mubr.f32.gmra.mrb[66].mxu1 %v7960_v9  ;;  %5099 = vmatprep.subr.bf16.mxu0 %v5098_v60  ;;  %v8002_v60 = vsel %vm931_vm1, %v5651_v16, %v5655_v29  ;;  %v5665_v5 = vunpack.i.l.bf16 %v7758_v38  ;;  %v5676_v29 = vunpack.i.h.bf16 %v7830_v32  ;;  %v5675_v16 = vunpack.i.l.bf16 %v7830_v32  ;;  %v8028_v26 = vpop.permute.xlu1 %5703 }
 0x140   :  { %v7994_v25 = vpop.permute.xlu0 %5708  ;;  %2894 = vmatprep.mubr.f32.mxu1 %v10270_v55  ;;  %5129 = vmatpush1.bf16.msra.mxu1 %v10296_v53  ;;  %v10297_v57 = vpack.c.bf16 %v7664_v46, %v7657_v51  ;;  %v10299_v20 = vunpack.i.h.bf16 %v7590_v63  ;;  %v10300_v51 = vunpack.i.l.bf16 %v7753_v0  ;;  %v5691_v23 = vunpack.i.h.bf16 %v7895_v49 }
 0x141   :  { %v5710_v15 = vunpack.i.l.bf16 %v7994_v25  ;;  %2734 = vmatmul.mubr.f32.gmra.mrb[68].mxu0 %v8008_v52  ;;  %5131 = vmatprep.subr.bf16.mxu1 %v5130_v17  ;;  %v10298_v17 = vunpack.i.h.bf16 %v7567_v28  ;;  %v5681_v28 = vunpack.i.h.bf16 %v7849_v3  ;;  %v10301_v63 = vunpack.i.l.bf16 %v7762_v59 }
 0x142   :  { %5101 = vmatpush1.bf16.msra.mxu0 %v10297_v57  ;;  %2739 = vmatprep.mubr.f32.mxu0 %v10270_v55  ;;  %v979_v46 = vsel %vm931_vm1, %v10300_v51, %v5661_v7  ;;  %v5685_v0 = vunpack.i.l.bf16 %v7893_v13  ;;  %v5696_v53 = vunpack.i.h.bf16 %v7955_v27  ;;  %v5695_v57 = vunpack.i.l.bf16 %v7955_v27 }
 0x143   :  { %v8026_v37 = vsel %vm1424_vm2, %v10298_v17, %v5700_v50  ;;  %v8035_v34 = vsel %vm1424_vm2, %v10299_v20, %v5710_v15  ;;  %2895 = vmatmul.mubr.f32.gmra.mrb[68].mxu1 %v8008_v52  ;;  %5103 = vmatprep.subr.bf16.mxu0 %v5102_v58  ;;  %v996_v24 = vsel %vm931_vm1, %v10301_v63, %v5671_v61  ;;  %v5686_v58 = vunpack.i.h.bf16 %v7893_v13  ;;  %v8056_v17 = vld [vmem:[%s10189_s1 + $0x18] sm:$0xff] }
 0x144   :  { %v5120_v43 = vpack.c.bf16 %v8035_v34, %v8026_v37  ;;  %2900 = vmatprep.mubr.f32.mxu1 %v10270_v55  ;;  %5133 = vmatpush1.bf16.msra.mxu1 %v5132_v6  ;;  %v5140_v59 = vpack.c.bf16 %v8002_v60, %v7991_v19  ;;  %v10302_v6 = vpack.c.bf16 %v7710_v62, %v7703_v18  ;;  %v5701_v18 = vunpack.i.h.bf16 %v7943_v30  ;;  %v8199_v37 = vld [vmem:[%s10189_s1 + $0x58] sm:$0xff]  ;;  %v8208_v34 = vld [vmem:[%s10189_s1 + $0x60] sm:$0xff] }
 0x145   :  { %2740 = vmatmul.mubr.f32.gmra.mrb[70].mxu0 %v8056_v17  ;;  %5135 = vmatprep.subr.bf16.mxu1 %v5134_v4  ;;  %v981_v20 = vsel %vm931_vm1, %v5665_v5, %v5666_v56  ;;  %v998_v51 = vsel %vm931_vm1, %v5675_v16, %v5676_v29  ;;  %v980_v63 = vsel %vm931_vm1, %v5661_v7, %v5665_v5  ;;  %v5711_v62 = vunpack.i.h.bf16 %v7994_v25 }
 0x146   :  { %5105 = vmatpush1.bf16.msra.mxu0 %v10302_v6  ;;  %2745 = vmatprep.mubr.f32.mxu0 %v10270_v55  ;;  %v997_v4 = vsel %vm931_vm1, %v5671_v61, %v5675_v16  ;;  %v5110_v19 = vpack.c.bf16 %v996_v24, %v979_v46  ;;  %v1438_v60 = vsel %vm1424_vm2, %v5680_v48, %v5681_v28  ;;  %v8083_v61 = vpop.permute.xlu1 %5713  ;;  %v5706_v49 = vunpack.i.h.bf16 %v8028_v26 }
 0x147   :  { %2901 = vmatmul.mubr.f32.gmra.mrb[70].mxu1 %v8056_v17  ;;  %5107 = vmatprep.subr.bf16.mxu0 %v5106_v33  ;;  %v1455_v7 = vsel %vm1424_vm2, %v5690_v45, %v5691_v23  ;;  %v8088_v33 = vld [vmem:[%s10189_s1 + $0x20] sm:$0xff]  ;;  %v5142_v5 = vpack.c.bf16 %v998_v51, %v981_v20  ;;  %v1440_v3 = vsel %vm1424_vm2, %v5685_v0, %v5686_v58  ;;  %v5705_v45 = vunpack.i.l.bf16 %v8028_v26  ;;  %v8118_v51 = vld [vmem:[%s10189_s1 + $0x28] sm:$0xff] }
 0x148   :  { %2906 = vmatprep.mubr.f32.mxu1 %v10270_v55  ;;  %5137 = vmatpush1.bf16.msra.mxu1 %v5136_v14  ;;  %v1457_v48 = vsel %vm1424_vm2, %v5695_v57, %v5696_v53  ;;  %v5716_v14 = vunpack.i.h.bf16 %v8083_v61  ;;  %v5715_v16 = vunpack.i.l.bf16 %v8083_v61  ;;  %v5114_v46 = vpack.c.bf16 %v1455_v7, %v1438_v60  ;;  %v5719_v60 = vpop.permute.xlu0 %5718  ;;  %v64_v7 = vld [vmem:[%s10188_s0 + $0x1a0] sm:$0xff] }
 0x149   :  { %2746 = vmatmul.mubr.f32.gmra.mrb[72].mxu0 %v8088_v33  ;;  %5139 = vmatprep.subr.bf16.mxu1 %v5138_v22  ;;  %v10303_v22 = vpack.c.bf16 %v7747_v42, %v7740_v11  ;;  %v5144_v24 = vpack.c.bf16 %v997_v4, %v980_v63  ;;  %v1472_v6 = vsel %vm1424_vm2, %v5700_v50, %v5701_v18 }
 0x14a   :  { %2751 = vmatprep.mubr.f32.mxu0 %v10270_v55  ;;  %v1489_v20 = vsel %vm1424_vm2, %v5710_v15, %v5711_v62  ;;  %v1439_v11 = vsel %vm1424_vm2, %v5681_v28, %v5685_v0  ;;  %v1456_v42 = vsel %vm1424_vm2, %v5691_v23, %v5695_v57  ;;  %v5146_v30 = vpack.c.bf16 %v1457_v48, %v1440_v3  ;;  %v8241_v3 = vld [vmem:[%s10189_s1 + $0x78] sm:$0xff] }
 0x14b   :  { %5109 = vmatpush1.bf16.msra.mxu0 %v10303_v22  ;;  %2907 = vmatmul.mubr.f32.gmra.mrb[72].mxu1 %v8088_v33  ;;  %v10304_v50 = vpack.c.bf16 %v7828_v36, %v7821_v40  ;;  %v1474_v25 = vsel %vm1424_vm2, %v5705_v45, %v5706_v49  ;;  %v1491_v15 = vsel %vm1424_vm2, %v5715_v16, %v5716_v14  ;;  %v30_v40 = vld [vmem:[%s10188_s0 + $0x80] sm:$0xff]  ;;  %v47_v36 = vld [vmem:[%s10188_s0 + $0x110] sm:$0xff]  ;;  %v5721_v48 = vunpack.i.h.bf16 %v5719_v60 }
 0x14c   :  { %5111 = vmatprep.subr.bf16.mxu0 %v5110_v19  ;;  %2912 = vmatprep.mubr.f32.mxu1 %v10270_v55  ;;  %v5118_v28 = vpack.c.bf16 %v1489_v20, %v1472_v6  ;;  %v5148_v23 = vpack.c.bf16 %v1456_v42, %v1439_v11  ;;  %v1473_v0 = vsel %vm1424_vm2, %v5701_v18, %v5705_v45  ;;  %v8158_v18 = vld [vmem:[%s10189_s1 + $0x38] sm:$0xff]  ;;  %v5720_v45 = vunpack.i.l.bf16 %v5719_v60 }
 0x14d   :  { %5141 = vmatpush1.bf16.msra.mxu1 %v5140_v59  ;;  %2752 = vmatmul.mubr.f32.gmra.mrb[74].mxu0 %v8118_v51  ;;  %v1490_v57 = vsel %vm1424_vm2, %v5711_v62, %v5715_v16  ;;  %v8144_v59 = vld [vmem:[%s10189_s1 + $0x30] sm:$0xff]  ;;  %v5150_v63 = vpack.c.bf16 %v1491_v15, %v1474_v25  ;;  %v8152_v4 = vpack.c.bf16 %v47_v36, %v30_v40  ;;  %v5724_v16 = vpop.permute.xlu1 %5723  ;;  %v10306_v6 = vunpack.i.h.bf16 %v7617_v2 }
 0x14e   :  { %5143 = vmatprep.subr.bf16.mxu1 %v5142_v5  ;;  %2757 = vmatprep.mubr.f32.mxu0 %v10270_v55  ;;  %v5152_v19 = vpack.c.bf16 %v1490_v57, %v1473_v0  ;;  %v8226_v62 = vld [vmem:[%s10189_s1 + $0x70] sm:$0xff]  ;;  %v5726_v11 = vunpack.i.h.bf16 %v5724_v16  ;;  %v5725_v42 = vunpack.i.l.bf16 %v5724_v16 }
 0x14f   :  { %5113 = vmatpush1.bf16.msra.mxu0 %v10304_v50  ;;  %2913 = vmatmul.mubr.f32.gmra.mrb[74].mxu1 %v8118_v51  ;;  %v81_v5 = vld [vmem:[%s10188_s0 + $0x230] sm:$0xff]  ;;  %v455_v20 = vsel %vm438_vm0, %v10306_v6, %v5720_v45 }
 0x150   :  { %5115 = vmatprep.subr.bf16.mxu0 %v5114_v46  ;;  %2918 = vmatprep.mubr.f32.mxu1 %v10270_v55  ;;  %v5158_v22 = vpack.c.bf16 %v81_v5, %v64_v7  ;;  %v10305_v46 = vunpack.i.h.bf16 %v7638_v47  ;;  %v489_v2 = vsel %vm438_vm0, %v5626_v31, %v5725_v42  ;;  %v506_v50 = vsel %vm438_vm0, %v5636_v44, %v5726_v11 }
 0x151   :  { %5145 = vmatpush1.bf16.msra.mxu1 %v5144_v24  ;;  %2758 = vmatmul.mubr.f32.gmra.mrb[76].mxu0 %v8144_v59 }
 0x152   :  { %5147 = vmatprep.subr.bf16.mxu1 %v5146_v30  ;;  %2763 = vmatprep.mubr.f32.mxu0 %v10270_v55  ;;  %v472_v24 = vsel %vm438_vm0, %v10305_v46, %v5721_v48  ;;  %v5729_v30 = vpop.permute.xlu0 %5728 }
 0x153   :  { %5117 = vmatpush1.bf16.msra.mxu0 %v5116_v12  ;;  %2919 = vmatmul.mubr.f32.gmra.mrb[76].mxu1 %v8144_v59  ;;  %v8171_v12 = vld [vmem:[%s10189_s1 + $0x40] sm:$0xff]  ;;  %v5162_v47 = vpack.c.bf16 %v472_v24, %v455_v20  ;;  %v5731_v25 = vunpack.i.h.bf16 %v5729_v30  ;;  %v5730_v15 = vunpack.i.l.bf16 %v5729_v30 }
 0x154   :  { %5119 = vmatprep.subr.bf16.mxu0 %v5118_v28  ;;  %2924 = vmatprep.mubr.f32.mxu1 %v10270_v55  ;;  %v5166_v28 = vpack.c.bf16 %v506_v50, %v489_v2 }
 0x155   :  { %5149 = vmatpush1.bf16.msra.mxu1 %v5148_v23  ;;  %2764 = vmatmul.mubr.f32.gmra.mrb[78].mxu0 %v8158_v18  ;;  %v965_v21 = vsel %vm931_vm1, %v10307_v8, %v5731_v25  ;;  %v948_v31 = vsel %vm931_vm1, %v5646_v1, %v5730_v15 }
 0x156   :  { %5151 = vmatprep.subr.bf16.mxu1 %v5150_v63  ;;  %2769 = vmatprep.mubr.f32.mxu0 %v10270_v55  ;;  %v5170_v40 = vpack.c.bf16 %v965_v21, %v948_v31 }
 0x157   :  { %5121 = vmatpush1.bf16.msra.mxu0 %v5120_v43  ;;  %2925 = vmatmul.mubr.f32.gmra.mrb[78].mxu1 %v8158_v18  ;;  %v8217_v43 = vld [vmem:[%s10189_s1 + $0x68] sm:$0xff] }
 0x158   :  { %5155 = vmatprep.subr.bf16.mxu0 %v8152_v4  ;;  %2930 = vmatprep.mubr.f32.mxu1 %v10270_v55 }
 0x159   :  { %5153 = vmatpush1.bf16.msra.mxu1 %v5152_v19  ;;  %2770 = vmatmul.mubr.f32.gmra.mrb[80].mxu0 %v8171_v12 }
 0x15a   :  { %5186 = vmatprep.subr.bf16.mxu1 %v8152_v4  ;;  %2775 = vmatprep.mubr.f32.mxu0 %v10270_v55 }
 0x15b   :  { %2931 = vmatmul.mubr.f32.gmra.mrb[80].mxu1 %v8171_v12 }
 0x15c   :  { %2936 = vmatprep.mubr.f32.mxu1 %v10270_v55 }
 0x15d   :  { %2776 = vmatmul.mubr.f32.gmra.mrb[82].mxu0 %v8181_v39 }
 0x15e   :  { %2781 = vmatprep.mubr.f32.mxu0 %v10270_v55 }
 0x15f   :  { %2937 = vmatmul.mubr.f32.gmra.mrb[82].mxu1 %v8181_v39 }
 0x160   :  { %2942 = vmatprep.mubr.f32.mxu1 %v10270_v55 }
 0x161   :  { %2782 = vmatmul.mubr.f32.gmra.mrb[84].mxu0 %v8190_v35 }
 0x162   :  { %2787 = vmatprep.mubr.f32.mxu0 %v10270_v55 }
 0x163   :  { %2943 = vmatmul.mubr.f32.gmra.mrb[84].mxu1 %v8190_v35 }
 0x164   :  { %2948 = vmatprep.mubr.f32.mxu1 %v10270_v55 }
 0x165   :  { %2788 = vmatmul.mubr.f32.gmra.mrb[86].mxu0 %v8199_v37 }
 0x166   :  { %2793 = vmatprep.mubr.f32.mxu0 %v10270_v55 }
 0x167   :  { %2949 = vmatmul.mubr.f32.gmra.mrb[86].mxu1 %v8199_v37 }
 0x168   :  { %2954 = vmatprep.mubr.f32.mxu1 %v10270_v55 }
 0x169   :  { %2794 = vmatmul.mubr.f32.gmra.mrb[88].mxu0 %v8208_v34 }
 0x16a   :  { %2799 = vmatprep.mubr.f32.mxu0 %v10270_v55 }
 0x16b   :  { %2955 = vmatmul.mubr.f32.gmra.mrb[88].mxu1 %v8208_v34 }
 0x16c   :  { %2960 = vmatprep.mubr.f32.mxu1 %v10270_v55 }
 0x16d   :  { %2800 = vmatmul.mubr.f32.gmra.mrb[90].mxu0 %v8217_v43 }
 0x16e   :  { %2805 = vmatprep.mubr.f32.mxu0 %v10270_v55 }
 0x16f   :  { %2961 = vmatmul.mubr.f32.gmra.mrb[90].mxu1 %v8217_v43 }
 0x170   :  { %2966 = vmatprep.mubr.f32.mxu1 %v10270_v55 }
 0x171   :  { %2806 = vmatmul.mubr.f32.gmra.mrb[92].mxu0 %v8226_v62 }
 0x172   :  { %2811 = vmatprep.mubr.f32.mxu0 %v10270_v55 }
 0x173   :  { %2967 = vmatmul.mubr.f32.gmra.mrb[92].mxu1 %v8226_v62 }
 0x174   :  { %2972 = vmatprep.mubr.f32.mxu1 %v10270_v55 }
 0x175   :  { %2812 = vmatmul.mubr.f32.gmra.mrb[94].mxu0 %v8241_v3 }
 0x176   :  { %3043 = vmatprep.mubr.f32.mxu0 %v10270_v55 }
 0x177   :  { %2973 = vmatmul.mubr.f32.gmra.mrb[94].mxu1 %v8241_v3 }
 0x178   :  { %3204 = vmatprep.mubr.f32.mxu1 %v10270_v55 }
 0x179   :  { %3044 = vmatmul.mubr.f32.vlgmr.msra.gmra.mrb[96].mxu0 %v7910_v54 }
 0x17a   :  { %5157 = vmatpush3.bf16.msra.mxu0 %v8152_v4  ;;  %3049 = vmatprep.mubr.f32.mxu0 %v10270_v55 }
 0x17b   :  { %3205 = vmatmul.mubr.f32.vlgmr.msra.gmra.mrb[96].mxu1 %v7910_v54  ;;  %5159 = vmatprep.subr.bf16.mxu0 %v5158_v22  ;;  %v5734_v54 = vpop.permute.xlu1 %5733 }
 0x17c   :  { %5194 = vmatpush3.bf16.msra.mxu1 %v8152_v4  ;;  %3210 = vmatprep.mubr.f32.mxu1 %v10270_v55  ;;  %v5736_v44 = vunpack.i.h.bf16 %v5734_v54  ;;  %v5735_v23 = vunpack.i.l.bf16 %v5734_v54 }
 0x17d   :  { %3050 = vmatmul.mubr.f32.gmra.mrb[98].mxu0 %v7960_v9  ;;  %5187 = vmatprep.subr.bf16.mxu1 %v5158_v22 }
 0x17e   :  { %5161 = vmatpush3.bf16.msra.mxu0 %v5158_v22  ;;  %3055 = vmatprep.mubr.f32.mxu0 %v10270_v55  ;;  %v982_v41 = vsel %vm931_vm1, %v5666_v56, %v5735_v23  ;;  %v999_v10 = vsel %vm931_vm1, %v5676_v29, %v5736_v44 }
 0x17f   :  { %3211 = vmatmul.mubr.f32.gmra.mrb[98].mxu1 %v7960_v9  ;;  %5163 = vmatprep.subr.bf16.mxu0 %v5162_v47  ;;  %v5739_v9 = vpop.permute.xlu0 %5738  ;;  %v5744_v0 = vpop.permute.xlu1 %5743  ;;  %v5174_v38 = vpack.c.bf16 %v999_v10, %v982_v41 }
 0x180   :  { %5195 = vmatpush3.bf16.msra.mxu1 %v5158_v22  ;;  %3216 = vmatprep.mubr.f32.mxu1 %v10270_v55  ;;  %v5741_v1 = vunpack.i.h.bf16 %v5739_v9  ;;  %v5740_v36 = vunpack.i.l.bf16 %v5739_v9  ;;  %v5746_v29 = vunpack.i.h.bf16 %v5744_v0 }
 0x181   :  { %5188 = vmatprep.subr.bf16.mxu1 %v5162_v47  ;;  %3056 = vmatmul.mubr.f32.gmra.mrb[100].mxu0 %v8008_v52 }
 0x182   :  { %5165 = vmatpush3.bf16.msra.mxu0 %v5162_v47  ;;  %3061 = vmatprep.mubr.f32.mxu0 %v10270_v55  ;;  %v1458_v32 = vsel %vm1424_vm2, %v5696_v53, %v5741_v1  ;;  %v1441_v56 = vsel %vm1424_vm2, %v5686_v58, %v5740_v36  ;;  %v1492_v5 = vsel %vm1424_vm2, %v5716_v14, %v5746_v29 }
 0x183   :  { %3217 = vmatmul.mubr.f32.gmra.mrb[100].mxu1 %v8008_v52  ;;  %5167 = vmatprep.subr.bf16.mxu0 %v5166_v28  ;;  %v8289_v52 = vpop.permute.xlu0 %1935  ;;  %v8299_v63 = vpop.permute.xlu1 %1940  ;;  %v5178_v58 = vpack.c.bf16 %v1458_v32, %v1441_v56 }
 0x184   :  { %5196 = vmatpush3.bf16.msra.mxu1 %v5162_v47  ;;  %3222 = vmatprep.mubr.f32.mxu1 %v10270_v55  ;;  %10308 = vst [vmem:[#allocation3_spill] sm:$0xff] %v8289_v52  ;;  %10309 = vst [vmem:[#allocation4_spill] sm:$0xff] %v8299_v63 }
 0x185   :  { %5189 = vmatprep.subr.bf16.mxu1 %v5166_v28  ;;  %3062 = vmatmul.mubr.f32.gmra.mrb[102].mxu0 %v8056_v17 }
 0x186   :  { %5169 = vmatpush3.bf16.msra.mxu0 %v5166_v28  ;;  %3067 = vmatprep.mubr.f32.mxu0 %v10270_v55 }
 0x187   :  { %3223 = vmatmul.mubr.f32.gmra.mrb[102].mxu1 %v8056_v17  ;;  %5171 = vmatprep.subr.bf16.mxu0 %v5170_v40  ;;  %v5745_v17 = vunpack.i.l.bf16 %v5744_v0  ;;  %v8319_v24 = vpop.permute.xlu1 %1945  ;;  %v8331_v31 = vpop.permute.xlu0 %1950 }
 0x188   :  { %5197 = vmatpush3.bf16.msra.mxu1 %v5166_v28  ;;  %3228 = vmatprep.mubr.f32.mxu1 %v10270_v55  ;;  %10310 = vst [vmem:[#allocation5_spill] sm:$0xff] %v8319_v24  ;;  %10311 = vst [vmem:[#allocation6_spill] sm:$0xff] %v8331_v31 }
 0x189   :  { %5190 = vmatprep.subr.bf16.mxu1 %v5170_v40  ;;  %3068 = vmatmul.mubr.f32.gmra.mrb[104].mxu0 %v8088_v33 }
 0x18a   :  { %5173 = vmatpush3.bf16.msra.mxu0 %v5170_v40  ;;  %3073 = vmatprep.mubr.f32.mxu0 %v10270_v55  ;;  %v2079_v57 = vpop.f32.mrb[0].mxu0 }
 0x18b   :  { %3229 = vmatmul.mubr.f32.gmra.mrb[104].mxu1 %v8088_v33  ;;  %5175 = vmatprep.subr.bf16.mxu0 %v5174_v38  ;;  %v2080_v4 = vadd.f32 %v2079_v57, %v8289_v52  ;;  %v2081_v27 = vpop.f32.mrb[1].mxu0  ;;  %v1475_v33 = vsel %vm1424_vm2, %v5706_v49, %v5745_v17 }
 0x18c   :  { %5198 = vmatpush3.bf16.msra.mxu1 %v5170_v40  ;;  %v2240_v53 = vpop.f32.mrb[0].mxu1  ;;  %3234 = vmatprep.mubr.f32.mxu1 %v10270_v55  ;;  %v2082_v13 = vadd.f32 %v2081_v27, %v8289_v52  ;;  %v5182_v6 = vpack.c.bf16 %v1492_v5, %v1475_v33 }
 0x18d   :  { %5191 = vmatprep.subr.bf16.mxu1 %v5174_v38  ;;  %3074 = vmatmul.mubr.f32.gmra.mrb[106].mxu0 %v8118_v51  ;;  %v2241_v19 = vadd.f32 %v2240_v53, %v8289_v52  ;;  %v3446_v60 = vmul.f32 0.5, %v2080_v4  ;;  %v2242_v7 = vpop.f32.mrb[1].mxu1 }
 0x18e   :  { %5177 = vmatpush3.bf16.msra.mxu0 %v5174_v38  ;;  %v3447_v48 = vmul.f32 0.5, %v2082_v13  ;;  %v2243_v45 = vadd.f32 %v2242_v7, %v8289_v52  ;;  %3079 = vmatprep.mubr.f32.mxu0 %v10270_v55  ;;  %v2085_v16 = vpop.f32.mrb[2].mxu0  ;;  %v8344_v13 = vpop.permute.xlu1 %1955 }
 0x18f   :  { %v3448_v22 = vmul.f32 0.5, %v2241_v19  ;;  %5749 = vtanh.f32 %v3446_v60  ;;  %3235 = vmatmul.mubr.f32.gmra.mrb[106].mxu1 %v8118_v51  ;;  %5179 = vmatprep.subr.bf16.mxu0 %v5178_v58  ;;  %v2086_v26 = vadd.f32 %v2085_v16, %v8299_v63  ;;  %v2087_v46 = vpop.f32.mrb[3].mxu0  ;;  %10312 = vst [vmem:[#allocation7_spill] sm:$0xff] %v8344_v13 }
 0x190   :  { %5751 = vtanh.f32 %v3447_v48  ;;  %v3449_v49 = vmul.f32 0.5, %v2243_v45  ;;  %5199 = vmatpush3.bf16.msra.mxu1 %v5174_v38  ;;  %v2246_v61 = vpop.f32.mrb[2].mxu1  ;;  %3240 = vmatprep.mubr.f32.mxu1 %v10270_v55  ;;  %v2088_v14 = vadd.f32 %v2087_v46, %v8299_v63 }
 0x191   :  { %5753 = vtanh.f32 %v3448_v22  ;;  %5192 = vmatprep.subr.bf16.mxu1 %v5178_v58  ;;  %3080 = vmatmul.mubr.f32.gmra.mrb[108].mxu0 %v8144_v59  ;;  %v2247_v51 = vadd.f32 %v2246_v61, %v8299_v63  ;;  %v3463_v20 = vmul.f32 0.5, %v2086_v26  ;;  %v2248_v11 = vpop.f32.mrb[3].mxu1 }
 0x192   :  { %5755 = vtanh.f32 %v3449_v49  ;;  %5181 = vmatpush3.bf16.msra.mxu0 %v5178_v58  ;;  %v3464_v42 = vmul.f32 0.5, %v2088_v14  ;;  %v2249_v30 = vadd.f32 %v2248_v11, %v8299_v63  ;;  %3085 = vmatprep.mubr.f32.mxu0 %v10270_v55  ;;  %v2091_v47 = vpop.f32.mrb[4].mxu0 }
 0x193   :  { %v3465_v2 = vmul.f32 0.5, %v2247_v51  ;;  %5757 = vtanh.f32 %v3463_v20  ;;  %3241 = vmatmul.mubr.f32.gmra.mrb[108].mxu1 %v8144_v59  ;;  %5183 = vmatprep.subr.bf16.mxu0 %v5182_v6  ;;  %v2092_v50 = vadd.f32 %v2091_v47, %v8319_v24  ;;  %v2093_v25 = vpop.f32.mrb[5].mxu0 }
 0x194   :  { %5759 = vtanh.f32 %v3464_v42  ;;  %v3466_v15 = vmul.f32 0.5, %v2249_v30  ;;  %5200 = vmatpush3.bf16.msra.mxu1 %v5178_v58  ;;  %v2252_v54 = vpop.f32.mrb[4].mxu1  ;;  %3246 = vmatprep.mubr.f32.mxu1 %v10270_v55  ;;  %v2094_v28 = vadd.f32 %v2093_v25, %v8319_v24 }
 0x195   :  { %5761 = vtanh.f32 %v3465_v2  ;;  %5193 = vmatprep.subr.bf16.mxu1 %v5182_v6  ;;  %3086 = vmatmul.mubr.f32.gmra.mrb[110].mxu0 %v8158_v18  ;;  %v2253_v8 = vadd.f32 %v2252_v54, %v8319_v24  ;;  %v3480_v21 = vmul.f32 0.5, %v2092_v50  ;;  %v2254_v59 = vpop.f32.mrb[5].mxu1  ;;  %v8363_v54 = vpop.permute.xlu0 %1960 }
 0x196   :  { %5763 = vtanh.f32 %v3466_v15  ;;  %5185 = vmatpush3.bf16.msra.mxu0 %v5182_v6  ;;  %v3481_v44 = vmul.f32 0.5, %v2094_v28  ;;  %v2255_v23 = vadd.f32 %v2254_v59, %v8319_v24  ;;  %3091 = vmatprep.mubr.f32.mxu0 %v10270_v55  ;;  %10313 = vst [vmem:[#allocation8_spill] sm:$0xff] %v8363_v54 }
 0x197   :  { %v3482_v9 = vmul.f32 0.5, %v2253_v8  ;;  %5765 = vtanh.f32 %v3480_v21  ;;  %3247 = vmatmul.mubr.f32.gmra.mrb[110].mxu1 %v8158_v18  ;;  %v2097_v40 = vpop.f32.mrb[6].mxu0 }
 0x198   :  { %5767 = vtanh.f32 %v3481_v44  ;;  %v3483_v41 = vmul.f32 0.5, %v2255_v23  ;;  %5201 = vmatpush3.bf16.msra.mxu1 %v5182_v6  ;;  %3252 = vmatprep.mubr.f32.mxu1 %v10270_v55  ;;  %v2098_v10 = vadd.f32 %v2097_v40, %v8331_v31  ;;  %v2099_v1 = vpop.f32.mrb[7].mxu0 }
 0x199   :  { %v5750_v36 = vpop.eup %5749  ;;  %5769 = vtanh.f32 %v3482_v9  ;;  %v2258_v0 = vpop.f32.mrb[6].mxu1  ;;  %3092 = vmatmul.mubr.f32.gmra.mrb[112].mxu0 %v8171_v12  ;;  %v2100_v38 = vadd.f32 %v2099_v1, %v8331_v31 }
 0x19a   :  { %v5752_v32 = vpop.eup %5751  ;;  %v3990_v56 = vmul.f32 0.5, %v5750_v36  ;;  %5771 = vtanh.f32 %v3483_v41  ;;  %v2259_v18 = vadd.f32 %v2258_v0, %v8331_v31  ;;  %v3497_v29 = vmul.f32 0.5, %v2098_v10  ;;  %v2260_v17 = vpop.f32.mrb[7].mxu1  ;;  %3097 = vmatprep.mubr.f32.mxu0 %v10270_v55 }
 0x19b   :  { %v5754_v57 = vpop.eup %5753  ;;  %v3991_v4 = vmul.f32 0.5, %v5752_v32  ;;  %v3498_v27 = vmul.f32 0.5, %v2100_v38  ;;  %v2261_v53 = vadd.f32 %v2260_v17, %v8331_v31  ;;  %3253 = vmatmul.mubr.f32.gmra.mrb[112].mxu1 %v8171_v12 }
 0x19c   :  { %v5756_v58 = vpop.eup %5755  ;;  %v3992_v19 = vmul.f32 0.5, %v5754_v57  ;;  %v4262_v60 = vadd.f32 0.5, %v3990_v56  ;;  %v3499_v7 = vmul.f32 0.5, %v2259_v18  ;;  %5773 = vtanh.f32 %v3497_v29  ;;  %v2103_v33 = vpop.f32.mrb[8].mxu0  ;;  %3258 = vmatprep.mubr.f32.mxu1 %v10270_v55 }
 0x19d   :  { %v5758_v5 = vpop.eup %5757  ;;  %v4263_v48 = vadd.f32 0.5, %v3991_v4  ;;  %v3993_v45 = vmul.f32 0.5, %v5756_v58  ;;  %5775 = vtanh.f32 %v3498_v27  ;;  %v3500_v16 = vmul.f32 0.5, %v2261_v53  ;;  %v2264_v22 = vpop.f32.mrb[8].mxu1  ;;  %3098 = vmatmul.mubr.f32.gmra.mrb[114].mxu0 %v8181_v39 }
 0x19e   :  { %v2105_v26 = vpop.f32.mrb[9].mxu0  ;;  %v5760_v46 = vpop.eup %5759  ;;  %v4264_v49 = vadd.f32 0.5, %v3992_v19  ;;  %4534 = vst [vmem:[%s10191_s3] sm:$0xff] %v4262_v60  ;;  %v4007_v61 = vmul.f32 0.5, %v5758_v5  ;;  %5777 = vtanh.f32 %v3499_v7  ;;  %v2104_v14 = vadd.f32 %v2103_v33, %v8344_v13  ;;  %3103 = vmatprep.mubr.f32.mxu0 %v10270_v55 }
 0x19f   :  { %v2266_v6 = vpop.f32.mrb[9].mxu1  ;;  %v5762_v51 = vpop.eup %5761  ;;  %4535 = vst [vmem:[%s10191_s3 + $0x8] sm:$0xff] %v4263_v48  ;;  %v4265_v20 = vadd.f32 0.5, %v3993_v45  ;;  %v4008_v11 = vmul.f32 0.5, %v5760_v46  ;;  %5779 = vtanh.f32 %v3500_v16  ;;  %v2265_v42 = vadd.f32 %v2264_v22, %v8344_v13  ;;  %3259 = vmatmul.mubr.f32.gmra.mrb[114].mxu1 %v8181_v39 }
 0x1a0   :  { %v5764_v30 = vpop.eup %5763  ;;  %4536 = vst [vmem:[%s10191_s3 + $0x10] sm:$0xff] %v4264_v49  ;;  %v4009_v47 = vmul.f32 0.5, %v5762_v51  ;;  %v4279_v2 = vadd.f32 0.5, %v4007_v61  ;;  %v3514_v50 = vmul.f32 0.5, %v2104_v14  ;;  %v2106_v25 = vadd.f32 %v2105_v26, %v8344_v13  ;;  %v2109_v15 = vpop.f32.mrb[10].mxu0  ;;  %3264 = vmatprep.mubr.f32.mxu1 %v10270_v55 }
 0x1a1   :  { %v5766_v28 = vpop.eup %5765  ;;  %4537 = vst [vmem:[%s10191_s3 + $0x18] sm:$0xff] %v4265_v20  ;;  %v4280_v8 = vadd.f32 0.5, %v4008_v11  ;;  %v4010_v21 = vmul.f32 0.5, %v5764_v30  ;;  %v3516_v59 = vmul.f32 0.5, %v2265_v42  ;;  %v2267_v44 = vadd.f32 %v2266_v6, %v8344_v13  ;;  %v2270_v23 = vpop.f32.mrb[10].mxu1  ;;  %3104 = vmatmul.mubr.f32.gmra.mrb[116].mxu0 %v8190_v35 }
 0x1a2   :  { %v2111_v9 = vpop.f32.mrb[11].mxu0  ;;  %v5768_v40 = vpop.eup %5767  ;;  %v4281_v41 = vadd.f32 0.5, %v4009_v47  ;;  %4551 = vst [vmem:[%s10191_s3 + $0x88] sm:$0xff] %v4279_v2  ;;  %v4024_v10 = vmul.f32 0.5, %v5766_v28  ;;  %5781 = vtanh.f32 %v3514_v50  ;;  %v3515_v1 = vmul.f32 0.5, %v2106_v25  ;;  %3109 = vmatprep.mubr.f32.mxu0 %v10270_v55 }
 0x1a3   :  { %v2272_v36 = vpop.f32.mrb[11].mxu1  ;;  %v5770_v0 = vpop.eup %5769  ;;  %4552 = vst [vmem:[%s10191_s3 + $0x90] sm:$0xff] %v4280_v8  ;;  %v4282_v38 = vadd.f32 0.5, %v4010_v21  ;;  %v4025_v32 = vmul.f32 0.5, %v5768_v40  ;;  %5783 = vtanh.f32 %v3516_v59  ;;  %v3517_v56 = vmul.f32 0.5, %v2267_v44  ;;  %3265 = vmatmul.mubr.f32.gmra.mrb[116].mxu1 %v8190_v35 }
 0x1a4   :  { %v5772_v18 = vpop.eup %5771  ;;  %4553 = vst [vmem:[%s10191_s3 + $0x98] sm:$0xff] %v4281_v41  ;;  %v4026_v29 = vmul.f32 0.5, %v5770_v0  ;;  %v4296_v17 = vadd.f32 0.5, %v4024_v10  ;;  %5785 = vtanh.f32 %v3515_v1  ;;  %v2110_v57 = vadd.f32 %v2109_v15, %v8363_v54  ;;  %v2115_v4 = vpop.f32.mrb[12].mxu0  ;;  %3270 = vmatprep.mubr.f32.mxu1 %v10270_v55 }
 0x1a5   :  { %v8383_v27 = vpop.permute.xlu1 %1965  ;;  %4554 = vst [vmem:[%s10191_s3 + $0xa0] sm:$0xff] %v4282_v38  ;;  %v4297_v53 = vadd.f32 0.5, %v4025_v32  ;;  %v4027_v58 = vmul.f32 0.5, %v5772_v18  ;;  %5787 = vtanh.f32 %v3517_v56  ;;  %v2271_v19 = vadd.f32 %v2270_v23, %v8363_v54  ;;  %3110 = vmatmul.mubr.f32.gmra.mrb[118].mxu0 %v8199_v37  ;;  %v2117_v60 = vpop.f32.mrb[13].mxu0 }
 0x1a6   :  { %10314 = vst [vmem:[#allocation9_spill] sm:$0xff] %v8383_v27  ;;  %v5774_v7 = vpop.eup %5773  ;;  %v4298_v33 = vadd.f32 0.5, %v4026_v29  ;;  %4568 = vst [vmem:[%s10191_s3 + $0x110] sm:$0xff] %v4296_v17  ;;  %v3531_v5 = vmul.f32 0.5, %v2110_v57  ;;  %v2112_v48 = vadd.f32 %v2111_v9, %v8363_v54  ;;  %v2273_v45 = vadd.f32 %v2272_v36, %v8363_v54  ;;  %v2276_v16 = vpop.f32.mrb[12].mxu1  ;;  %3115 = vmatprep.mubr.f32.mxu0 %v10270_v55 }
 0x1a7   :  { %v5776_v22 = vpop.eup %5775  ;;  %4569 = vst [vmem:[%s10191_s3 + $0x118] sm:$0xff] %v4297_v53  ;;  %v4299_v26 = vadd.f32 0.5, %v4027_v58  ;;  %v4041_v46 = vmul.f32 0.5, %v5774_v7  ;;  %v3533_v49 = vmul.f32 0.5, %v2271_v19  ;;  %v2116_v61 = vadd.f32 %v2115_v4, %v8383_v27  ;;  %v2278_v14 = vpop.f32.mrb[13].mxu1  ;;  %3271 = vmatmul.mubr.f32.gmra.mrb[118].mxu1 %v8199_v37 }
 0x1a8   :  { %v5778_v6 = vpop.eup %5777  ;;  %4570 = vst [vmem:[%s10191_s3 + $0x120] sm:$0xff] %v4298_v33  ;;  %v4042_v51 = vmul.f32 0.5, %v5776_v22  ;;  %5789 = vtanh.f32 %v3531_v5  ;;  %v3532_v20 = vmul.f32 0.5, %v2112_v48  ;;  %v3534_v11 = vmul.f32 0.5, %v2273_v45  ;;  %v2121_v42 = vpop.f32.mrb[14].mxu0  ;;  %3276 = vmatprep.mubr.f32.mxu1 %v10270_v55 }
 0x1a9   :  { %v5780_v30 = vpop.eup %5779  ;;  %4571 = vst [vmem:[%s10191_s3 + $0x128] sm:$0xff] %v4299_v26  ;;  %v4043_v47 = vmul.f32 0.5, %v5778_v6  ;;  %v4313_v2 = vadd.f32 0.5, %v4041_v46  ;;  %5791 = vtanh.f32 %v3533_v49  ;;  %v2277_v50 = vadd.f32 %v2276_v16, %v8383_v27  ;;  %3116 = vmatmul.mubr.f32.gmra.mrb[120].mxu0 %v8208_v34  ;;  %v8410_v25 = vpop.permute.xlu0 %1970 }
 0x1aa   :  { %10315 = vst [vmem:[#allocation10_spill] sm:$0xff] %v8410_v25  ;;  %v2123_v15 = vpop.f32.mrb[15].mxu0  ;;  %v4314_v28 = vadd.f32 0.5, %v4042_v51  ;;  %v4044_v8 = vmul.f32 0.5, %v5780_v30  ;;  %5793 = vtanh.f32 %v3532_v20  ;;  %v3548_v21 = vmul.f32 0.5, %v2116_v61  ;;  %v2282_v59 = vpop.f32.mrb[14].mxu1  ;;  %3121 = vmatprep.mubr.f32.mxu0 %v10270_v55 }
 0x1ab   :  { %v4315_v44 = vadd.f32 0.5, %v4043_v47  ;;  %4585 = vst [vmem:[%s10191_s3 + $0x198] sm:$0xff] %v4313_v2  ;;  %5795 = vtanh.f32 %v3534_v11  ;;  %v3550_v23 = vmul.f32 0.5, %v2277_v50  ;;  %v2118_v9 = vadd.f32 %v2117_v60, %v8383_v27  ;;  %v2284_v40 = vpop.f32.mrb[15].mxu1  ;;  %3277 = vmatmul.mubr.f32.gmra.mrb[120].mxu1 %v8208_v34  ;;  %v8433_v60 = vpop.permute.xlu1 %1975 }
 0x1ac   :  { %v5782_v41 = vpop.eup %5781  ;;  %4586 = vst [vmem:[%s10191_s3 + $0x1a0] sm:$0xff] %v4314_v28  ;;  %v4316_v10 = vadd.f32 0.5, %v4044_v8  ;;  %5797 = vtanh.f32 %v3548_v21  ;;  %v2279_v1 = vadd.f32 %v2278_v14, %v8383_v27  ;;  %v2122_v36 = vadd.f32 %v2121_v42, %v8410_v25  ;;  %v2127_v0 = vpop.f32.mrb[16].mxu0  ;;  %3282 = vmatprep.mubr.f32.mxu1 %v10270_v55  ;;  %10316 = vst [vmem:[#allocation11_spill] sm:$0xff] %v8433_v60 }
 0x1ad   :  { %v5784_v38 = vpop.eup %5783  ;;  %4587 = vst [vmem:[%s10191_s3 + $0x1a8] sm:$0xff] %v4315_v44  ;;  %v4058_v32 = vmul.f32 0.5, %v5782_v41  ;;  %5799 = vtanh.f32 %v3550_v23  ;;  %v3549_v56 = vmul.f32 0.5, %v2118_v9  ;;  %v2283_v18 = vadd.f32 %v2282_v59, %v8410_v25  ;;  %3122 = vmatmul.mubr.f32.gmra.mrb[122].mxu0 %v8217_v43  ;;  %v2129_v29 = vpop.f32.mrb[17].mxu0 }
 0x1ae   :  { %v5786_v17 = vpop.eup %5785  ;;  %4588 = vst [vmem:[%s10191_s3 + $0x1b0] sm:$0xff] %v4316_v10  ;;  %v4060_v57 = vmul.f32 0.5, %v5784_v38  ;;  %v3551_v4 = vmul.f32 0.5, %v2279_v1  ;;  %v3565_v53 = vmul.f32 0.5, %v2122_v36  ;;  %v2124_v58 = vadd.f32 %v2123_v15, %v8410_v25  ;;  %v2288_v19 = vpop.f32.mrb[16].mxu1  ;;  %3127 = vmatprep.mubr.f32.mxu0 %v10270_v55 }
 0x1af   :  { %v5788_v7 = vpop.eup %5787  ;;  %v4330_v33 = vadd.f32 0.5, %v4058_v32  ;;  %v4059_v5 = vmul.f32 0.5, %v5786_v17  ;;  %5801 = vtanh.f32 %v3549_v56  ;;  %v3567_v48 = vmul.f32 0.5, %v2283_v18  ;;  %v2290_v45 = vpop.f32.mrb[17].mxu1  ;;  %3283 = vmatmul.mubr.f32.gmra.mrb[122].mxu1 %v8217_v43 }
 0x1b0   :  { %v4332_v16 = vadd.f32 0.5, %v4060_v57  ;;  %v4061_v22 = vmul.f32 0.5, %v5788_v7  ;;  %5803 = vtanh.f32 %v3551_v4  ;;  %v3566_v26 = vmul.f32 0.5, %v2124_v58  ;;  %v2133_v46 = vpop.f32.mrb[18].mxu0  ;;  %3288 = vmatprep.mubr.f32.mxu1 %v10270_v55  ;;  %v8449_v47 = vpop.permute.xlu0 %1980 }
 0x1b1   :  { %4602 = vst [vmem:[%s10191_s3 + $0x220] sm:$0xff] %v4330_v33  ;;  %v4331_v49 = vadd.f32 0.5, %v4059_v5  ;;  %5805 = vtanh.f32 %v3565_v53  ;;  %v2285_v61 = vadd.f32 %v2284_v40, %v8410_v25  ;;  %v2128_v14 = vadd.f32 %v2127_v0, %v8433_v60  ;;  %3128 = vmatmul.mubr.f32.gmra.mrb[124].mxu0 %v8226_v62  ;;  %v2135_v6 = vpop.f32.mrb[19].mxu0  ;;  %10317 = vst [vmem:[#allocation12_spill] sm:$0xff] %v8449_v47  ;;  %v8478_v5 = vpop.permute.xlu1 %1985 }
 0x1b2   :  { %v5790_v51 = vpop.eup %5789  ;;  %4604 = vst [vmem:[%s10191_s3 + $0x230] sm:$0xff] %v4332_v16  ;;  %v4333_v20 = vadd.f32 0.5, %v4061_v22  ;;  %5807 = vtanh.f32 %v3567_v48  ;;  %v2289_v11 = vadd.f32 %v2288_v19, %v8433_v60  ;;  %v2130_v42 = vadd.f32 %v2129_v29, %v8433_v60  ;;  %v2294_v30 = vpop.f32.mrb[18].mxu1  ;;  %3133 = vmatprep.mubr.f32.mxu0 %v10270_v55  ;;  %10318 = vst [vmem:[#allocation13_spill] sm:$0xff] %v8478_v5 }
 0x1b3   :  { %v5792_v2 = vpop.eup %5791  ;;  %4603 = vst [vmem:[%s10191_s3 + $0x228] sm:$0xff] %v4331_v49  ;;  %v4075_v50 = vmul.f32 0.5, %v5790_v51  ;;  %5809 = vtanh.f32 %v3566_v26  ;;  %v3568_v15 = vmul.f32 0.5, %v2285_v61  ;;  %v3582_v28 = vmul.f32 0.5, %v2128_v14  ;;  %v2296_v8 = vpop.f32.mrb[19].mxu1  ;;  %3289 = vmatmul.mubr.f32.gmra.mrb[124].mxu1 %v8226_v62  ;;  %v6310_v26 = vld [vmem:[%s10189_s1 + $0x8] sm:$0xff] }
 0x1b4   :  { %v5794_v21 = vpop.eup %5793  ;;  %4605 = vst [vmem:[%s10191_s3 + $0x238] sm:$0xff] %v4333_v20  ;;  %v4077_v59 = vmul.f32 0.5, %v5792_v2  ;;  %v3584_v44 = vmul.f32 0.5, %v2289_v11  ;;  %v3583_v23 = vmul.f32 0.5, %v2130_v42  ;;  %v2291_v9 = vadd.f32 %v2290_v45, %v8433_v60  ;;  %v2139_v40 = vpop.f32.mrb[20].mxu0  ;;  %3294 = vmatprep.mubr.f32.mxu1 %v10270_v55  ;;  %v6309_v55 = vld [vmem:[%s10189_s1] sm:$0xff] }
 0x1b5   :  { %v5796_v41 = vpop.eup %5795  ;;  %v4347_v10 = vadd.f32 0.5, %v4075_v50  ;;  %v4076_v1 = vmul.f32 0.5, %v5794_v21  ;;  %5811 = vtanh.f32 %v3568_v15  ;;  %v2134_v36 = vadd.f32 %v2133_v46, %v8449_v47  ;;  %3134 = vmatmul.mubr.f32.gmra.mrb[126].mxu0 %v8241_v3  ;;  %v8463_v0 = vpop.f32.mrb[21].mxu0 }
 0x1b6   :  { %v5798_v38 = vpop.eup %5797  ;;  %v4349_v32 = vadd.f32 0.5, %v4077_v59  ;;  %v4078_v56 = vmul.f32 0.5, %v5796_v41  ;;  %5813 = vtanh.f32 %v3582_v28  ;;  %v3585_v18 = vmul.f32 0.5, %v2291_v9  ;;  %v2300_v29 = vpop.f32.mrb[20].mxu1  ;;  %4874 = vmatprep.mubr.f32.mxu0 %v6309_v55  ;;  %v6312_v41 = vld [vmem:[%s10189_s1 + $0x18] sm:$0xff] }
 0x1b7   :  { %v5800_v17 = vpop.eup %5799  ;;  %4619 = vst [vmem:[%s10191_s3 + $0x2a8] sm:$0xff] %v4347_v10  ;;  %v4348_v57 = vadd.f32 0.5, %v4076_v1  ;;  %v4092_v4 = vmul.f32 0.5, %v5798_v38  ;;  %5815 = vtanh.f32 %v3584_v44  ;;  %v2295_v53 = vadd.f32 %v2294_v30, %v8449_v47  ;;  %v8472_v58 = vpop.f32.mrb[21].mxu1  ;;  %3295 = vmatmul.mubr.f32.gmra.mrb[126].mxu1 %v8241_v3 }
 0x1b8   :  { %4621 = vst [vmem:[%s10191_s3 + $0x2b8] sm:$0xff] %v4349_v32  ;;  %v4350_v19 = vadd.f32 0.5, %v4078_v56  ;;  %v4094_v7 = vmul.f32 0.5, %v5800_v17  ;;  %5817 = vtanh.f32 %v3583_v23  ;;  %v3599_v33 = vmul.f32 0.5, %v2134_v36  ;;  %v8480_v48 = vpop.f32.mrb[22].mxu0  ;;  %4886 = vmatprep.mubr.f32.mxu1 %v8171_v12  ;;  %v6313_v32 = vld [vmem:[%s10189_s1 + $0x20] sm:$0xff] }
 0x1b9   :  { %v5802_v45 = vpop.eup %5801  ;;  %4620 = vst [vmem:[%s10191_s3 + $0x2b0] sm:$0xff] %v4348_v57  ;;  %v4364_v3 = vadd.f32 0.5, %v4092_v4  ;;  %5819 = vtanh.f32 %v3585_v18  ;;  %v3601_v16 = vmul.f32 0.5, %v2295_v53  ;;  %v2136_v22 = vadd.f32 %v2135_v6, %v8449_v47  ;;  %4875 = vmatmul.mubr.f32.vlgmr.msra.gmra.mrb[128].mxu0 %v6310_v26  ;;  %v8490_v46 = vpop.f32.mrb[23].mxu0  ;;  %v6311_v6 = vld [vmem:[%s10189_s1 + $0x10] sm:$0xff] }
 0x1ba   :  { %v5804_v49 = vpop.eup %5803  ;;  %4622 = vst [vmem:[%s10191_s3 + $0x2c0] sm:$0xff] %v4350_v19  ;;  %v4366_v12 = vadd.f32 0.5, %v4094_v7  ;;  %v4093_v61 = vmul.f32 0.5, %v5802_v45  ;;  %5821 = vtanh.f32 %v3599_v33  ;;  %v2297_v14 = vadd.f32 %v2296_v8, %v8449_v47  ;;  %v2306_v51 = vpop.f32.mrb[22].mxu1  ;;  %4877 = vmatprep.mubr.f32.mxu0 %v6311_v6 }
 0x1bb   :  { %v5806_v20 = vpop.eup %5805  ;;  %4636 = vst [vmem:[%s10191_s3 + $0x330] sm:$0xff] %v4364_v3  ;;  %v4095_v11 = vmul.f32 0.5, %v5804_v49  ;;  %5823 = vtanh.f32 %v3601_v16  ;;  %v3600_v42 = vmul.f32 0.5, %v2136_v22  ;;  %v2140_v30 = vadd.f32 %v2139_v40, %v8478_v5  ;;  %v8503_v2 = vpop.f32.mrb[23].mxu1  ;;  %4887 = vmatmul.mubr.f32.vlgmr.msra.gmra.mrb[128].mxu1 %v8181_v39  ;;  %v6314_v3 = vld [vmem:[%s10189_s1 + $0x28] sm:$0xff] }
 0x1bc   :  { %v5808_v50 = vpop.eup %5807  ;;  %4638 = vst [vmem:[%s10191_s3 + $0x340] sm:$0xff] %v4366_v12  ;;  %v4365_v15 = vadd.f32 0.5, %v4093_v61  ;;  %v4109_v28 = vmul.f32 0.5, %v5806_v20  ;;  %v3602_v8 = vmul.f32 0.5, %v2297_v14  ;;  %v2301_v21 = vadd.f32 %v2300_v29, %v8478_v5  ;;  %v8510_v59 = vpop.f32.mrb[24].mxu0  ;;  %4889 = vmatprep.mubr.f32.mxu1 %v8190_v35  ;;  %v6315_v61 = vld [vmem:[%s10189_s1 + $0x30] sm:$0xff] }
 0x1bd   :  { %v5810_v44 = vpop.eup %5809  ;;  %v4367_v23 = vadd.f32 0.5, %v4095_v11  ;;  %v4111_v9 = vmul.f32 0.5, %v5808_v50  ;;  %5825 = vtanh.f32 %v3600_v42  ;;  %v3616_v40 = vmul.f32 0.5, %v2140_v30  ;;  %v8513_v39 = vpop.permute.xlu0 %1990  ;;  %4878 = vmatmul.mubr.f32.gmra.mrb[130].mxu0 %v6312_v41 }
 0x1be   :  { %10319 = vst [vmem:[#allocation14_spill] sm:$0xff] %v8513_v39  ;;  %v8518_v10 = vpop.f32.mrb[25].mxu0  ;;  %4637 = vst [vmem:[%s10191_s3 + $0x338] sm:$0xff] %v4365_v15  ;;  %v4381_v1 = vadd.f32 0.5, %v4109_v28  ;;  %v4110_v35 = vmul.f32 0.5, %v5810_v44  ;;  %5827 = vtanh.f32 %v3602_v8  ;;  %v3618_v36 = vmul.f32 0.5, %v2301_v21  ;;  %4880 = vmatprep.mubr.f32.mxu0 %v6313_v32  ;;  %v8565_v11 = vpop.permute.xlu1 %1995 }
 0x1bf   :  { %v8523_v38 = vpop.f32.mrb[24].mxu1  ;;  %v5812_v56 = vpop.eup %5811  ;;  %4639 = vst [vmem:[%s10191_s3 + $0x348] sm:$0xff] %v4367_v23  ;;  %v4383_v18 = vadd.f32 0.5, %v4111_v9  ;;  %5829 = vtanh.f32 %v3616_v40  ;;  %v2142_v29 = vadd.f32 %v8463_v0, %v8478_v5  ;;  %v2303_v55 = vadd.f32 %v8472_v58, %v8478_v5  ;;  %4890 = vmatmul.mubr.f32.gmra.mrb[130].mxu1 %v8199_v37  ;;  %10320 = vst [vmem:[#allocation15_spill] sm:$0xff] %v8565_v11  ;;  %v6316_v23 = vld [vmem:[%s10189_s1 + $0x38] sm:$0xff] }
 0x1c0   :  { %v8535_v17 = vpop.f32.mrb[25].mxu1  ;;  %v5814_v57 = vpop.eup %5813  ;;  %4653 = vst [vmem:[%s10191_s3 + $0x3b8] sm:$0xff] %v4381_v1  ;;  %v4382_v4 = vadd.f32 0.5, %v4110_v35  ;;  %v4112_v53 = vmul.f32 0.5, %v5812_v56  ;;  %5831 = vtanh.f32 %v3618_v36  ;;  %v2146_v19 = vadd.f32 %v8480_v48, %v8513_v39  ;;  %4892 = vmatprep.mubr.f32.mxu1 %v8208_v34 }
 0x1c1   :  { %v8543_v7 = vpop.f32.mrb[26].mxu0  ;;  %v5816_v0 = vpop.eup %5815  ;;  %4655 = vst [vmem:[%s10191_s3 + $0x3c8] sm:$0xff] %v4383_v18  ;;  %v4126_v37 = vmul.f32 0.5, %v5814_v57  ;;  %v3617_v58 = vmul.f32 0.5, %v2142_v29  ;;  %v3619_v33 = vmul.f32 0.5, %v2303_v55  ;;  %v2307_v45 = vadd.f32 %v2306_v51, %v8513_v39  ;;  %4881 = vmatmul.mubr.f32.gmra.mrb[132].mxu0 %v6314_v3  ;;  %v6317_v18 = vld [vmem:[%s10189_s1 + $0x78] sm:$0xff] }
 0x1c2   :  { %v8553_v48 = vpop.f32.mrb[27].mxu0  ;;  %v5818_v16 = vpop.eup %5817  ;;  %4654 = vst [vmem:[%s10191_s3 + $0x3c0] sm:$0xff] %v4382_v4  ;;  %v4384_v34 = vadd.f32 0.5, %v4112_v53  ;;  %v4128_v22 = vmul.f32 0.5, %v5816_v0  ;;  %v3633_v26 = vmul.f32 0.5, %v2146_v19  ;;  %v2148_v49 = vadd.f32 %v8490_v46, %v8513_v39  ;;  %4883 = vmatprep.mubr.f32.mxu0 %v6315_v61 }
 0x1c3   :  { %v8560_v12 = vpop.f32.mrb[26].mxu1  ;;  %v5820_v14 = vpop.eup %5819  ;;  %v4398_v51 = vadd.f32 0.5, %v4126_v37  ;;  %v4127_v6 = vmul.f32 0.5, %v5818_v16  ;;  %5833 = vtanh.f32 %v3617_v58  ;;  %v3635_v20 = vmul.f32 0.5, %v2307_v45  ;;  %4893 = vmatmul.mubr.f32.gmra.mrb[132].mxu1 %v8217_v43 }
 0x1c4   :  { %v8567_v42 = vpop.f32.mrb[27].mxu1  ;;  %v5822_v30 = vpop.eup %5821  ;;  %4656 = vst [vmem:[%s10191_s3 + $0x3d0] sm:$0xff] %v4384_v34  ;;  %v4400_v46 = vadd.f32 0.5, %v4128_v22  ;;  %v4129_v50 = vmul.f32 0.5, %v5820_v14  ;;  %5835 = vtanh.f32 %v3619_v33  ;;  %v3634_v15 = vmul.f32 0.5, %v2148_v49  ;;  %4895 = vmatprep.mubr.f32.mxu1 %v8226_v62 }
 0x1c5   :  { %v8573_v28 = vpop.f32.mrb[28].mxu0  ;;  %v5824_v8 = vpop.eup %5823  ;;  %4670 = vst [vmem:[%s10191_s3 + $0x440] sm:$0xff] %v4398_v51  ;;  %v4399_v21 = vadd.f32 0.5, %v4127_v6  ;;  %v4143_v43 = vmul.f32 0.5, %v5822_v30  ;;  %5837 = vtanh.f32 %v3633_v26  ;;  %v2309_v44 = vadd.f32 %v8503_v2, %v8513_v39  ;;  %4884 = vmatmul.mubr.f32.gmra.mrb[134].mxu0 %v6316_v23 }
 0x1c6   :  { %v8584_v9 = vpop.f32.mrb[29].mxu0  ;;  %4672 = vst [vmem:[%s10191_s3 + $0x450] sm:$0xff] %v4400_v46  ;;  %v4401_v62 = vadd.f32 0.5, %v4129_v50  ;;  %v4145_v40 = vmul.f32 0.5, %v5824_v8  ;;  %5839 = vtanh.f32 %v3635_v20  ;;  %v2152_v41 = vadd.f32 %v8510_v59, %v8565_v11  ;;  %v8591_v1 = vpop.f32.mrb[28].mxu1 }
 0x1c7   :  { %v5826_v2 = vpop.eup %5825  ;;  %4671 = vst [vmem:[%s10191_s3 + $0x448] sm:$0xff] %v4399_v21  ;;  %v4415_v35 = vadd.f32 0.5, %v4143_v43  ;;  %5841 = vtanh.f32 %v3634_v15  ;;  %v3636_v36 = vmul.f32 0.5, %v2309_v44  ;;  %v2313_v32 = vadd.f32 %v8523_v38, %v8565_v11  ;;  %v8598_v56 = vpop.f32.mrb[29].mxu1  ;;  %4896 = vmatmul.mubr.f32.gmra.mrb[134].mxu1 %v6317_v18 }
 0x1c8   :  { %v5828_v59 = vpop.eup %5827  ;;  %4673 = vst [vmem:[%s10191_s3 + $0x458] sm:$0xff] %v4401_v62  ;;  %v4417_v29 = vadd.f32 0.5, %v4145_v40  ;;  %v4144_v55 = vmul.f32 0.5, %v5826_v2  ;;  %v3650_v57 = vmul.f32 0.5, %v2152_v41  ;;  %v2154_v4 = vadd.f32 %v8518_v10, %v8565_v11  ;;  %v8608_v53 = vpop.f32.mrb[30].mxu0 }
 0x1c9   :  { %v5830_v38 = vpop.eup %5829  ;;  %4687 = vst [vmem:[%s10191_s3 + $0x4c8] sm:$0xff] %v4415_v35  ;;  %v4146_v19 = vmul.f32 0.5, %v5828_v59  ;;  %5843 = vtanh.f32 %v3636_v36  ;;  %v3652_v0 = vmul.f32 0.5, %v2313_v32  ;;  %v2315_v37 = vadd.f32 %v8535_v17, %v8565_v11  ;;  %v8615_v58 = vpop.permute.xlu0 %2000 }
 0x1ca   :  { %10321 = vst [vmem:[#allocation16_spill] sm:$0xff] %v8615_v58  ;;  %v8617_v33 = vpop.f32.mrb[31].mxu0  ;;  %v5832_v45 = vpop.eup %5831  ;;  %4689 = vst [vmem:[%s10191_s3 + $0x4d8] sm:$0xff] %v4417_v29  ;;  %v4416_v10 = vadd.f32 0.5, %v4144_v55  ;;  %v4160_v3 = vmul.f32 0.5, %v5830_v38  ;;  %5845 = vtanh.f32 %v3650_v57  ;;  %v3651_v16 = vmul.f32 0.5, %v2154_v4 }
 0x1cb   :  { %v8622_v34 = vpop.f32.mrb[30].mxu1  ;;  %v4418_v22 = vadd.f32 0.5, %v4146_v19  ;;  %v4162_v26 = vmul.f32 0.5, %v5832_v45  ;;  %5847 = vtanh.f32 %v3652_v0  ;;  %v3653_v49 = vmul.f32 0.5, %v2315_v37  ;;  %v8624_v17 = vpop.permute.xlu1 %2005 }
 0x1cc   :  { %10322 = vst [vmem:[#allocation17_spill] sm:$0xff] %v8624_v17  ;;  %v8626_v61 = vpop.f32.mrb[31].mxu1  ;;  %4688 = vst [vmem:[%s10191_s3 + $0x4d0] sm:$0xff] %v4416_v10  ;;  %v4432_v14 = vadd.f32 0.5, %v4160_v3  ;;  %5849 = vtanh.f32 %v3651_v16  ;;  %v2158_v51 = vadd.f32 %v8543_v7, %v8615_v58  ;;  %v2319_v6 = vadd.f32 %v8560_v12, %v8615_v58  ;;  %v8635_v20 = vpop.f32.mrb[32].mxu0 }
 0x1cd   :  { %v5834_v30 = vpop.eup %5833  ;;  %4690 = vst [vmem:[%s10191_s3 + $0x4e0] sm:$0xff] %v4418_v22  ;;  %v4434_v46 = vadd.f32 0.5, %v4162_v26  ;;  %5851 = vtanh.f32 %v3653_v49  ;;  %v2160_v50 = vadd.f32 %v8553_v48, %v8615_v58  ;;  %v2321_v15 = vadd.f32 %v8567_v42, %v8615_v58  ;;  %v8644_v8 = vpop.f32.mrb[33].mxu0 }
 0x1ce   :  { %v5836_v7 = vpop.eup %5835  ;;  %4704 = vst [vmem:[%s10191_s3 + $0x550] sm:$0xff] %v4432_v14  ;;  %v4161_v12 = vmul.f32 0.5, %v5834_v30  ;;  %v3667_v21 = vmul.f32 0.5, %v2158_v51  ;;  %v3669_v43 = vmul.f32 0.5, %v2319_v6  ;;  %v2164_v44 = vadd.f32 %v8573_v28, %v8624_v17  ;;  %v8651_v23 = vpop.f32.mrb[32].mxu1 }
 0x1cf   :  { %v5838_v62 = vpop.eup %5837  ;;  %4706 = vst [vmem:[%s10191_s3 + $0x560] sm:$0xff] %v4434_v46  ;;  %v4163_v48 = vmul.f32 0.5, %v5836_v7  ;;  %v3668_v42 = vmul.f32 0.5, %v2160_v50  ;;  %v3670_v40 = vmul.f32 0.5, %v2321_v15  ;;  %v2325_v41 = vadd.f32 %v8591_v1, %v8624_v17  ;;  %v8658_v2 = vpop.f32.mrb[33].mxu1 }
 0x1d0   :  { %v5840_v35 = vpop.eup %5839  ;;  %v4433_v36 = vadd.f32 0.5, %v4161_v12  ;;  %v4177_v32 = vmul.f32 0.5, %v5838_v62  ;;  %5853 = vtanh.f32 %v3667_v21  ;;  %v3684_v28 = vmul.f32 0.5, %v2164_v44  ;;  %v8660_v18 = vpop.permute.xlu0 %2010 }
 0x1d1   :  { %10323 = vst [vmem:[#allocation18_spill] sm:$0xff] %v8660_v18  ;;  %v8662_v59 = vpop.f32.mrb[34].mxu0  ;;  %v5842_v29 = vpop.eup %5841  ;;  %v4435_v55 = vadd.f32 0.5, %v4163_v48  ;;  %v4179_v57 = vmul.f32 0.5, %v5840_v35  ;;  %5855 = vtanh.f32 %v3669_v43  ;;  %v3686_v4 = vmul.f32 0.5, %v2325_v41 }
 0x1d2   :  { %v8664_v38 = vpop.f32.mrb[35].mxu0  ;;  %4705 = vst [vmem:[%s10191_s3 + $0x558] sm:$0xff] %v4433_v36  ;;  %v4449_v1 = vadd.f32 0.5, %v4177_v32  ;;  %v4178_v19 = vmul.f32 0.5, %v5842_v29  ;;  %5857 = vtanh.f32 %v3668_v42  ;;  %v2166_v0 = vadd.f32 %v8584_v9, %v8624_v17  ;;  %v8671_v37 = vpop.f32.mrb[34].mxu1 }
 0x1d3   :  { %v5844_v45 = vpop.eup %5843  ;;  %4707 = vst [vmem:[%s10191_s3 + $0x568] sm:$0xff] %v4435_v55  ;;  %v4451_v10 = vadd.f32 0.5, %v4179_v57  ;;  %5859 = vtanh.f32 %v3670_v40  ;;  %v2327_v3 = vadd.f32 %v8598_v56, %v8624_v17  ;;  %v2170_v16 = vadd.f32 %v8608_v53, %v8660_v18  ;;  %v8680_v22 = vpop.f32.mrb[35].mxu1 }
 0x1d4   :  { %v5846_v26 = vpop.eup %5845  ;;  %4721 = vst [vmem:[%s10191_s3 + $0x5d8] sm:$0xff] %v4449_v1  ;;  %v4450_v9 = vadd.f32 0.5, %v4178_v19  ;;  %v4180_v49 = vmul.f32 0.5, %v5844_v45  ;;  %5861 = vtanh.f32 %v3684_v28  ;;  %v3685_v14 = vmul.f32 0.5, %v2166_v0  ;;  %v8685_v51 = vpop.f32.mrb[36].mxu0 }
 0x1d5   :  { %v5848_v6 = vpop.eup %5847  ;;  %4723 = vst [vmem:[%s10191_s3 + $0x5e8] sm:$0xff] %v4451_v10  ;;  %v4194_v56 = vmul.f32 0.5, %v5846_v26  ;;  %5863 = vtanh.f32 %v3686_v4  ;;  %v3687_v53 = vmul.f32 0.5, %v2327_v3  ;;  %v2331_v30 = vadd.f32 %v8622_v34, %v8660_v18  ;;  %v8692_v46 = vpop.f32.mrb[37].mxu0 }
 0x1d6   :  { %v5850_v50 = vpop.eup %5849  ;;  %4722 = vst [vmem:[%s10191_s3 + $0x5e0] sm:$0xff] %v4450_v9  ;;  %v4452_v15 = vadd.f32 0.5, %v4180_v49  ;;  %v4196_v7 = vmul.f32 0.5, %v5848_v6  ;;  %5865 = vtanh.f32 %v3685_v14  ;;  %v3701_v12 = vmul.f32 0.5, %v2170_v16  ;;  %v8697_v21 = vpop.f32.mrb[36].mxu1 }
 0x1d7   :  { %v5852_v43 = vpop.eup %5851  ;;  %v4466_v44 = vadd.f32 0.5, %v4194_v56  ;;  %v4195_v62 = vmul.f32 0.5, %v5850_v50  ;;  %5867 = vtanh.f32 %v3687_v53  ;;  %v3703_v48 = vmul.f32 0.5, %v2331_v30  ;;  %v8699_v42 = vpop.f32.mrb[37].mxu1 }
 0x1d8   :  { %4724 = vst [vmem:[%s10191_s3 + $0x5f0] sm:$0xff] %v4452_v15  ;;  %v4468_v34 = vadd.f32 0.5, %v4196_v7  ;;  %v4197_v40 = vmul.f32 0.5, %v5852_v43  ;;  %5869 = vtanh.f32 %v3701_v12  ;;  %v2172_v41 = vadd.f32 %v8617_v33, %v8660_v18  ;;  %v8706_v35 = vpop.f32.mrb[38].mxu0 }
 0x1d9   :  { %4738 = vst [vmem:[%s10191_s3 + $0x660] sm:$0xff] %v4466_v44  ;;  %v4467_v36 = vadd.f32 0.5, %v4195_v62  ;;  %5871 = vtanh.f32 %v3703_v48  ;;  %v2333_v32 = vadd.f32 %v8626_v61, %v8660_v18  ;;  %v2402_v28 = vadd.f32 %v8635_v20, %v8289_v52  ;;  %v8715_v29 = vpop.f32.mrb[39].mxu0 }
 0x1da   :  { %v5854_v55 = vpop.eup %5853  ;;  %4740 = vst [vmem:[%s10191_s3 + $0x670] sm:$0xff] %v4468_v34  ;;  %v4469_v33 = vadd.f32 0.5, %v4197_v40  ;;  %v3702_v57 = vmul.f32 0.5, %v2172_v41  ;;  %v2563_v4 = vadd.f32 %v8651_v23, %v8289_v52  ;;  %v2404_v1 = vadd.f32 %v8644_v8, %v8289_v52  ;;  %v8724_v19 = vpop.f32.mrb[38].mxu1 }
 0x1db   :  { %v5856_v61 = vpop.eup %5855  ;;  %4739 = vst [vmem:[%s10191_s3 + $0x668] sm:$0xff] %v4467_v36  ;;  %v4211_v20 = vmul.f32 0.5, %v5854_v55  ;;  %v3704_v0 = vmul.f32 0.5, %v2333_v32  ;;  %v3450_v45 = vmul.f32 0.5, %v2402_v28  ;;  %v2565_v10 = vadd.f32 %v8658_v2, %v8289_v52  ;;  %v8731_v3 = vpop.f32.mrb[39].mxu1 }
 0x1dc   :  { %v5858_v16 = vpop.eup %5857  ;;  %4741 = vst [vmem:[%s10191_s3 + $0x678] sm:$0xff] %v4469_v33  ;;  %v4213_v8 = vmul.f32 0.5, %v5856_v61  ;;  %5873 = vtanh.f32 %v3702_v57  ;;  %v3452_v23 = vmul.f32 0.5, %v2563_v4  ;;  %v3451_v26 = vmul.f32 0.5, %v2404_v1  ;;  %v8736_v9 = vpop.f32.mrb[40].mxu0 }
 0x1dd   :  { %v5860_v49 = vpop.eup %5859  ;;  %v4483_v14 = vadd.f32 0.5, %v4211_v20  ;;  %v4212_v6 = vmul.f32 0.5, %v5858_v16  ;;  %5875 = vtanh.f32 %v3704_v0  ;;  %v3453_v56 = vmul.f32 0.5, %v2565_v10  ;;  %v8738_v53 = vpop.f32.mrb[41].mxu0 }
 0x1de   :  { %v5862_v2 = vpop.eup %5861  ;;  %v4485_v30 = vadd.f32 0.5, %v4213_v8  ;;  %v4214_v50 = vmul.f32 0.5, %v5860_v49  ;;  %5877 = vtanh.f32 %v3450_v45  ;;  %v2408_v15 = vadd.f32 %v8662_v59, %v8299_v63  ;;  %v8742_v7 = vpop.f32.mrb[40].mxu1 }
 0x1df   :  { %v5864_v12 = vpop.eup %5863  ;;  %4755 = vst [vmem:[%s10191_s3 + $0x6e8] sm:$0xff] %v4483_v14  ;;  %v4484_v43 = vadd.f32 0.5, %v4212_v6  ;;  %v4228_v44 = vmul.f32 0.5, %v5862_v2  ;;  %5879 = vtanh.f32 %v3452_v23  ;;  %v2569_v62 = vadd.f32 %v8671_v37, %v8299_v63  ;;  %v8749_v48 = vpop.f32.mrb[41].mxu1 }
 0x1e0   :  { %v5866_v34 = vpop.eup %5865  ;;  %4757 = vst [vmem:[%s10191_s3 + $0x6f8] sm:$0xff] %v4485_v30  ;;  %v4486_v59 = vadd.f32 0.5, %v4214_v50  ;;  %v4230_v40 = vmul.f32 0.5, %v5864_v12  ;;  %5881 = vtanh.f32 %v3451_v26  ;;  %v3467_v41 = vmul.f32 0.5, %v2408_v15  ;;  %v8754_v36 = vpop.f32.mrb[42].mxu0 }
 0x1e1   :  { %v5868_v32 = vpop.eup %5867  ;;  %4756 = vst [vmem:[%s10191_s3 + $0x6f0] sm:$0xff] %v4484_v43  ;;  %v4500_v28 = vadd.f32 0.5, %v4228_v44  ;;  %v4229_v37 = vmul.f32 0.5, %v5866_v34  ;;  %5883 = vtanh.f32 %v3453_v56  ;;  %v3469_v55 = vmul.f32 0.5, %v2569_v62  ;;  %v8759_v33 = vpop.f32.mrb[43].mxu0 }
 0x1e2   :  { %v5870_v57 = vpop.eup %5869  ;;  %4758 = vst [vmem:[%s10191_s3 + $0x700] sm:$0xff] %v4486_v59  ;;  %v4502_v4 = vadd.f32 0.5, %v4230_v40  ;;  %v4231_v1 = vmul.f32 0.5, %v5868_v32  ;;  %5885 = vtanh.f32 %v3467_v41  ;;  %v2410_v61 = vadd.f32 %v8664_v38, %v8299_v63  ;;  %v8766_v20 = vpop.f32.mrb[42].mxu1 }
 0x1e3   :  { %v5872_v0 = vpop.eup %5871  ;;  %4772 = vst [vmem:[%s10191_s3 + $0x770] sm:$0xff] %v4500_v28  ;;  %v4501_v45 = vadd.f32 0.5, %v4229_v37  ;;  %v4245_v10 = vmul.f32 0.5, %v5870_v57  ;;  %5887 = vtanh.f32 %v3469_v55  ;;  %v2571_v16 = vadd.f32 %v8680_v22, %v8299_v63  ;;  %v8773_v8 = vpop.f32.mrb[43].mxu1 }
 0x1e4   :  { %4774 = vst [vmem:[%s10191_s3 + $0x780] sm:$0xff] %v4502_v4  ;;  %v4503_v38 = vadd.f32 0.5, %v4231_v1  ;;  %v4247_v23 = vmul.f32 0.5, %v5872_v0  ;;  %v3468_v26 = vmul.f32 0.5, %v2410_v61  ;;  %v2414_v49 = vadd.f32 %v8685_v51, %v8319_v24  ;;  %v8780_v14 = vpop.f32.mrb[44].mxu0 }
 0x1e5   :  { %4773 = vst [vmem:[%s10191_s3 + $0x778] sm:$0xff] %v4501_v45  ;;  %v4517_v6 = vadd.f32 0.5, %v4245_v10  ;;  %v3470_v22 = vmul.f32 0.5, %v2571_v16  ;;  %v2575_v56 = vadd.f32 %v8697_v21, %v8319_v24  ;;  %v2416_v2 = vadd.f32 %v8692_v46, %v8319_v24  ;;  %v8789_v30 = vpop.f32.mrb[45].mxu0 }
 0x1e6   :  { %v5874_v50 = vpop.eup %5873  ;;  %4775 = vst [vmem:[%s10191_s3 + $0x788] sm:$0xff] %v4503_v38  ;;  %v4519_v51 = vadd.f32 0.5, %v4247_v23  ;;  %5889 = vtanh.f32 %v3468_v26  ;;  %v3484_v15 = vmul.f32 0.5, %v2414_v49  ;;  %v2577_v12 = vadd.f32 %v8699_v42, %v8319_v24  ;;  %v8796_v43 = vpop.f32.mrb[44].mxu1 }
 0x1e7   :  { %v5876_v44 = vpop.eup %5875  ;;  %4789 = vst [vmem:[%s10191_s3 + $0x7f8] sm:$0xff] %v4517_v6  ;;  %v4246_v46 = vmul.f32 0.5, %v5874_v50  ;;  %5891 = vtanh.f32 %v3470_v22  ;;  %v3486_v21 = vmul.f32 0.5, %v2575_v56  ;;  %v3485_v62 = vmul.f32 0.5, %v2416_v2  ;;  %v8801_v34 = vpop.f32.mrb[45].mxu1 }
 0x1e8   :  { %v5878_v59 = vpop.eup %5877  ;;  %4791 = vst [vmem:[%s10191_s3 + $0x808] sm:$0xff] %v4519_v51  ;;  %v4248_v40 = vmul.f32 0.5, %v5876_v44  ;;  %5893 = vtanh.f32 %v3484_v15  ;;  %v3487_v42 = vmul.f32 0.5, %v2577_v12  ;;  %v2420_v41 = vadd.f32 %v8706_v35, %v8331_v31  ;;  %v8808_v32 = vpop.f32.mrb[46].mxu0 }
 0x1e9   :  { %v5880_v28 = vpop.eup %5879  ;;  %v4518_v37 = vadd.f32 0.5, %v4246_v46  ;;  %v3994_v55 = vmul.f32 0.5, %v5878_v59  ;;  %5895 = vtanh.f32 %v3486_v21  ;;  %v2581_v57 = vadd.f32 %v8724_v19, %v8331_v31  ;;  %v8812_v4 = vpop.f32.mrb[47].mxu0 }
 0x1ea   :  { %v5882_v1 = vpop.eup %5881  ;;  %v4520_v61 = vadd.f32 0.5, %v4248_v40  ;;  %v3996_v0 = vmul.f32 0.5, %v5880_v28  ;;  %5897 = vtanh.f32 %v3485_v62  ;;  %v3501_v45 = vmul.f32 0.5, %v2420_v41  ;;  %v8814_v10 = vpop.f32.mrb[46].mxu1 }
 0x1eb   :  { %v5884_v16 = vpop.eup %5883  ;;  %4790 = vst [vmem:[%s10191_s3 + $0x800] sm:$0xff] %v4518_v37  ;;  %v4266_v35 = vadd.f32 0.5, %v3994_v55  ;;  %v3995_v38 = vmul.f32 0.5, %v5882_v1  ;;  %5899 = vtanh.f32 %v3487_v42  ;;  %v3503_v23 = vmul.f32 0.5, %v2581_v57  ;;  %v8819_v26 = vpop.f32.mrb[47].mxu1 }
 0x1ec   :  { %v5886_v19 = vpop.eup %5885  ;;  %4792 = vst [vmem:[%s10191_s3 + $0x810] sm:$0xff] %v4520_v61  ;;  %v4268_v49 = vadd.f32 0.5, %v3996_v0  ;;  %v3997_v6 = vmul.f32 0.5, %v5884_v16  ;;  %5901 = vtanh.f32 %v3501_v45  ;;  %v2422_v22 = vadd.f32 %v8715_v29, %v8331_v31  ;;  %v8826_v56 = vpop.f32.mrb[48].mxu0 }
 0x1ed   :  { %v5888_v2 = vpop.eup %5887  ;;  %4538 = vst [vmem:[%s10191_s3 + $0x20] sm:$0xff] %v4266_v35  ;;  %v4267_v50 = vadd.f32 0.5, %v3995_v38  ;;  %v4011_v51 = vmul.f32 0.5, %v5886_v19  ;;  %5903 = vtanh.f32 %v3503_v23  ;;  %v2583_v15 = vadd.f32 %v8731_v3, %v8331_v31  ;;  %v8833_v12 = vpop.f32.mrb[49].mxu0 }
 0x1ee   :  { %4540 = vst [vmem:[%s10191_s3 + $0x30] sm:$0xff] %v4268_v49  ;;  %v4269_v29 = vadd.f32 0.5, %v3997_v6  ;;  %v4013_v44 = vmul.f32 0.5, %v5888_v2  ;;  %v3502_v46 = vmul.f32 0.5, %v2422_v22  ;;  %v2426_v21 = vadd.f32 %v8736_v9, %v8344_v13  ;;  %v8840_v62 = vpop.f32.mrb[48].mxu1 }
 0x1ef   :  { %4539 = vst [vmem:[%s10191_s3 + $0x28] sm:$0xff] %v4267_v50  ;;  %v4283_v59 = vadd.f32 0.5, %v4011_v51  ;;  %v3504_v3 = vmul.f32 0.5, %v2583_v15  ;;  %v2587_v40 = vadd.f32 %v8742_v7, %v8344_v13  ;;  %v2428_v42 = vadd.f32 %v8738_v53, %v8344_v13  ;;  %v8849_v41 = vpop.f32.mrb[49].mxu1 }
 0x1f0   :  { %v5890_v28 = vpop.eup %5889  ;;  %4541 = vst [vmem:[%s10191_s3 + $0x38] sm:$0xff] %v4269_v29  ;;  %v4285_v9 = vadd.f32 0.5, %v4013_v44  ;;  %5905 = vtanh.f32 %v3502_v46  ;;  %v3518_v37 = vmul.f32 0.5, %v2426_v21  ;;  %v2589_v55 = vadd.f32 %v8749_v48, %v8344_v13  ;;  %v8856_v57 = vpop.f32.mrb[50].mxu0 }
 0x1f1   :  { %v5892_v1 = vpop.eup %5891  ;;  %4555 = vst [vmem:[%s10191_s3 + $0xa8] sm:$0xff] %v4283_v59  ;;  %v4012_v53 = vmul.f32 0.5, %v5890_v28  ;;  %5907 = vtanh.f32 %v3504_v3  ;;  %v3520_v7 = vmul.f32 0.5, %v2587_v40  ;;  %v3519_v61 = vmul.f32 0.5, %v2428_v42  ;;  %v8861_v0 = vpop.f32.mrb[51].mxu0 }
 0x1f2   :  { %v5894_v45 = vpop.eup %5893  ;;  %4557 = vst [vmem:[%s10191_s3 + $0xb8] sm:$0xff] %v4285_v9  ;;  %v4014_v16 = vmul.f32 0.5, %v5892_v1  ;;  %5909 = vtanh.f32 %v3518_v37  ;;  %v3521_v48 = vmul.f32 0.5, %v2589_v55  ;;  %v2432_v35 = vadd.f32 %v8754_v36, %v8363_v54  ;;  %v8868_v38 = vpop.f32.mrb[50].mxu1 }
 0x1f3   :  { %v5896_v23 = vpop.eup %5895  ;;  %v4284_v19 = vadd.f32 0.5, %v4012_v53  ;;  %v4028_v49 = vmul.f32 0.5, %v5894_v45  ;;  %5911 = vtanh.f32 %v3520_v7  ;;  %v2593_v6 = vadd.f32 %v8766_v20, %v8363_v54  ;;  %v8872_v22 = vpop.f32.mrb[51].mxu1 }
 0x1f4   :  { %v5898_v2 = vpop.eup %5897  ;;  %v4286_v50 = vadd.f32 0.5, %v4014_v16  ;;  %v4030_v51 = vmul.f32 0.5, %v5896_v23  ;;  %5913 = vtanh.f32 %v3519_v61  ;;  %v3535_v15 = vmul.f32 0.5, %v2432_v35  ;;  %v8874_v29 = vpop.f32.mrb[52].mxu0 }
 0x1f5   :  { %v5900_v44 = vpop.eup %5899  ;;  %4556 = vst [vmem:[%s10191_s3 + $0xb0] sm:$0xff] %v4284_v19  ;;  %v4300_v36 = vadd.f32 0.5, %v4028_v49  ;;  %v4029_v46 = vmul.f32 0.5, %v5898_v2  ;;  %5915 = vtanh.f32 %v3521_v48  ;;  %v3537_v21 = vmul.f32 0.5, %v2593_v6  ;;  %v8879_v59 = vpop.f32.mrb[53].mxu0 }
 0x1f6   :  { %v5902_v20 = vpop.eup %5901  ;;  %4558 = vst [vmem:[%s10191_s3 + $0xc0] sm:$0xff] %v4286_v50  ;;  %v4302_v3 = vadd.f32 0.5, %v4030_v51  ;;  %v4031_v40 = vmul.f32 0.5, %v5900_v44  ;;  %5917 = vtanh.f32 %v3535_v15  ;;  %v2434_v42 = vadd.f32 %v8759_v33, %v8363_v54  ;;  %v8886_v28 = vpop.f32.mrb[52].mxu1 }
 0x1f7   :  { %v5904_v9 = vpop.eup %5903  ;;  %4572 = vst [vmem:[%s10191_s3 + $0x130] sm:$0xff] %v4300_v36  ;;  %v4301_v37 = vadd.f32 0.5, %v4029_v46  ;;  %v4045_v55 = vmul.f32 0.5, %v5902_v20  ;;  %5919 = vtanh.f32 %v3537_v21  ;;  %v2595_v1 = vadd.f32 %v8773_v8, %v8363_v54  ;;  %v8893_v53 = vpop.f32.mrb[53].mxu1 }
 0x1f8   :  { %4574 = vst [vmem:[%s10191_s3 + $0x140] sm:$0xff] %v4302_v3  ;;  %v4303_v33 = vadd.f32 0.5, %v4031_v40  ;;  %v4047_v7 = vmul.f32 0.5, %v5904_v9  ;;  %v3536_v61 = vmul.f32 0.5, %v2434_v42  ;;  %v2438_v45 = vadd.f32 %v8780_v14, %v8383_v27  ;;  %v8900_v16 = vpop.f32.mrb[54].mxu0 }
 0x1f9   :  { %4573 = vst [vmem:[%s10191_s3 + $0x138] sm:$0xff] %v4301_v37  ;;  %v4317_v48 = vadd.f32 0.5, %v4045_v55  ;;  %v3538_v8 = vmul.f32 0.5, %v2595_v1  ;;  %v2599_v35 = vadd.f32 %v8796_v43, %v8383_v27  ;;  %v2440_v23 = vadd.f32 %v8789_v30, %v8383_v27  ;;  %v8909_v19 = vpop.f32.mrb[55].mxu0 }
 0x1fa   :  { %v5906_v49 = vpop.eup %5905  ;;  %4575 = vst [vmem:[%s10191_s3 + $0x148] sm:$0xff] %v4303_v33  ;;  %v4319_v14 = vadd.f32 0.5, %v4047_v7  ;;  %5921 = vtanh.f32 %v3536_v61  ;;  %v3552_v6 = vmul.f32 0.5, %v2438_v45  ;;  %v2601_v2 = vadd.f32 %v8801_v34, %v8383_v27  ;;  %v8916_v50 = vpop.f32.mrb[54].mxu1 }
 0x1fb   :  { %v5908_v51 = vpop.eup %5907  ;;  %4589 = vst [vmem:[%s10191_s3 + $0x1b8] sm:$0xff] %v4317_v48  ;;  %v4046_v30 = vmul.f32 0.5, %v5906_v49  ;;  %5923 = vtanh.f32 %v3538_v8  ;;  %v3554_v43 = vmul.f32 0.5, %v2599_v35  ;;  %v3553_v15 = vmul.f32 0.5, %v2440_v23  ;;  %v8921_v44 = vpop.f32.mrb[55].mxu1 }
 0x1fc   :  { %v5910_v36 = vpop.eup %5909  ;;  %4591 = vst [vmem:[%s10191_s3 + $0x1c8] sm:$0xff] %v4319_v14  ;;  %v4048_v46 = vmul.f32 0.5, %v5908_v51  ;;  %5925 = vtanh.f32 %v3552_v6  ;;  %v3555_v34 = vmul.f32 0.5, %v2601_v2  ;;  %v2444_v21 = vadd.f32 %v8808_v32, %v8410_v25  ;;  %v8928_v20 = vpop.f32.mrb[56].mxu0 }
 0x1fd   :  { %v5912_v3 = vpop.eup %5911  ;;  %v4318_v40 = vadd.f32 0.5, %v4046_v30  ;;  %v4062_v42 = vmul.f32 0.5, %v5910_v36  ;;  %5927 = vtanh.f32 %v3554_v43  ;;  %v2605_v9 = vadd.f32 %v8814_v10, %v8410_v25  ;;  %v8932_v37 = vpop.f32.mrb[57].mxu0 }
 0x1fe   :  { %v5914_v55 = vpop.eup %5913  ;;  %v4320_v1 = vadd.f32 0.5, %v4048_v46  ;;  %v4064_v33 = vmul.f32 0.5, %v5912_v3  ;;  %5929 = vtanh.f32 %v3553_v15  ;;  %v3569_v7 = vmul.f32 0.5, %v2444_v21  ;;  %v8934_v61 = vpop.f32.mrb[56].mxu1 }
 0x1ff   :  { %v5916_v45 = vpop.eup %5915  ;;  %4590 = vst [vmem:[%s10191_s3 + $0x1c0] sm:$0xff] %v4318_v40  ;;  %v4334_v32 = vadd.f32 0.5, %v4062_v42  ;;  %v4063_v48 = vmul.f32 0.5, %v5914_v55  ;;  %5931 = vtanh.f32 %v3555_v34  ;;  %v3571_v8 = vmul.f32 0.5, %v2605_v9  ;;  %v8939_v35 = vpop.f32.mrb[57].mxu1 }
 0x200   :  { %v5918_v10 = vpop.eup %5917  ;;  %4592 = vst [vmem:[%s10191_s3 + $0x1d0] sm:$0xff] %v4320_v1  ;;  %v4336_v23 = vadd.f32 0.5, %v4064_v33  ;;  %v4065_v49 = vmul.f32 0.5, %v5916_v45  ;;  %5933 = vtanh.f32 %v3569_v7  ;;  %v2446_v14 = vadd.f32 %v8812_v4, %v8410_v25  ;;  %v8946_v6 = vpop.f32.mrb[58].mxu0 }
 0x201   :  { %v5920_v2 = vpop.eup %5919  ;;  %4606 = vst [vmem:[%s10191_s3 + $0x240] sm:$0xff] %v4334_v32  ;;  %v4335_v51 = vadd.f32 0.5, %v4063_v48  ;;  %v4079_v30 = vmul.f32 0.5, %v5918_v10  ;;  %5935 = vtanh.f32 %v3571_v8  ;;  %v2607_v43 = vadd.f32 %v8819_v26, %v8410_v25  ;;  %v8953_v15 = vpop.f32.mrb[59].mxu0 }
 0x202   :  { %4608 = vst [vmem:[%s10191_s3 + $0x250] sm:$0xff] %v4336_v23  ;;  %v4337_v4 = vadd.f32 0.5, %v4065_v49  ;;  %v4081_v36 = vmul.f32 0.5, %v5920_v2  ;;  %v3570_v46 = vmul.f32 0.5, %v2446_v14  ;;  %v2450_v34 = vadd.f32 %v8826_v56, %v8433_v60  ;;  %v8960_v21 = vpop.f32.mrb[58].mxu1 }
 0x203   :  { %4607 = vst [vmem:[%s10191_s3 + $0x248] sm:$0xff] %v4335_v51  ;;  %v4351_v3 = vadd.f32 0.5, %v4079_v30  ;;  %v3572_v26 = vmul.f32 0.5, %v2607_v43  ;;  %v2611_v40 = vadd.f32 %v8840_v62, %v8433_v60  ;;  %v2452_v42 = vadd.f32 %v8833_v12, %v8433_v60  ;;  %v8969_v9 = vpop.f32.mrb[59].mxu1 }
 0x204   :  { %v5922_v55 = vpop.eup %5921  ;;  %4609 = vst [vmem:[%s10191_s3 + $0x258] sm:$0xff] %v4337_v4  ;;  %v4353_v56 = vadd.f32 0.5, %v4081_v36  ;;  %5937 = vtanh.f32 %v3570_v46  ;;  %v3586_v1 = vmul.f32 0.5, %v2450_v34  ;;  %v2613_v33 = vadd.f32 %v8849_v41, %v8433_v60  ;;  %v8976_v7 = vpop.f32.mrb[60].mxu0 }
 0x205   :  { %v5924_v45 = vpop.eup %5923  ;;  %4623 = vst [vmem:[%s10191_s3 + $0x2c8] sm:$0xff] %v4351_v3  ;;  %v4080_v12 = vmul.f32 0.5, %v5922_v55  ;;  %5939 = vtanh.f32 %v3572_v26  ;;  %v3588_v62 = vmul.f32 0.5, %v2611_v40  ;;  %v3587_v32 = vmul.f32 0.5, %v2452_v42  ;;  %v8981_v48 = vpop.f32.mrb[61].mxu0 }
 0x206   :  { %v5926_v8 = vpop.eup %5925  ;;  %4625 = vst [vmem:[%s10191_s3 + $0x2d8] sm:$0xff] %v4353_v56  ;;  %v4082_v10 = vmul.f32 0.5, %v5924_v45  ;;  %5941 = vtanh.f32 %v3586_v1  ;;  %v3589_v41 = vmul.f32 0.5, %v2613_v33  ;;  %v2456_v23 = vadd.f32 %v8856_v57, %v8449_v47  ;;  %v8988_v49 = vpop.f32.mrb[60].mxu1 }
 0x207   :  { %v5928_v14 = vpop.eup %5927  ;;  %v4352_v2 = vadd.f32 0.5, %v4080_v12  ;;  %v4096_v51 = vmul.f32 0.5, %v5926_v8  ;;  %5943 = vtanh.f32 %v3588_v62  ;;  %v2617_v30 = vadd.f32 %v8868_v38, %v8449_v47  ;;  %v8992_v43 = vpop.f32.mrb[61].mxu1 }
 0x208   :  { %v5930_v4 = vpop.eup %5929  ;;  %v4354_v36 = vadd.f32 0.5, %v4082_v10  ;;  %v4098_v46 = vmul.f32 0.5, %v5928_v14  ;;  %5945 = vtanh.f32 %v3587_v32  ;;  %v3603_v34 = vmul.f32 0.5, %v2456_v23  ;;  %v8994_v3 = vpop.f32.mrb[62].mxu0 }
 0x209   :  { %v5932_v26 = vpop.eup %5931  ;;  %4624 = vst [vmem:[%s10191_s3 + $0x2d0] sm:$0xff] %v4352_v2  ;;  %v4368_v57 = vadd.f32 0.5, %v4096_v51  ;;  %v4097_v40 = vmul.f32 0.5, %v5930_v4  ;;  %5947 = vtanh.f32 %v3589_v41  ;;  %v3605_v42 = vmul.f32 0.5, %v2617_v30  ;;  %v8999_v55 = vpop.f32.mrb[63].mxu0 }
 0x20a   :  { %v5934_v38 = vpop.eup %5933  ;;  %4626 = vst [vmem:[%s10191_s3 + $0x2e0] sm:$0xff] %v4354_v36  ;;  %v4370_v56 = vadd.f32 0.5, %v4098_v46  ;;  %v4099_v1 = vmul.f32 0.5, %v5932_v26  ;;  %5949 = vtanh.f32 %v3603_v34  ;;  %v2458_v33 = vadd.f32 %v8861_v0, %v8449_v47  ;;  %v9006_v45 = vpop.f32.mrb[62].mxu1 }
 0x20b   :  { %v5936_v12 = vpop.eup %5935  ;;  %4640 = vst [vmem:[%s10191_s3 + $0x350] sm:$0xff] %v4368_v57  ;;  %v4369_v62 = vadd.f32 0.5, %v4097_v40  ;;  %v4113_v32 = vmul.f32 0.5, %v5934_v38  ;;  %5951 = vtanh.f32 %v3605_v42  ;;  %v2619_v8 = vadd.f32 %v8872_v22, %v8449_v47  ;;  %v9013_v10 = vpop.f32.mrb[63].mxu1 }
 0x20c   :  { %4642 = vst [vmem:[%s10191_s3 + $0x360] sm:$0xff] %v4370_v56  ;;  %v4371_v0 = vadd.f32 0.5, %v4099_v1  ;;  %v4115_v41 = vmul.f32 0.5, %v5936_v12  ;;  %v3604_v23 = vmul.f32 0.5, %v2458_v33  ;;  %v2462_v14 = vadd.f32 %v8874_v29, %v8478_v5  ;;  %v9020_v2 = vpop.f32.mrb[64].mxu0 }
 0x20d   :  { %4641 = vst [vmem:[%s10191_s3 + $0x358] sm:$0xff] %v4369_v62  ;;  %v4385_v51 = vadd.f32 0.5, %v4113_v32  ;;  %v3606_v22 = vmul.f32 0.5, %v2619_v8  ;;  %v2623_v30 = vadd.f32 %v8886_v28, %v8478_v5  ;;  %v2464_v4 = vadd.f32 %v8879_v59, %v8478_v5  ;;  %v9029_v36 = vpop.f32.mrb[65].mxu0 }
 0x20e   :  { %v5938_v46 = vpop.eup %5937  ;;  %4643 = vst [vmem:[%s10191_s3 + $0x368] sm:$0xff] %v4371_v0  ;;  %v4387_v29 = vadd.f32 0.5, %v4115_v41  ;;  %5953 = vtanh.f32 %v3604_v23  ;;  %v3620_v34 = vmul.f32 0.5, %v2462_v14  ;;  %v2625_v26 = vadd.f32 %v8893_v53, %v8478_v5  ;;  %v9036_v57 = vpop.f32.mrb[64].mxu1 }
 0x20f   :  { %v5940_v40 = vpop.eup %5939  ;;  %4657 = vst [vmem:[%s10191_s3 + $0x3d8] sm:$0xff] %v4385_v51  ;;  %v4114_v59 = vmul.f32 0.5, %v5938_v46  ;;  %5955 = vtanh.f32 %v3606_v22  ;;  %v3622_v28 = vmul.f32 0.5, %v2623_v30  ;;  %v3621_v42 = vmul.f32 0.5, %v2464_v4  ;;  %v9041_v38 = vpop.f32.mrb[65].mxu1 }
 0x210   :  { %v5942_v56 = vpop.eup %5941  ;;  %4659 = vst [vmem:[%s10191_s3 + $0x3e8] sm:$0xff] %v4387_v29  ;;  %v4116_v1 = vmul.f32 0.5, %v5940_v40  ;;  %5957 = vtanh.f32 %v3620_v34  ;;  %v3623_v53 = vmul.f32 0.5, %v2625_v26  ;;  %v2468_v33 = vadd.f32 %v8900_v16, %v8513_v39  ;;  %v9048_v12 = vpop.f32.mrb[66].mxu0 }
 0x211   :  { %v5944_v62 = vpop.eup %5943  ;;  %v4386_v32 = vadd.f32 0.5, %v4114_v59  ;;  %v4130_v8 = vmul.f32 0.5, %v5942_v56  ;;  %5959 = vtanh.f32 %v3622_v28  ;;  %v2629_v0 = vadd.f32 %v8916_v50, %v8513_v39  ;;  %v9052_v41 = vpop.f32.mrb[67].mxu0 }
 0x212   :  { %v5946_v23 = vpop.eup %5945  ;;  %v4388_v14 = vadd.f32 0.5, %v4116_v1  ;;  %v4132_v51 = vmul.f32 0.5, %v5944_v62  ;;  %5961 = vtanh.f32 %v3621_v42  ;;  %v3637_v22 = vmul.f32 0.5, %v2468_v33  ;;  %v9054_v30 = vpop.f32.mrb[66].mxu1 }
 0x213   :  { %v5948_v4 = vpop.eup %5947  ;;  %4658 = vst [vmem:[%s10191_s3 + $0x3e0] sm:$0xff] %v4386_v32  ;;  %v4402_v16 = vadd.f32 0.5, %v4130_v8  ;;  %v4131_v46 = vmul.f32 0.5, %v5946_v23  ;;  %5963 = vtanh.f32 %v3623_v53  ;;  %v3639_v29 = vmul.f32 0.5, %v2629_v0  ;;  %v9059_v34 = vpop.f32.mrb[67].mxu1 }
 0x214   :  { %v5950_v50 = vpop.eup %5949  ;;  %4660 = vst [vmem:[%s10191_s3 + $0x3f0] sm:$0xff] %v4388_v14  ;;  %v4404_v26 = vadd.f32 0.5, %v4132_v51  ;;  %v4133_v40 = vmul.f32 0.5, %v5948_v4  ;;  %5965 = vtanh.f32 %v3637_v22  ;;  %v2470_v59 = vadd.f32 %v8909_v19, %v8513_v39  ;;  %v9066_v28 = vpop.f32.mrb[68].mxu0 }
 0x215   :  { %v5952_v42 = vpop.eup %5951  ;;  %4674 = vst [vmem:[%s10191_s3 + $0x460] sm:$0xff] %v4402_v16  ;;  %v4403_v56 = vadd.f32 0.5, %v4131_v46  ;;  %v4147_v1 = vmul.f32 0.5, %v5950_v50  ;;  %5967 = vtanh.f32 %v3639_v29  ;;  %v2631_v53 = vadd.f32 %v8921_v44, %v8513_v39  ;;  %v9073_v33 = vpop.f32.mrb[69].mxu0 }
 0x216   :  { %4676 = vst [vmem:[%s10191_s3 + $0x470] sm:$0xff] %v4404_v26  ;;  %v4405_v19 = vadd.f32 0.5, %v4133_v40  ;;  %v4149_v62 = vmul.f32 0.5, %v5952_v42  ;;  %v3638_v32 = vmul.f32 0.5, %v2470_v59  ;;  %v2474_v8 = vadd.f32 %v8928_v20, %v8565_v11  ;;  %v9080_v0 = vpop.f32.mrb[68].mxu1 }
 0x217   :  { %4675 = vst [vmem:[%s10191_s3 + $0x468] sm:$0xff] %v4403_v56  ;;  %v4419_v23 = vadd.f32 0.5, %v4147_v1  ;;  %v3640_v44 = vmul.f32 0.5, %v2631_v53  ;;  %v2635_v14 = vadd.f32 %v8934_v61, %v8565_v11  ;;  %v2476_v51 = vadd.f32 %v8932_v37, %v8565_v11  ;;  %v9089_v22 = vpop.f32.mrb[69].mxu1 }
 0x218   :  { %v5954_v4 = vpop.eup %5953  ;;  %4677 = vst [vmem:[%s10191_s3 + $0x478] sm:$0xff] %v4405_v19  ;;  %v4421_v20 = vadd.f32 0.5, %v4149_v62  ;;  %5969 = vtanh.f32 %v3638_v32  ;;  %v3654_v16 = vmul.f32 0.5, %v2474_v8  ;;  %v2637_v46 = vadd.f32 %v8939_v35, %v8565_v11  ;;  %v9096_v29 = vpop.f32.mrb[70].mxu0 }
 0x219   :  { %v5956_v50 = vpop.eup %5955  ;;  %4691 = vst [vmem:[%s10191_s3 + $0x4e8] sm:$0xff] %v4419_v23  ;;  %v4148_v37 = vmul.f32 0.5, %v5954_v4  ;;  %5971 = vtanh.f32 %v3640_v44  ;;  %v3656_v61 = vmul.f32 0.5, %v2635_v14  ;;  %v3655_v26 = vmul.f32 0.5, %v2476_v51  ;;  %v9101_v40 = vpop.f32.mrb[71].mxu0 }
 0x21a   :  { %v5958_v59 = vpop.eup %5957  ;;  %4693 = vst [vmem:[%s10191_s3 + $0x4f8] sm:$0xff] %v4421_v20  ;;  %v4150_v42 = vmul.f32 0.5, %v5956_v50  ;;  %5973 = vtanh.f32 %v3654_v16  ;;  %v3657_v35 = vmul.f32 0.5, %v2637_v46  ;;  %v2480_v56 = vadd.f32 %v8946_v6, %v8615_v58  ;;  %v9108_v1 = vpop.f32.mrb[70].mxu1 }
 0x21b   :  { %v5960_v53 = vpop.eup %5959  ;;  %v4420_v19 = vadd.f32 0.5, %v4148_v37  ;;  %v4164_v62 = vmul.f32 0.5, %v5958_v59  ;;  %5975 = vtanh.f32 %v3656_v61  ;;  %v2641_v32 = vadd.f32 %v8960_v21, %v8615_v58  ;;  %v9112_v8 = vpop.f32.mrb[71].mxu1 }
 0x21c   :  { %v5962_v23 = vpop.eup %5961  ;;  %v4422_v44 = vadd.f32 0.5, %v4150_v42  ;;  %v4166_v14 = vmul.f32 0.5, %v5960_v53  ;;  %5977 = vtanh.f32 %v3655_v26  ;;  %v3671_v51 = vmul.f32 0.5, %v2480_v56  ;;  %v9114_v4 = vpop.f32.mrb[72].mxu0 }
 0x21d   :  { %v5964_v20 = vpop.eup %5963  ;;  %4692 = vst [vmem:[%s10191_s3 + $0x4f0] sm:$0xff] %v4420_v19  ;;  %v4436_v6 = vadd.f32 0.5, %v4164_v62  ;;  %v4165_v16 = vmul.f32 0.5, %v5962_v23  ;;  %5979 = vtanh.f32 %v3657_v35  ;;  %v3673_v46 = vmul.f32 0.5, %v2641_v32  ;;  %v9119_v50 = vpop.f32.mrb[73].mxu0 }
 0x21e   :  { %v5966_v21 = vpop.eup %5965  ;;  %4694 = vst [vmem:[%s10191_s3 + $0x500] sm:$0xff] %v4422_v44  ;;  %v4438_v37 = vadd.f32 0.5, %v4166_v14  ;;  %v4167_v61 = vmul.f32 0.5, %v5964_v20  ;;  %5981 = vtanh.f32 %v3671_v51  ;;  %v2482_v26 = vadd.f32 %v8953_v15, %v8615_v58  ;;  %v9126_v59 = vpop.f32.mrb[72].mxu1 }
 0x21f   :  { %v5968_v42 = vpop.eup %5967  ;;  %4708 = vst [vmem:[%s10191_s3 + $0x570] sm:$0xff] %v4436_v6  ;;  %v4437_v35 = vadd.f32 0.5, %v4165_v16  ;;  %v4181_v56 = vmul.f32 0.5, %v5966_v21  ;;  %5983 = vtanh.f32 %v3673_v46  ;;  %v2643_v53 = vadd.f32 %v8969_v9, %v8615_v58  ;;  %v9133_v19 = vpop.f32.mrb[73].mxu1 }
 0x220   :  { %4710 = vst [vmem:[%s10191_s3 + $0x580] sm:$0xff] %v4438_v37  ;;  %v4439_v15 = vadd.f32 0.5, %v4167_v61  ;;  %v4183_v62 = vmul.f32 0.5, %v5968_v42  ;;  %v3672_v32 = vmul.f32 0.5, %v2482_v26  ;;  %v2486_v23 = vadd.f32 %v8976_v7, %v8624_v17  ;;  %v9140_v44 = vpop.f32.mrb[74].mxu0 }
 0x221   :  { %4709 = vst [vmem:[%s10191_s3 + $0x578] sm:$0xff] %v4437_v35  ;;  %v4453_v14 = vadd.f32 0.5, %v4181_v56  ;;  %v3674_v9 = vmul.f32 0.5, %v2643_v53  ;;  %v2647_v51 = vadd.f32 %v8988_v49, %v8624_v17  ;;  %v2488_v20 = vadd.f32 %v8981_v48, %v8624_v17  ;;  %v9149_v6 = vpop.f32.mrb[75].mxu0 }
 0x222   :  { %v5970_v16 = vpop.eup %5969  ;;  %4711 = vst [vmem:[%s10191_s3 + $0x588] sm:$0xff] %v4439_v15  ;;  %v4455_v7 = vadd.f32 0.5, %v4183_v62  ;;  %5985 = vtanh.f32 %v3672_v32  ;;  %v3688_v46 = vmul.f32 0.5, %v2486_v23  ;;  %v2649_v21 = vadd.f32 %v8992_v43, %v8624_v17  ;;  %v9156_v37 = vpop.f32.mrb[74].mxu1 }
 0x223   :  { %v5972_v61 = vpop.eup %5971  ;;  %4725 = vst [vmem:[%s10191_s3 + $0x5f8] sm:$0xff] %v4453_v14  ;;  %v4182_v48 = vmul.f32 0.5, %v5970_v16  ;;  %5987 = vtanh.f32 %v3674_v9  ;;  %v3690_v49 = vmul.f32 0.5, %v2647_v51  ;;  %v3689_v26 = vmul.f32 0.5, %v2488_v20  ;;  %v9161_v42 = vpop.f32.mrb[75].mxu1 }
 0x224   :  { %v5974_v35 = vpop.eup %5973  ;;  %4727 = vst [vmem:[%s10191_s3 + $0x608] sm:$0xff] %v4455_v7  ;;  %v4184_v56 = vmul.f32 0.5, %v5972_v61  ;;  %5989 = vtanh.f32 %v3688_v46  ;;  %v3691_v43 = vmul.f32 0.5, %v2649_v21  ;;  %v2492_v53 = vadd.f32 %v8994_v3, %v8660_v18  ;;  %v9168_v15 = vpop.f32.mrb[76].mxu0 }
 0x225   :  { %v5976_v62 = vpop.eup %5975  ;;  %v4454_v32 = vadd.f32 0.5, %v4182_v48  ;;  %v4198_v23 = vmul.f32 0.5, %v5974_v35  ;;  %5991 = vtanh.f32 %v3690_v49  ;;  %v2653_v14 = vadd.f32 %v9006_v45, %v8660_v18  ;;  %v9172_v9 = vpop.f32.mrb[77].mxu0 }
 0x226   :  { %v5978_v51 = vpop.eup %5977  ;;  %v4456_v20 = vadd.f32 0.5, %v4184_v56  ;;  %v4200_v16 = vmul.f32 0.5, %v5976_v62  ;;  %5993 = vtanh.f32 %v3689_v26  ;;  %v3705_v7 = vmul.f32 0.5, %v2492_v53  ;;  %v9174_v46 = vpop.f32.mrb[76].mxu1 }
 0x227   :  { %v5980_v21 = vpop.eup %5979  ;;  %4726 = vst [vmem:[%s10191_s3 + $0x600] sm:$0xff] %v4454_v32  ;;  %v4470_v3 = vadd.f32 0.5, %v4198_v23  ;;  %v4199_v61 = vmul.f32 0.5, %v5978_v51  ;;  %5995 = vtanh.f32 %v3691_v43  ;;  %v3707_v48 = vmul.f32 0.5, %v2653_v14  ;;  %v9179_v49 = vpop.f32.mrb[77].mxu1 }
 0x228   :  { %v5982_v45 = vpop.eup %5981  ;;  %4728 = vst [vmem:[%s10191_s3 + $0x610] sm:$0xff] %v4456_v20  ;;  %v4472_v26 = vadd.f32 0.5, %v4200_v16  ;;  %v4201_v35 = vmul.f32 0.5, %v5980_v21  ;;  %5997 = vtanh.f32 %v3705_v7  ;;  %v2494_v56 = vadd.f32 %v8999_v55, %v8660_v18  ;;  %v9186_v53 = vpop.f32.mrb[78].mxu0 }
 0x229   :  { %v5984_v62 = vpop.eup %5983  ;;  %4742 = vst [vmem:[%s10191_s3 + $0x680] sm:$0xff] %v4470_v3  ;;  %v4471_v43 = vadd.f32 0.5, %v4199_v61  ;;  %v4215_v32 = vmul.f32 0.5, %v5982_v45  ;;  %5999 = vtanh.f32 %v3707_v48  ;;  %v2655_v23 = vadd.f32 %v9013_v10, %v8660_v18  ;;  %v9193_v14 = vpop.f32.mrb[79].mxu0 }
 0x22a   :  { %4744 = vst [vmem:[%s10191_s3 + $0x690] sm:$0xff] %v4472_v26  ;;  %v4473_v55 = vadd.f32 0.5, %v4201_v35  ;;  %v4217_v51 = vmul.f32 0.5, %v5984_v62  ;;  %v3706_v20 = vmul.f32 0.5, %v2494_v56  ;;  %v2724_v16 = vadd.f32 %v9020_v2, %v8289_v52  ;;  %v9200_v7 = vpop.f32.mrb[78].mxu1 }
 0x22b   :  { %4743 = vst [vmem:[%s10191_s3 + $0x688] sm:$0xff] %v4471_v43  ;;  %v4487_v21 = vadd.f32 0.5, %v4215_v32  ;;  %v3708_v10 = vmul.f32 0.5, %v2655_v23  ;;  %v2885_v3 = vadd.f32 %v9036_v57, %v8289_v52  ;;  %v2726_v61 = vadd.f32 %v9029_v36, %v8289_v52  ;;  %v9209_v48 = vpop.f32.mrb[79].mxu1 }
 0x22c   :  { %v5986_v45 = vpop.eup %5985  ;;  %4745 = vst [vmem:[%s10191_s3 + $0x698] sm:$0xff] %v4473_v55  ;;  %v4489_v2 = vadd.f32 0.5, %v4217_v51  ;;  %6001 = vtanh.f32 %v3706_v20  ;;  %v3454_v26 = vmul.f32 0.5, %v2724_v16  ;;  %v2887_v35 = vadd.f32 %v9041_v38, %v8289_v52  ;;  %v9216_v56 = vpop.f32.mrb[80].mxu0 }
 0x22d   :  { %v5988_v62 = vpop.eup %5987  ;;  %4759 = vst [vmem:[%s10191_s3 + $0x708] sm:$0xff] %v4487_v21  ;;  %v4216_v36 = vmul.f32 0.5, %v5986_v45  ;;  %6003 = vtanh.f32 %v3708_v10  ;;  %v3456_v57 = vmul.f32 0.5, %v2885_v3  ;;  %v3455_v43 = vmul.f32 0.5, %v2726_v61  ;;  %v9221_v32 = vpop.f32.mrb[81].mxu0 }
 0x22e   :  { %v5990_v23 = vpop.eup %5989  ;;  %4761 = vst [vmem:[%s10191_s3 + $0x718] sm:$0xff] %v4489_v2  ;;  %v4218_v55 = vmul.f32 0.5, %v5988_v62  ;;  %6005 = vtanh.f32 %v3454_v26  ;;  %v3457_v38 = vmul.f32 0.5, %v2887_v35  ;;  %v2730_v51 = vadd.f32 %v9048_v12, %v8299_v63  ;;  %v9228_v20 = vpop.f32.mrb[80].mxu1 }
 0x22f   :  { %v5992_v16 = vpop.eup %5991  ;;  %v4488_v21 = vadd.f32 0.5, %v4216_v36  ;;  %v4232_v10 = vmul.f32 0.5, %v5990_v23  ;;  %6007 = vtanh.f32 %v3456_v57  ;;  %v2891_v3 = vadd.f32 %v9054_v30, %v8299_v63  ;;  %v9232_v61 = vpop.f32.mrb[81].mxu1 }
 0x230   :  { %v5994_v45 = vpop.eup %5993  ;;  %v4490_v52 = vadd.f32 0.5, %v4218_v55  ;;  %v4234_v2 = vmul.f32 0.5, %v5992_v16  ;;  %6009 = vtanh.f32 %v3455_v43  ;;  %v3471_v26 = vmul.f32 0.5, %v2730_v51  ;;  %v9234_v35 = vpop.f32.mrb[82].mxu0 }
 0x231   :  { %v5996_v62 = vpop.eup %5995  ;;  %4760 = vst [vmem:[%s10191_s3 + $0x710] sm:$0xff] %v4488_v21  ;;  %v4504_v12 = vadd.f32 0.5, %v4232_v10  ;;  %v4233_v36 = vmul.f32 0.5, %v5994_v45  ;;  %6011 = vtanh.f32 %v3457_v38  ;;  %v3473_v57 = vmul.f32 0.5, %v2891_v3  ;;  %v9239_v23 = vpop.f32.mrb[83].mxu0 }
 0x232   :  { %v5998_v30 = vpop.eup %5997  ;;  %4762 = vst [vmem:[%s10191_s3 + $0x720] sm:$0xff] %v4490_v52  ;;  %v4506_v43 = vadd.f32 0.5, %v4234_v2  ;;  %v4235_v55 = vmul.f32 0.5, %v5996_v62  ;;  %6013 = vtanh.f32 %v3471_v26  ;;  %v2732_v51 = vadd.f32 %v9052_v41, %v8299_v63  ;;  %v9246_v16 = vpop.f32.mrb[82].mxu1 }
 0x233   :  { %v6000_v21 = vpop.eup %5999  ;;  %4776 = vst [vmem:[%s10191_s3 + $0x790] sm:$0xff] %v4504_v12  ;;  %v4505_v38 = vadd.f32 0.5, %v4233_v36  ;;  %v4249_v10 = vmul.f32 0.5, %v5998_v30  ;;  %6015 = vtanh.f32 %v3473_v57  ;;  %v2893_v3 = vadd.f32 %v9059_v34, %v8299_v63  ;;  %v9253_v52 = vpop.f32.mrb[83].mxu1 }
 0x234   :  { %4778 = vst [vmem:[%s10191_s3 + $0x7a0] sm:$0xff] %v4506_v43  ;;  %v4507_v41 = vadd.f32 0.5, %v4235_v55  ;;  %v4251_v45 = vmul.f32 0.5, %v6000_v21  ;;  %v3472_v2 = vmul.f32 0.5, %v2732_v51  ;;  %v2736_v26 = vadd.f32 %v9066_v28, %v8319_v24  ;;  %v9260_v62 = vpop.f32.mrb[84].mxu0 }
 0x235   :  { %4777 = vst [vmem:[%s10191_s3 + $0x798] sm:$0xff] %v4505_v38  ;;  %v4521_v12 = vadd.f32 0.5, %v4249_v10  ;;  %v3474_v34 = vmul.f32 0.5, %v2893_v3  ;;  %v2897_v36 = vadd.f32 %v9080_v0, %v8319_v24  ;;  %v2738_v57 = vadd.f32 %v9073_v33, %v8319_v24  ;;  %v9269_v30 = vpop.f32.mrb[85].mxu0 }
 0x236   :  { %v6002_v43 = vpop.eup %6001  ;;  %4779 = vst [vmem:[%s10191_s3 + $0x7a8] sm:$0xff] %v4507_v41  ;;  %v4523_v28 = vadd.f32 0.5, %v4251_v45  ;;  %6017 = vtanh.f32 %v3472_v2  ;;  %v3488_v55 = vmul.f32 0.5, %v2736_v26  ;;  %v2899_v51 = vadd.f32 %v9089_v22, %v8319_v24  ;;  %v9276_v21 = vpop.f32.mrb[84].mxu1 }
 0x237   :  { %v6004_v38 = vpop.eup %6003  ;;  %4793 = vst [vmem:[%s10191_s3 + $0x818] sm:$0xff] %v4521_v12  ;;  %v4250_v33 = vmul.f32 0.5, %v6002_v43  ;;  %6019 = vtanh.f32 %v3474_v34  ;;  %v3490_v0 = vmul.f32 0.5, %v2897_v36  ;;  %v3489_v10 = vmul.f32 0.5, %v2738_v57  ;;  %v9281_v3 = vpop.f32.mrb[85].mxu1 }
 0x238   :  { %v6006_v41 = vpop.eup %6005  ;;  %4795 = vst [vmem:[%s10191_s3 + $0x828] sm:$0xff] %v4523_v28  ;;  %v4252_v45 = vmul.f32 0.5, %v6004_v38  ;;  %6021 = vtanh.f32 %v3488_v55  ;;  %v3491_v22 = vmul.f32 0.5, %v2899_v51  ;;  %v2742_v2 = vadd.f32 %v9096_v29, %v8331_v31  ;;  %v9288_v26 = vpop.f32.mrb[86].mxu0 }
 0x239   :  { %v6008_v12 = vpop.eup %6007  ;;  %v4522_v43 = vadd.f32 0.5, %v4250_v33  ;;  %v3998_v34 = vmul.f32 0.5, %v6006_v41  ;;  %6023 = vtanh.f32 %v3490_v0  ;;  %v2903_v36 = vadd.f32 %v9108_v1, %v8331_v31  ;;  %v9292_v57 = vpop.f32.mrb[87].mxu0 }
 0x23a   :  { %v6010_v24 = vpop.eup %6009  ;;  %v4524_v63 = vadd.f32 0.5, %v4252_v45  ;;  %v4000_v28 = vmul.f32 0.5, %v6008_v12  ;;  %6025 = vtanh.f32 %v3489_v10  ;;  %v3505_v55 = vmul.f32 0.5, %v2742_v2  ;;  %v9294_v51 = vpop.f32.mrb[86].mxu1 }
 0x23b   :  { %v6012_v38 = vpop.eup %6011  ;;  %4794 = vst [vmem:[%s10191_s3 + $0x820] sm:$0xff] %v4522_v43  ;;  %v4270_v29 = vadd.f32 0.5, %v3998_v34  ;;  %v3999_v33 = vmul.f32 0.5, %v6010_v24  ;;  %6027 = vtanh.f32 %v3491_v22  ;;  %v3507_v0 = vmul.f32 0.5, %v2903_v36  ;;  %v9299_v41 = vpop.f32.mrb[87].mxu1 }
 0x23c   :  { %v6014_v1 = vpop.eup %6013  ;;  %4796 = vst [vmem:[%s10191_s3 + $0x830] sm:$0xff] %v4524_v63  ;;  %v4272_v10 = vadd.f32 0.5, %v4000_v28  ;;  %v4001_v45 = vmul.f32 0.5, %v6012_v38  ;;  %6029 = vtanh.f32 %v3505_v55  ;;  %v2744_v2 = vadd.f32 %v9101_v40, %v8331_v31  ;;  %v9306_v12 = vpop.f32.mrb[88].mxu0 }
 0x23d   :  { %v6016_v43 = vpop.eup %6015  ;;  %4542 = vst [vmem:[%s10191_s3 + $0x40] sm:$0xff] %v4270_v29  ;;  %v4271_v24 = vadd.f32 0.5, %v3999_v33  ;;  %v4015_v22 = vmul.f32 0.5, %v6014_v1  ;;  %6031 = vtanh.f32 %v3507_v0  ;;  %v2905_v34 = vadd.f32 %v9112_v8, %v8331_v31  ;;  %v9313_v63 = vpop.f32.mrb[89].mxu0 }
 0x23e   :  { %4544 = vst [vmem:[%s10191_s3 + $0x50] sm:$0xff] %v4272_v10  ;;  %v4273_v40 = vadd.f32 0.5, %v4001_v45  ;;  %v4017_v36 = vmul.f32 0.5, %v6016_v43  ;;  %v3506_v28 = vmul.f32 0.5, %v2744_v2  ;;  %v2748_v55 = vadd.f32 %v9114_v4, %v8344_v13  ;;  %v9320_v38 = vpop.f32.mrb[88].mxu1 }
 0x23f   :  { %4543 = vst [vmem:[%s10191_s3 + $0x48] sm:$0xff] %v4271_v24  ;;  %v4287_v29 = vadd.f32 0.5, %v4015_v22  ;;  %v3508_v8 = vmul.f32 0.5, %v2905_v34  ;;  %v2909_v33 = vadd.f32 %v9126_v59, %v8344_v13  ;;  %v2750_v0 = vadd.f32 %v9119_v50, %v8344_v13  ;;  %v9329_v1 = vpop.f32.mrb[89].mxu1 }
 0x240   :  { %v6018_v10 = vpop.eup %6017  ;;  %4545 = vst [vmem:[%s10191_s3 + $0x58] sm:$0xff] %v4273_v40  ;;  %v4289_v4 = vadd.f32 0.5, %v4017_v36  ;;  %6033 = vtanh.f32 %v3506_v28  ;;  %v3522_v45 = vmul.f32 0.5, %v2748_v55  ;;  %v2911_v2 = vadd.f32 %v9133_v19, %v8344_v13  ;;  %v9336_v43 = vpop.f32.mrb[90].mxu0 }
 0x241   :  { %v6020_v24 = vpop.eup %6019  ;;  %4559 = vst [vmem:[%s10191_s3 + $0xc8] sm:$0xff] %v4287_v29  ;;  %v4016_v50 = vmul.f32 0.5, %v6018_v10  ;;  %6035 = vtanh.f32 %v3508_v8  ;;  %v3524_v59 = vmul.f32 0.5, %v2909_v33  ;;  %v3523_v22 = vmul.f32 0.5, %v2750_v0  ;;  %v9341_v34 = vpop.f32.mrb[91].mxu0 }
 0x242   :  { %v6022_v40 = vpop.eup %6021  ;;  %4561 = vst [vmem:[%s10191_s3 + $0xd8] sm:$0xff] %v4289_v4  ;;  %v4018_v36 = vmul.f32 0.5, %v6020_v24  ;;  %6037 = vtanh.f32 %v3522_v45  ;;  %v3525_v19 = vmul.f32 0.5, %v2911_v2  ;;  %v2754_v28 = vadd.f32 %v9140_v44, %v8363_v54  ;;  %v9348_v55 = vpop.f32.mrb[90].mxu1 }
 0x243   :  { %v6024_v29 = vpop.eup %6023  ;;  %v4288_v10 = vadd.f32 0.5, %v4016_v50  ;;  %v4032_v8 = vmul.f32 0.5, %v6022_v40  ;;  %6039 = vtanh.f32 %v3524_v59  ;;  %v2915_v33 = vadd.f32 %v9156_v37, %v8363_v54  ;;  %v9352_v0 = vpop.f32.mrb[91].mxu1 }
 0x244   :  { %v6026_v13 = vpop.eup %6025  ;;  %v4290_v31 = vadd.f32 0.5, %v4018_v36  ;;  %v4034_v4 = vmul.f32 0.5, %v6024_v29  ;;  %6041 = vtanh.f32 %v3523_v22  ;;  %v3539_v45 = vmul.f32 0.5, %v2754_v28  ;;  %v9354_v2 = vpop.f32.mrb[92].mxu0 }
 0x245   :  { %v6028_v24 = vpop.eup %6027  ;;  %4560 = vst [vmem:[%s10191_s3 + $0xd0] sm:$0xff] %v4288_v10  ;;  %v4304_v44 = vadd.f32 0.5, %v4032_v8  ;;  %v4033_v50 = vmul.f32 0.5, %v6026_v13  ;;  %6043 = vtanh.f32 %v3525_v19  ;;  %v3541_v59 = vmul.f32 0.5, %v2915_v33  ;;  %v9359_v40 = vpop.f32.mrb[93].mxu0 }
 0x246   :  { %v6030_v37 = vpop.eup %6029  ;;  %4562 = vst [vmem:[%s10191_s3 + $0xe0] sm:$0xff] %v4290_v31  ;;  %v4306_v22 = vadd.f32 0.5, %v4034_v4  ;;  %v4035_v36 = vmul.f32 0.5, %v6028_v24  ;;  %6045 = vtanh.f32 %v3539_v45  ;;  %v2756_v28 = vadd.f32 %v9149_v6, %v8363_v54  ;;  %v9366_v29 = vpop.f32.mrb[92].mxu1 }
 0x247   :  { %v6032_v10 = vpop.eup %6031  ;;  %4576 = vst [vmem:[%s10191_s3 + $0x150] sm:$0xff] %v4304_v44  ;;  %v4305_v13 = vadd.f32 0.5, %v4033_v50  ;;  %v4049_v19 = vmul.f32 0.5, %v6030_v37  ;;  %6047 = vtanh.f32 %v3541_v59  ;;  %v2917_v8 = vadd.f32 %v9161_v42, %v8363_v54  ;;  %v9373_v31 = vpop.f32.mrb[93].mxu1 }
 0x248   :  { %4578 = vst [vmem:[%s10191_s3 + $0x160] sm:$0xff] %v4306_v22  ;;  %v4307_v6 = vadd.f32 0.5, %v4035_v36  ;;  %v4051_v33 = vmul.f32 0.5, %v6032_v10  ;;  %v3540_v4 = vmul.f32 0.5, %v2756_v28  ;;  %v2760_v45 = vadd.f32 %v9168_v15, %v8383_v27  ;;  %v9380_v24 = vpop.f32.mrb[94].mxu0 }
 0x249   :  { %4577 = vst [vmem:[%s10191_s3 + $0x158] sm:$0xff] %v4305_v13  ;;  %v4321_v44 = vadd.f32 0.5, %v4049_v19  ;;  %v3542_v42 = vmul.f32 0.5, %v2917_v8  ;;  %v2921_v50 = vadd.f32 %v9174_v46, %v8383_v27  ;;  %v2762_v59 = vadd.f32 %v9172_v9, %v8383_v27  ;;  %v9389_v37 = vpop.f32.mrb[95].mxu0 }
 0x24a   :  { %v6034_v22 = vpop.eup %6033  ;;  %4579 = vst [vmem:[%s10191_s3 + $0x168] sm:$0xff] %v4307_v6  ;;  %v4323_v15 = vadd.f32 0.5, %v4051_v33  ;;  %6049 = vtanh.f32 %v3540_v4  ;;  %v3556_v36 = vmul.f32 0.5, %v2760_v45  ;;  %v2923_v28 = vadd.f32 %v9179_v49, %v8383_v27  ;;  %v9396_v10 = vpop.f32.mrb[94].mxu1 }
 0x24b   :  { %v6036_v13 = vpop.eup %6035  ;;  %4593 = vst [vmem:[%s10191_s3 + $0x1d8] sm:$0xff] %v4321_v44  ;;  %v4050_v9 = vmul.f32 0.5, %v6034_v22  ;;  %6051 = vtanh.f32 %v3542_v42  ;;  %v3558_v46 = vmul.f32 0.5, %v2921_v50  ;;  %v3557_v19 = vmul.f32 0.5, %v2762_v59  ;;  %v9401_v8 = vpop.f32.mrb[95].mxu1 }
 0x24c   :  { %v6038_v6 = vpop.eup %6037  ;;  %4595 = vst [vmem:[%s10191_s3 + $0x1e8] sm:$0xff] %v4323_v15  ;;  %v4052_v33 = vmul.f32 0.5, %v6036_v13  ;;  %6053 = vtanh.f32 %v3556_v36  ;;  %v3559_v49 = vmul.f32 0.5, %v2923_v28  ;;  %v2766_v4 = vadd.f32 %v9186_v53, %v8410_v25  ;;  %v9408_v45 = vpop.f32.mrb[96].mxu0 }
 0x24d   :  { %v6040_v44 = vpop.eup %6039  ;;  %v4322_v22 = vadd.f32 0.5, %v4050_v9  ;;  %v4066_v42 = vmul.f32 0.5, %v6038_v6  ;;  %6055 = vtanh.f32 %v3558_v46  ;;  %v2927_v50 = vadd.f32 %v9200_v7, %v8410_v25  ;;  %v9412_v59 = vpop.f32.mrb[97].mxu0 }
 0x24e   :  { %v6042_v27 = vpop.eup %6041  ;;  %v4324_v54 = vadd.f32 0.5, %v4052_v33  ;;  %v4068_v15 = vmul.f32 0.5, %v6040_v44  ;;  %6057 = vtanh.f32 %v3557_v19  ;;  %v3573_v36 = vmul.f32 0.5, %v2766_v4  ;;  %v9414_v28 = vpop.f32.mrb[96].mxu1 }
 0x24f   :  { %v6044_v13 = vpop.eup %6043  ;;  %4594 = vst [vmem:[%s10191_s3 + $0x1e0] sm:$0xff] %v4322_v22  ;;  %v4338_v53 = vadd.f32 0.5, %v4066_v42  ;;  %v4067_v9 = vmul.f32 0.5, %v6042_v27  ;;  %6059 = vtanh.f32 %v3559_v49  ;;  %v3575_v46 = vmul.f32 0.5, %v2927_v50  ;;  %v9419_v6 = vpop.f32.mrb[97].mxu1 }
 0x250   :  { %v6046_v7 = vpop.eup %6045  ;;  %4596 = vst [vmem:[%s10191_s3 + $0x1f0] sm:$0xff] %v4324_v54  ;;  %v4340_v19 = vadd.f32 0.5, %v4068_v15  ;;  %v4069_v33 = vmul.f32 0.5, %v6044_v13  ;;  %6061 = vtanh.f32 %v3573_v36  ;;  %v2768_v4 = vadd.f32 %v9193_v14, %v8410_v25  ;;  %v9426_v44 = vpop.f32.mrb[98].mxu0 }
 0x251   :  { %v6048_v22 = vpop.eup %6047  ;;  %4610 = vst [vmem:[%s10191_s3 + $0x260] sm:$0xff] %v4338_v53  ;;  %v4339_v27 = vadd.f32 0.5, %v4067_v9  ;;  %v4083_v49 = vmul.f32 0.5, %v6046_v7  ;;  %6063 = vtanh.f32 %v3575_v46  ;;  %v2929_v42 = vadd.f32 %v9209_v48, %v8410_v25  ;;  %v9433_v54 = vpop.f32.mrb[99].mxu0 }
 0x252   :  { %4612 = vst [vmem:[%s10191_s3 + $0x270] sm:$0xff] %v4340_v19  ;;  %v4341_v14 = vadd.f32 0.5, %v4069_v33  ;;  %v4085_v50 = vmul.f32 0.5, %v6048_v22  ;;  %v3574_v15 = vmul.f32 0.5, %v2768_v4  ;;  %v2772_v36 = vadd.f32 %v9216_v56, %v8433_v60  ;;  %v9440_v13 = vpop.f32.mrb[98].mxu1 }
 0x253   :  { %4611 = vst [vmem:[%s10191_s3 + $0x268] sm:$0xff] %v4339_v27  ;;  %v4355_v53 = vadd.f32 0.5, %v4083_v49  ;;  %v3576_v48 = vmul.f32 0.5, %v2929_v42  ;;  %v2933_v9 = vadd.f32 %v9228_v20, %v8433_v60  ;;  %v2774_v46 = vadd.f32 %v9221_v32, %v8433_v60  ;;  %v9449_v7 = vpop.f32.mrb[99].mxu1 }
 0x254   :  { %v6050_v19 = vpop.eup %6049  ;;  %4613 = vst [vmem:[%s10191_s3 + $0x278] sm:$0xff] %v4341_v14  ;;  %v4357_v56 = vadd.f32 0.5, %v4085_v50  ;;  %6065 = vtanh.f32 %v3574_v15  ;;  %v3590_v33 = vmul.f32 0.5, %v2772_v36  ;;  %v2935_v4 = vadd.f32 %v9232_v61, %v8433_v60  ;;  %v9456_v22 = vpop.f32.mrb[100].mxu0 }
 0x255   :  { %v6052_v27 = vpop.eup %6051  ;;  %4627 = vst [vmem:[%s10191_s3 + $0x2e8] sm:$0xff] %v4355_v53  ;;  %v4084_v32 = vmul.f32 0.5, %v6050_v19  ;;  %6067 = vtanh.f32 %v3576_v48  ;;  %v3592_v20 = vmul.f32 0.5, %v2933_v9  ;;  %v3591_v49 = vmul.f32 0.5, %v2774_v46  ;;  %v9461_v42 = vpop.f32.mrb[101].mxu0 }
 0x256   :  { %v6054_v14 = vpop.eup %6053  ;;  %4629 = vst [vmem:[%s10191_s3 + $0x2f8] sm:$0xff] %v4357_v56  ;;  %v4086_v50 = vmul.f32 0.5, %v6052_v27  ;;  %6069 = vtanh.f32 %v3590_v33  ;;  %v3593_v61 = vmul.f32 0.5, %v2935_v4  ;;  %v2778_v15 = vadd.f32 %v9234_v35, %v8449_v47  ;;  %v9468_v36 = vpop.f32.mrb[100].mxu1 }
 0x257   :  { %v6056_v53 = vpop.eup %6055  ;;  %v4356_v19 = vadd.f32 0.5, %v4084_v32  ;;  %v4100_v48 = vmul.f32 0.5, %v6054_v14  ;;  %6071 = vtanh.f32 %v3592_v20  ;;  %v2939_v9 = vadd.f32 %v9246_v16, %v8449_v47  ;;  %v9472_v46 = vpop.f32.mrb[101].mxu1 }
 0x258   :  { %v6058_v60 = vpop.eup %6057  ;;  %v4358_v25 = vadd.f32 0.5, %v4086_v50  ;;  %v4102_v56 = vmul.f32 0.5, %v6056_v53  ;;  %6073 = vtanh.f32 %v3591_v49  ;;  %v3607_v33 = vmul.f32 0.5, %v2778_v15  ;;  %v9474_v4 = vpop.f32.mrb[102].mxu0 }
 0x259   :  { %v6060_v27 = vpop.eup %6059  ;;  %4628 = vst [vmem:[%s10191_s3 + $0x2f0] sm:$0xff] %v4356_v19  ;;  %v4372_v35 = vadd.f32 0.5, %v4100_v48  ;;  %v4101_v32 = vmul.f32 0.5, %v6058_v60  ;;  %6075 = vtanh.f32 %v3593_v61  ;;  %v3609_v20 = vmul.f32 0.5, %v2939_v9  ;;  %v9479_v14 = vpop.f32.mrb[103].mxu0 }
 0x25a   :  { %v6062_v16 = vpop.eup %6061  ;;  %4630 = vst [vmem:[%s10191_s3 + $0x300] sm:$0xff] %v4358_v25  ;;  %v4374_v49 = vadd.f32 0.5, %v4102_v56  ;;  %v4103_v50 = vmul.f32 0.5, %v6060_v27  ;;  %6077 = vtanh.f32 %v3607_v33  ;;  %v2780_v15 = vadd.f32 %v9239_v23, %v8449_v47  ;;  %v9486_v53 = vpop.f32.mrb[102].mxu1 }
 0x25b   :  { %v6064_v19 = vpop.eup %6063  ;;  %4644 = vst [vmem:[%s10191_s3 + $0x370] sm:$0xff] %v4372_v35  ;;  %v4373_v60 = vadd.f32 0.5, %v4101_v32  ;;  %v4117_v61 = vmul.f32 0.5, %v6062_v16  ;;  %6079 = vtanh.f32 %v3609_v20  ;;  %v2941_v48 = vadd.f32 %v9253_v52, %v8449_v47  ;;  %v9493_v25 = vpop.f32.mrb[103].mxu1 }
 0x25c   :  { %4646 = vst [vmem:[%s10191_s3 + $0x380] sm:$0xff] %v4374_v49  ;;  %v4375_v23 = vadd.f32 0.5, %v4103_v50  ;;  %v4119_v9 = vmul.f32 0.5, %v6064_v19  ;;  %v3608_v56 = vmul.f32 0.5, %v2780_v15  ;;  %v2784_v33 = vadd.f32 %v9260_v62, %v8478_v5  ;;  %v9500_v27 = vpop.f32.mrb[104].mxu0 }
 0x25d   :  { %4645 = vst [vmem:[%s10191_s3 + $0x378] sm:$0xff] %v4373_v60  ;;  %v4389_v35 = vadd.f32 0.5, %v4117_v61  ;;  %v3610_v52 = vmul.f32 0.5, %v2941_v48  ;;  %v2945_v32 = vadd.f32 %v9276_v21, %v8478_v5  ;;  %v2786_v20 = vadd.f32 %v9269_v30, %v8478_v5  ;;  %v9509_v16 = vpop.f32.mrb[105].mxu0 }
 0x25e   :  { %v6066_v49 = vpop.eup %6065  ;;  %4647 = vst [vmem:[%s10191_s3 + $0x388] sm:$0xff] %v4375_v23  ;;  %v4391_v62 = vadd.f32 0.5, %v4119_v9  ;;  %6081 = vtanh.f32 %v3608_v56  ;;  %v3624_v50 = vmul.f32 0.5, %v2784_v33  ;;  %v2947_v15 = vadd.f32 %v9281_v3, %v8478_v5  ;;  %v9516_v19 = vpop.f32.mrb[104].mxu1 }
 0x25f   :  { %v6068_v60 = vpop.eup %6067  ;;  %4661 = vst [vmem:[%s10191_s3 + $0x3f8] sm:$0xff] %v4389_v35  ;;  %v4118_v30 = vmul.f32 0.5, %v6066_v49  ;;  %6083 = vtanh.f32 %v3610_v52  ;;  %v3626_v21 = vmul.f32 0.5, %v2945_v32  ;;  %v3625_v61 = vmul.f32 0.5, %v2786_v20  ;;  %v9521_v48 = vpop.f32.mrb[105].mxu1 }
 0x260   :  { %v6070_v23 = vpop.eup %6069  ;;  %4663 = vst [vmem:[%s10191_s3 + $0x408] sm:$0xff] %v4391_v62  ;;  %v4120_v9 = vmul.f32 0.5, %v6068_v60  ;;  %6085 = vtanh.f32 %v3624_v50  ;;  %v3627_v3 = vmul.f32 0.5, %v2947_v15  ;;  %v2790_v56 = vadd.f32 %v9288_v26, %v8513_v39  ;;  %v9528_v33 = vpop.f32.mrb[106].mxu0 }
 0x261   :  { %v6072_v35 = vpop.eup %6071  ;;  %v4390_v49 = vadd.f32 0.5, %v4118_v30  ;;  %v4134_v52 = vmul.f32 0.5, %v6070_v23  ;;  %6087 = vtanh.f32 %v3626_v21  ;;  %v2951_v32 = vadd.f32 %v9294_v51, %v8513_v39  ;;  %v9532_v20 = vpop.f32.mrb[107].mxu0 }
 0x262   :  { %v6074_v5 = vpop.eup %6073  ;;  %v4392_v47 = vadd.f32 0.5, %v4120_v9  ;;  %v4136_v62 = vmul.f32 0.5, %v6072_v35  ;;  %6089 = vtanh.f32 %v3625_v61  ;;  %v3641_v50 = vmul.f32 0.5, %v2790_v56  ;;  %v9534_v15 = vpop.f32.mrb[106].mxu1 }
 0x263   :  { %v6076_v60 = vpop.eup %6075  ;;  %4662 = vst [vmem:[%s10191_s3 + $0x400] sm:$0xff] %v4390_v49  ;;  %v4406_v26 = vadd.f32 0.5, %v4134_v52  ;;  %v4135_v30 = vmul.f32 0.5, %v6074_v5  ;;  %6091 = vtanh.f32 %v3627_v3  ;;  %v3643_v21 = vmul.f32 0.5, %v2951_v32  ;;  %v9539_v23 = vpop.f32.mrb[107].mxu1 }
 0x264   :  { %v6078_v51 = vpop.eup %6077  ;;  %4664 = vst [vmem:[%s10191_s3 + $0x410] sm:$0xff] %v4392_v47  ;;  %v4408_v61 = vadd.f32 0.5, %v4136_v62  ;;  %v4137_v9 = vmul.f32 0.5, %v6076_v60  ;;  %6093 = vtanh.f32 %v3641_v50  ;;  %v2792_v56 = vadd.f32 %v9292_v57, %v8513_v39  ;;  %v9546_v35 = vpop.f32.mrb[108].mxu0 }
 0x265   :  { %v6080_v49 = vpop.eup %6079  ;;  %4678 = vst [vmem:[%s10191_s3 + $0x480] sm:$0xff] %v4406_v26  ;;  %v4407_v5 = vadd.f32 0.5, %v4135_v30  ;;  %v4151_v3 = vmul.f32 0.5, %v6078_v51  ;;  %6095 = vtanh.f32 %v3643_v21  ;;  %v2953_v52 = vadd.f32 %v9299_v41, %v8513_v39  ;;  %v9553_v47 = vpop.f32.mrb[109].mxu0 }
 0x266   :  { %4680 = vst [vmem:[%s10191_s3 + $0x490] sm:$0xff] %v4408_v61  ;;  %v4409_v57 = vadd.f32 0.5, %v4137_v9  ;;  %v4153_v32 = vmul.f32 0.5, %v6080_v49  ;;  %v3642_v62 = vmul.f32 0.5, %v2792_v56  ;;  %v2796_v50 = vadd.f32 %v9306_v12, %v8565_v11  ;;  %v9560_v60 = vpop.f32.mrb[108].mxu1 }
 0x267   :  { %4679 = vst [vmem:[%s10191_s3 + $0x488] sm:$0xff] %v4407_v5  ;;  %v4423_v26 = vadd.f32 0.5, %v4151_v3  ;;  %v3644_v41 = vmul.f32 0.5, %v2953_v52  ;;  %v2957_v30 = vadd.f32 %v9320_v38, %v8565_v11  ;;  %v2798_v21 = vadd.f32 %v9313_v63, %v8565_v11  ;;  %v9569_v51 = vpop.f32.mrb[109].mxu1 }
 0x268   :  { %v6082_v61 = vpop.eup %6081  ;;  %4681 = vst [vmem:[%s10191_s3 + $0x498] sm:$0xff] %v4409_v57  ;;  %v4425_v12 = vadd.f32 0.5, %v4153_v32  ;;  %6097 = vtanh.f32 %v3642_v62  ;;  %v3658_v9 = vmul.f32 0.5, %v2796_v50  ;;  %v2959_v56 = vadd.f32 %v9329_v1, %v8565_v11  ;;  %v9576_v49 = vpop.f32.mrb[110].mxu0 }
 0x269   :  { %v6084_v5 = vpop.eup %6083  ;;  %4695 = vst [vmem:[%s10191_s3 + $0x508] sm:$0xff] %v4423_v26  ;;  %v4152_v63 = vmul.f32 0.5, %v6082_v61  ;;  %6099 = vtanh.f32 %v3644_v41  ;;  %v3660_v38 = vmul.f32 0.5, %v2957_v30  ;;  %v3659_v3 = vmul.f32 0.5, %v2798_v21  ;;  %v9581_v52 = vpop.f32.mrb[111].mxu0 }
 0x26a   :  { %v6086_v57 = vpop.eup %6085  ;;  %4697 = vst [vmem:[%s10191_s3 + $0x518] sm:$0xff] %v4425_v12  ;;  %v4154_v32 = vmul.f32 0.5, %v6084_v5  ;;  %6101 = vtanh.f32 %v3658_v9  ;;  %v3661_v1 = vmul.f32 0.5, %v2959_v56  ;;  %v2802_v62 = vadd.f32 %v9336_v43, %v8615_v58  ;;  %v9588_v50 = vpop.f32.mrb[110].mxu1 }
 0x26b   :  { %v6088_v26 = vpop.eup %6087  ;;  %v4424_v61 = vadd.f32 0.5, %v4152_v63  ;;  %v4168_v41 = vmul.f32 0.5, %v6086_v57  ;;  %6103 = vtanh.f32 %v3660_v38  ;;  %v2963_v30 = vadd.f32 %v9348_v55, %v8615_v58  ;;  %v9592_v21 = vpop.f32.mrb[111].mxu1 }
 0x26c   :  { %v6090_v11 = vpop.eup %6089  ;;  %v4426_v39 = vadd.f32 0.5, %v4154_v32  ;;  %v4170_v12 = vmul.f32 0.5, %v6088_v26  ;;  %6105 = vtanh.f32 %v3659_v3  ;;  %v3675_v9 = vmul.f32 0.5, %v2802_v62  ;;  %v9594_v56 = vpop.f32.mrb[112].mxu0 }
 0x26d   :  { %v6092_v5 = vpop.eup %6091  ;;  %4696 = vst [vmem:[%s10191_s3 + $0x510] sm:$0xff] %v4424_v61  ;;  %v4440_v43 = vadd.f32 0.5, %v4168_v41  ;;  %v4169_v63 = vmul.f32 0.5, %v6090_v11  ;;  %6107 = vtanh.f32 %v3661_v1  ;;  %v3677_v38 = vmul.f32 0.5, %v2963_v30  ;;  %v9599_v57 = vpop.f32.mrb[113].mxu0 }
 0x26e   :  { %v6094_v55 = vpop.eup %6093  ;;  %4698 = vst [vmem:[%s10191_s3 + $0x520] sm:$0xff] %v4426_v39  ;;  %v4442_v3 = vadd.f32 0.5, %v4170_v12  ;;  %v4171_v32 = vmul.f32 0.5, %v6092_v5  ;;  %6109 = vtanh.f32 %v3675_v9  ;;  %v2804_v62 = vadd.f32 %v9341_v34, %v8615_v58  ;;  %v9606_v26 = vpop.f32.mrb[112].mxu1 }
 0x26f   :  { %v6096_v61 = vpop.eup %6095  ;;  %4712 = vst [vmem:[%s10191_s3 + $0x590] sm:$0xff] %v4440_v43  ;;  %v4441_v11 = vadd.f32 0.5, %v4169_v63  ;;  %v4185_v1 = vmul.f32 0.5, %v6094_v55  ;;  %6111 = vtanh.f32 %v3677_v38  ;;  %v2965_v41 = vadd.f32 %v9352_v0, %v8615_v58  ;;  %v9613_v39 = vpop.f32.mrb[113].mxu1 }
 0x270   :  { %4714 = vst [vmem:[%s10191_s3 + $0x5a0] sm:$0xff] %v4442_v3  ;;  %v4443_v34 = vadd.f32 0.5, %v4171_v32  ;;  %v4187_v30 = vmul.f32 0.5, %v6096_v61  ;;  %v3676_v12 = vmul.f32 0.5, %v2804_v62  ;;  %v2808_v9 = vadd.f32 %v9354_v2, %v8624_v17  ;;  %v9620_v5 = vpop.f32.mrb[114].mxu0 }
 0x271   :  { %4713 = vst [vmem:[%s10191_s3 + $0x598] sm:$0xff] %v4441_v11  ;;  %v4457_v43 = vadd.f32 0.5, %v4185_v1  ;;  %v3678_v0 = vmul.f32 0.5, %v2965_v41  ;;  %v2969_v63 = vadd.f32 %v9366_v29, %v8624_v17  ;;  %v2810_v38 = vadd.f32 %v9359_v40, %v8624_v17  ;;  %v9629_v55 = vpop.f32.mrb[115].mxu0 }
 0x272   :  { %v6098_v3 = vpop.eup %6097  ;;  %4715 = vst [vmem:[%s10191_s3 + $0x5a8] sm:$0xff] %v4443_v34  ;;  %v4459_v2 = vadd.f32 0.5, %v4187_v30  ;;  %6113 = vtanh.f32 %v3676_v12  ;;  %v3692_v32 = vmul.f32 0.5, %v2808_v9  ;;  %v2971_v62 = vadd.f32 %v9373_v31, %v8624_v17  ;;  %v9636_v61 = vpop.f32.mrb[114].mxu1 }
 0x273   :  { %v6100_v11 = vpop.eup %6099  ;;  %4729 = vst [vmem:[%s10191_s3 + $0x618] sm:$0xff] %v4457_v43  ;;  %v4186_v40 = vmul.f32 0.5, %v6098_v3  ;;  %6115 = vtanh.f32 %v3678_v0  ;;  %v3694_v29 = vmul.f32 0.5, %v2969_v63  ;;  %v3693_v1 = vmul.f32 0.5, %v2810_v38  ;;  %v9641_v41 = vpop.f32.mrb[115].mxu1 }
 0x274   :  { %v6102_v34 = vpop.eup %6101  ;;  %4731 = vst [vmem:[%s10191_s3 + $0x628] sm:$0xff] %v4459_v2  ;;  %v4188_v30 = vmul.f32 0.5, %v6100_v11  ;;  %6117 = vtanh.f32 %v3692_v32  ;;  %v3695_v31 = vmul.f32 0.5, %v2971_v62  ;;  %v2814_v12 = vadd.f32 %v9380_v24, %v8660_v18  ;;  %v9648_v9 = vpop.f32.mrb[116].mxu0 }
 0x275   :  { %v6104_v43 = vpop.eup %6103  ;;  %v4458_v3 = vadd.f32 0.5, %v4186_v40  ;;  %v4202_v0 = vmul.f32 0.5, %v6102_v34  ;;  %6119 = vtanh.f32 %v3694_v29  ;;  %v2975_v63 = vadd.f32 %v9396_v10, %v8660_v18  ;;  %v9652_v38 = vpop.f32.mrb[117].mxu0 }
 0x276   :  { %v6106_v17 = vpop.eup %6105  ;;  %v4460_v58 = vadd.f32 0.5, %v4188_v30  ;;  %v4204_v2 = vmul.f32 0.5, %v6104_v43  ;;  %6121 = vtanh.f32 %v3693_v1  ;;  %v3709_v32 = vmul.f32 0.5, %v2814_v12  ;;  %v9654_v62 = vpop.f32.mrb[116].mxu1 }
 0x277   :  { %v6108_v11 = vpop.eup %6107  ;;  %4730 = vst [vmem:[%s10191_s3 + $0x620] sm:$0xff] %v4458_v3  ;;  %v4474_v24 = vadd.f32 0.5, %v4202_v0  ;;  %v4203_v40 = vmul.f32 0.5, %v6106_v17  ;;  %6123 = vtanh.f32 %v3695_v31  ;;  %v3711_v29 = vmul.f32 0.5, %v2975_v63  ;;  %v9659_v34 = vpop.f32.mrb[117].mxu1 }
 0x278   :  { %v6110_v10 = vpop.eup %6109  ;;  %4732 = vst [vmem:[%s10191_s3 + $0x630] sm:$0xff] %v4460_v58  ;;  %v4476_v1 = vadd.f32 0.5, %v4204_v2  ;;  %v4205_v30 = vmul.f32 0.5, %v6108_v11  ;;  %6125 = vtanh.f32 %v3709_v32  ;;  %v2816_v12 = vadd.f32 %v9389_v37, %v8660_v18  ;;  %v9666_v43 = vpop.f32.mrb[118].mxu0  ;;  %v10325_v32 = vld [vmem:[#allocation3_spill] sm:$0xff] }
 0x279   :  { %10324 = vst [vmem:[#allocation19_spill] sm:$0xff] %v9666_v43  ;;  %v6112_v3 = vpop.eup %6111  ;;  %4746 = vst [vmem:[%s10191_s3 + $0x6a0] sm:$0xff] %v4474_v24  ;;  %v4475_v17 = vadd.f32 0.5, %v4203_v40  ;;  %v4219_v31 = vmul.f32 0.5, %v6110_v10  ;;  %6127 = vtanh.f32 %v3711_v29  ;;  %v2977_v0 = vadd.f32 %v9401_v8, %v8660_v18  ;;  %v9673_v58 = vpop.f32.mrb[119].mxu0 }
 0x27a   :  { %4748 = vst [vmem:[%s10191_s3 + $0x6b0] sm:$0xff] %v4476_v1  ;;  %v4477_v37 = vadd.f32 0.5, %v4205_v30  ;;  %v4221_v63 = vmul.f32 0.5, %v6112_v3  ;;  %v3710_v2 = vmul.f32 0.5, %v2816_v12  ;;  %v3046_v11 = vadd.f32 %v9408_v45, %v10325_v32  ;;  %v9680_v43 = vpop.f32.mrb[118].mxu1 }
 0x27b   :  { %4747 = vst [vmem:[%s10191_s3 + $0x6a8] sm:$0xff] %v4475_v17  ;;  %v4491_v24 = vadd.f32 0.5, %v4219_v31  ;;  %v3712_v8 = vmul.f32 0.5, %v2977_v0  ;;  %v3207_v40 = vadd.f32 %v9414_v28, %v10325_v32  ;;  %v3048_v29 = vadd.f32 %v9412_v59, %v10325_v32  ;;  %v9689_v10 = vpop.f32.mrb[119].mxu1 }
 0x27c   :  { %v6114_v1 = vpop.eup %6113  ;;  %4749 = vst [vmem:[%s10191_s3 + $0x6b8] sm:$0xff] %v4477_v37  ;;  %v4493_v45 = vadd.f32 0.5, %v4221_v63  ;;  %6129 = vtanh.f32 %v3710_v2  ;;  %v3458_v30 = vmul.f32 0.5, %v3046_v11  ;;  %v3209_v12 = vadd.f32 %v9419_v6, %v10325_v32  ;;  %v9696_v3 = vpop.f32.mrb[120].mxu0  ;;  %v10327_v2 = vld [vmem:[#allocation4_spill] sm:$0xff] }
 0x27d   :  { %v6116_v17 = vpop.eup %6115  ;;  %4763 = vst [vmem:[%s10191_s3 + $0x728] sm:$0xff] %v4491_v24  ;;  %v4220_v59 = vmul.f32 0.5, %v6114_v1  ;;  %6131 = vtanh.f32 %v3712_v8  ;;  %v3460_v28 = vmul.f32 0.5, %v3207_v40  ;;  %v3459_v31 = vmul.f32 0.5, %v3048_v29  ;;  %v9701_v0 = vpop.f32.mrb[121].mxu0 }
 0x27e   :  { %10326 = vst [vmem:[#allocation20_spill] sm:$0xff] %v9701_v0  ;;  %v6118_v37 = vpop.eup %6117  ;;  %4765 = vst [vmem:[%s10191_s3 + $0x738] sm:$0xff] %v4493_v45  ;;  %v4222_v63 = vmul.f32 0.5, %v6116_v17  ;;  %6133 = vtanh.f32 %v3458_v30  ;;  %v3461_v6 = vmul.f32 0.5, %v3209_v12  ;;  %v3052_v11 = vadd.f32 %v9426_v44, %v10327_v2  ;;  %v9708_v32 = vpop.f32.mrb[120].mxu1 }
 0x27f   :  { %v6120_v24 = vpop.eup %6119  ;;  %v4492_v1 = vadd.f32 0.5, %v4220_v59  ;;  %v4236_v8 = vmul.f32 0.5, %v6118_v37  ;;  %6135 = vtanh.f32 %v3460_v28  ;;  %v3213_v40 = vadd.f32 %v9440_v13, %v10327_v2  ;;  %v9712_v29 = vpop.f32.mrb[121].mxu1 }
 0x280   :  { %v6122_v18 = vpop.eup %6121  ;;  %v4494_v0 = vadd.f32 0.5, %v4222_v63  ;;  %v4238_v45 = vmul.f32 0.5, %v6120_v24  ;;  %6137 = vtanh.f32 %v3459_v31  ;;  %v3475_v30 = vmul.f32 0.5, %v3052_v11  ;;  %v9714_v12 = vpop.f32.mrb[122].mxu0 }
 0x281   :  { %v6124_v17 = vpop.eup %6123  ;;  %4764 = vst [vmem:[%s10191_s3 + $0x730] sm:$0xff] %v4492_v1  ;;  %v4508_v44 = vadd.f32 0.5, %v4236_v8  ;;  %v4237_v59 = vmul.f32 0.5, %v6122_v18  ;;  %6139 = vtanh.f32 %v3461_v6  ;;  %v3477_v28 = vmul.f32 0.5, %v3213_v40  ;;  %v9719_v37 = vpop.f32.mrb[123].mxu0 }
 0x282   :  { %v6126_v13 = vpop.eup %6125  ;;  %4766 = vst [vmem:[%s10191_s3 + $0x740] sm:$0xff] %v4494_v0  ;;  %v4510_v31 = vadd.f32 0.5, %v4238_v45  ;;  %v4239_v63 = vmul.f32 0.5, %v6124_v17  ;;  %6141 = vtanh.f32 %v3475_v30  ;;  %v3054_v11 = vadd.f32 %v9433_v54, %v10327_v2  ;;  %v9726_v24 = vpop.f32.mrb[122].mxu1  ;;  %v10329_v30 = vld [vmem:[#allocation5_spill] sm:$0xff] }
 0x283   :  { %10328 = vst [vmem:[#allocation21_spill] sm:$0xff] %v9726_v24  ;;  %v6128_v1 = vpop.eup %6127  ;;  %4780 = vst [vmem:[%s10191_s3 + $0x7b0] sm:$0xff] %v4508_v44  ;;  %v4509_v18 = vadd.f32 0.5, %v4237_v59  ;;  %v4253_v6 = vmul.f32 0.5, %v6126_v13  ;;  %6143 = vtanh.f32 %v3477_v28  ;;  %v3215_v8 = vadd.f32 %v9449_v7, %v10327_v2  ;;  %v9733_v0 = vpop.f32.mrb[123].mxu1 }
 0x284   :  { %4782 = vst [vmem:[%s10191_s3 + $0x7c0] sm:$0xff] %v4510_v31  ;;  %v4511_v54 = vadd.f32 0.5, %v4239_v63  ;;  %v4255_v40 = vmul.f32 0.5, %v6128_v1  ;;  %v3476_v45 = vmul.f32 0.5, %v3054_v11  ;;  %v3058_v17 = vadd.f32 %v9456_v22, %v10329_v30  ;;  %v9740_v24 = vpop.f32.mrb[124].mxu0 }
 0x285   :  { %4781 = vst [vmem:[%s10191_s3 + $0x7b8] sm:$0xff] %v4509_v18  ;;  %v4525_v44 = vadd.f32 0.5, %v4253_v6  ;;  %v3478_v7 = vmul.f32 0.5, %v3215_v8  ;;  %v3219_v59 = vadd.f32 %v9468_v36, %v10329_v30  ;;  %v3060_v28 = vadd.f32 %v9461_v42, %v10329_v30  ;;  %v9749_v13 = vpop.f32.mrb[125].mxu0 }
 0x286   :  { %v6130_v31 = vpop.eup %6129  ;;  %4783 = vst [vmem:[%s10191_s3 + $0x7c8] sm:$0xff] %v4511_v54  ;;  %v4527_v22 = vadd.f32 0.5, %v4255_v40  ;;  %6145 = vtanh.f32 %v3476_v45  ;;  %v3492_v63 = vmul.f32 0.5, %v3058_v17  ;;  %v3221_v11 = vadd.f32 %v9472_v46, %v10329_v30  ;;  %v9756_v1 = vpop.f32.mrb[124].mxu1  ;;  %v10331_v45 = vld [vmem:[#allocation6_spill] sm:$0xff] }
 0x287   :  { %v6132_v18 = vpop.eup %6131  ;;  %4797 = vst [vmem:[%s10191_s3 + $0x838] sm:$0xff] %v4525_v44  ;;  %v4254_v42 = vmul.f32 0.5, %v6130_v31  ;;  %6147 = vtanh.f32 %v3478_v7  ;;  %v3494_v36 = vmul.f32 0.5, %v3219_v59  ;;  %v3493_v6 = vmul.f32 0.5, %v3060_v28  ;;  %v9761_v8 = vpop.f32.mrb[125].mxu1 }
 0x288   :  { %10330 = vst [vmem:[#allocation22_spill] sm:$0xff] %v9761_v8  ;;  %v6134_v54 = vpop.eup %6133  ;;  %4799 = vst [vmem:[%s10191_s3 + $0x848] sm:$0xff] %v4527_v22  ;;  %v4256_v40 = vmul.f32 0.5, %v6132_v18  ;;  %6149 = vtanh.f32 %v3492_v63  ;;  %v3495_v46 = vmul.f32 0.5, %v3221_v11  ;;  %v3064_v17 = vadd.f32 %v9474_v4, %v10331_v45  ;;  %v9768_v30 = vpop.f32.mrb[126].mxu0 }
 0x289   :  { %v6136_v44 = vpop.eup %6135  ;;  %v4526_v31 = vadd.f32 0.5, %v4254_v42  ;;  %v4002_v7 = vmul.f32 0.5, %v6134_v54  ;;  %6151 = vtanh.f32 %v3494_v36  ;;  %v3225_v59 = vadd.f32 %v9486_v53, %v10331_v45  ;;  %v9772_v28 = vpop.f32.mrb[127].mxu0 }
 0x28a   :  { %v6138_v2 = vpop.eup %6137  ;;  %v4528_v8 = vadd.f32 0.5, %v4256_v40  ;;  %v4004_v22 = vmul.f32 0.5, %v6136_v44  ;;  %6153 = vtanh.f32 %v3493_v6  ;;  %v3509_v63 = vmul.f32 0.5, %v3064_v17  ;;  %v9774_v11 = vpop.f32.mrb[126].mxu1 }
 0x28b   :  { %v6140_v18 = vpop.eup %6139  ;;  %4798 = vst [vmem:[%s10191_s3 + $0x840] sm:$0xff] %v4526_v31  ;;  %v4274_v4 = vadd.f32 0.5, %v4002_v7  ;;  %v4003_v42 = vmul.f32 0.5, %v6138_v2  ;;  %6155 = vtanh.f32 %v3495_v46  ;;  %v3511_v36 = vmul.f32 0.5, %v3225_v59  ;;  %v9779_v54 = vpop.f32.mrb[127].mxu1 }
 0x28c   :  { %v6142_v53 = vpop.eup %6141  ;;  %4800 = vst [vmem:[%s10191_s3 + $0x850] sm:$0xff] %v4528_v8  ;;  %v4276_v6 = vadd.f32 0.5, %v4004_v22  ;;  %v4005_v40 = vmul.f32 0.5, %v6140_v18  ;;  %6157 = vtanh.f32 %v3509_v63  ;;  %v3066_v17 = vadd.f32 %v9479_v14, %v10331_v45  ;;  %v9786_v44 = vpop.f32.mrb[128].mxu0  ;;  %v10333_v63 = vld [vmem:[#allocation7_spill] sm:$0xff] }
 0x28d   :  { %10332 = vst [vmem:[#allocation6_spill] sm:$0xff] %v9786_v44  ;;  %v6144_v31 = vpop.eup %6143  ;;  %4546 = vst [vmem:[%s10191_s3 + $0x60] sm:$0xff] %v4274_v4  ;;  %v4275_v2 = vadd.f32 0.5, %v4003_v42  ;;  %v4019_v46 = vmul.f32 0.5, %v6142_v53  ;;  %6159 = vtanh.f32 %v3511_v36  ;;  %v3227_v7 = vadd.f32 %v9493_v25, %v10331_v45  ;;  %v9793_v8 = vpop.f32.mrb[129].mxu0 }
 0x28e   :  { %4548 = vst [vmem:[%s10191_s3 + $0x70] sm:$0xff] %v4276_v6  ;;  %v4277_v14 = vadd.f32 0.5, %v4005_v40  ;;  %v4021_v59 = vmul.f32 0.5, %v6144_v31  ;;  %v3510_v22 = vmul.f32 0.5, %v3066_v17  ;;  %v3070_v18 = vadd.f32 %v9500_v27, %v10333_v63  ;;  %v9800_v44 = vpop.f32.mrb[128].mxu1 }
 0x28f   :  { %4547 = vst [vmem:[%s10191_s3 + $0x68] sm:$0xff] %v4275_v2  ;;  %v4291_v4 = vadd.f32 0.5, %v4019_v46  ;;  %v3512_v25 = vmul.f32 0.5, %v3227_v7  ;;  %v3231_v42 = vadd.f32 %v9516_v19, %v10333_v63  ;;  %v3072_v36 = vadd.f32 %v9509_v16, %v10333_v63  ;;  %v9809_v53 = vpop.f32.mrb[129].mxu1 }
 0x290   :  { %v6146_v6 = vpop.eup %6145  ;;  %4549 = vst [vmem:[%s10191_s3 + $0x78] sm:$0xff] %v4277_v14  ;;  %v4293_v27 = vadd.f32 0.5, %v4021_v59  ;;  %6161 = vtanh.f32 %v3510_v22  ;;  %v3526_v40 = vmul.f32 0.5, %v3070_v18  ;;  %v3233_v17 = vadd.f32 %v9521_v48, %v10333_v63  ;;  %v9816_v31 = vpop.f32.mrb[130].mxu0  ;;  %v10336_v22 = vld [vmem:[#allocation8_spill] sm:$0xff] }
 0x291   :  { %10334 = vst [vmem:[#allocation23_spill] sm:$0xff] %v9816_v31  ;;  %v6148_v2 = vpop.eup %6147  ;;  %4563 = vst [vmem:[%s10191_s3 + $0xe8] sm:$0xff] %v4291_v4  ;;  %v4020_v16 = vmul.f32 0.5, %v6146_v6  ;;  %6163 = vtanh.f32 %v3512_v25  ;;  %v3528_v19 = vmul.f32 0.5, %v3231_v42  ;;  %v3527_v46 = vmul.f32 0.5, %v3072_v36  ;;  %v9821_v7 = vpop.f32.mrb[131].mxu0 }
 0x292   :  { %10335 = vst [vmem:[#allocation24_spill] sm:$0xff] %v9821_v7  ;;  %v6150_v14 = vpop.eup %6149  ;;  %4565 = vst [vmem:[%s10191_s3 + $0xf8] sm:$0xff] %v4293_v27  ;;  %v4022_v59 = vmul.f32 0.5, %v6148_v2  ;;  %6165 = vtanh.f32 %v3526_v40  ;;  %v3529_v48 = vmul.f32 0.5, %v3233_v17  ;;  %v3076_v18 = vadd.f32 %v9528_v33, %v10336_v22  ;;  %v9828_v63 = vpop.f32.mrb[130].mxu1 }
 0x293   :  { %v6152_v4 = vpop.eup %6151  ;;  %v4292_v6 = vadd.f32 0.5, %v4020_v16  ;;  %v4036_v25 = vmul.f32 0.5, %v6150_v14  ;;  %6167 = vtanh.f32 %v3528_v19  ;;  %v3237_v42 = vadd.f32 %v9534_v15, %v10336_v22  ;;  %v9832_v36 = vpop.f32.mrb[131].mxu1 }
 0x294   :  { %v6154_v7 = vpop.eup %6153  ;;  %v4294_v31 = vadd.f32 0.5, %v4022_v59  ;;  %v4038_v27 = vmul.f32 0.5, %v6152_v4  ;;  %6169 = vtanh.f32 %v3527_v46  ;;  %v3543_v40 = vmul.f32 0.5, %v3076_v18  ;;  %v9834_v17 = vpop.f32.mrb[132].mxu0 }
 0x295   :  { %v6156_v2 = vpop.eup %6155  ;;  %4564 = vst [vmem:[%s10191_s3 + $0xf0] sm:$0xff] %v4292_v6  ;;  %v4308_v33 = vadd.f32 0.5, %v4036_v25  ;;  %v4037_v16 = vmul.f32 0.5, %v6154_v7  ;;  %6171 = vtanh.f32 %v3529_v48  ;;  %v3545_v19 = vmul.f32 0.5, %v3237_v42  ;;  %v9839_v14 = vpop.f32.mrb[133].mxu0 }
 0x296   :  { %v6158_v15 = vpop.eup %6157  ;;  %4566 = vst [vmem:[%s10191_s3 + $0x100] sm:$0xff] %v4294_v31  ;;  %v4310_v46 = vadd.f32 0.5, %v4038_v27  ;;  %v4039_v59 = vmul.f32 0.5, %v6156_v2  ;;  %6173 = vtanh.f32 %v3543_v40  ;;  %v3078_v18 = vadd.f32 %v9532_v20, %v10336_v22  ;;  %v9846_v4 = vpop.f32.mrb[132].mxu1  ;;  %v10338_v40 = vld [vmem:[#allocation9_spill] sm:$0xff] }
 0x297   :  { %10337 = vst [vmem:[#allocation8_spill] sm:$0xff] %v9846_v4  ;;  %v6160_v6 = vpop.eup %6159  ;;  %4580 = vst [vmem:[%s10191_s3 + $0x170] sm:$0xff] %v4308_v33  ;;  %v4309_v7 = vadd.f32 0.5, %v4037_v16  ;;  %v4053_v48 = vmul.f32 0.5, %v6158_v15  ;;  %6175 = vtanh.f32 %v3545_v19  ;;  %v3239_v25 = vadd.f32 %v9539_v23, %v10336_v22  ;;  %v9853_v31 = vpop.f32.mrb[133].mxu1 }
 0x298   :  { %4582 = vst [vmem:[%s10191_s3 + $0x180] sm:$0xff] %v4310_v46  ;;  %v4311_v20 = vadd.f32 0.5, %v4039_v59  ;;  %v4055_v42 = vmul.f32 0.5, %v6160_v6  ;;  %v3544_v27 = vmul.f32 0.5, %v3078_v18  ;;  %v3082_v2 = vadd.f32 %v9546_v35, %v10338_v40  ;;  %v9860_v4 = vpop.f32.mrb[134].mxu0 }
 0x299   :  { %4581 = vst [vmem:[%s10191_s3 + $0x178] sm:$0xff] %v4309_v7  ;;  %v4325_v33 = vadd.f32 0.5, %v4053_v48  ;;  %v3546_v23 = vmul.f32 0.5, %v3239_v25  ;;  %v3243_v16 = vadd.f32 %v9560_v60, %v10338_v40  ;;  %v3084_v19 = vadd.f32 %v9553_v47, %v10338_v40  ;;  %v9869_v15 = vpop.f32.mrb[135].mxu0 }
 0x29a   :  { %10339 = vst [vmem:[#allocation25_spill] sm:$0xff] %v9869_v15  ;;  %v6162_v46 = vpop.eup %6161  ;;  %4583 = vst [vmem:[%s10191_s3 + $0x188] sm:$0xff] %v4311_v20  ;;  %v4327_v35 = vadd.f32 0.5, %v4055_v42  ;;  %6177 = vtanh.f32 %v3544_v27  ;;  %v3560_v59 = vmul.f32 0.5, %v3082_v2  ;;  %v3245_v18 = vadd.f32 %v9569_v51, %v10338_v40  ;;  %v9876_v6 = vpop.f32.mrb[134].mxu1  ;;  %v10342_v27 = vld [vmem:[#allocation10_spill] sm:$0xff] }
 0x29b   :  { %10340 = vst [vmem:[#allocation26_spill] sm:$0xff] %v9876_v6  ;;  %v6164_v7 = vpop.eup %6163  ;;  %4597 = vst [vmem:[%s10191_s3 + $0x1f8] sm:$0xff] %v4325_v33  ;;  %v4054_v47 = vmul.f32 0.5, %v6162_v46  ;;  %6179 = vtanh.f32 %v3546_v23  ;;  %v3562_v60 = vmul.f32 0.5, %v3243_v16  ;;  %v3561_v48 = vmul.f32 0.5, %v3084_v19  ;;  %v9881_v25 = vpop.f32.mrb[135].mxu1 }
 0x29c   :  { %10341 = vst [vmem:[#allocation27_spill] sm:$0xff] %v9881_v25  ;;  %v6166_v20 = vpop.eup %6165  ;;  %4599 = vst [vmem:[%s10191_s3 + $0x208] sm:$0xff] %v4327_v35  ;;  %v4056_v42 = vmul.f32 0.5, %v6164_v7  ;;  %6181 = vtanh.f32 %v3560_v59  ;;  %v3563_v51 = vmul.f32 0.5, %v3245_v18  ;;  %v3088_v2 = vadd.f32 %v9576_v49, %v10342_v27 }
 0x29d   :  { %v6168_v6 = vpop.eup %6167  ;;  %v4326_v15 = vadd.f32 0.5, %v4054_v47  ;;  %v4070_v33 = vmul.f32 0.5, %v6166_v20  ;;  %6183 = vtanh.f32 %v3562_v60  ;;  %v3249_v23 = vadd.f32 %v9588_v50, %v10342_v27 }
 0x29e   :  { %v6170_v16 = vpop.eup %6169  ;;  %v4328_v19 = vadd.f32 0.5, %v4056_v42  ;;  %v4072_v46 = vmul.f32 0.5, %v6168_v6  ;;  %6185 = vtanh.f32 %v3561_v48  ;;  %v3577_v25 = vmul.f32 0.5, %v3088_v2  ;;  %v10343_v42 = vld [vmem:[#allocation11_spill] sm:$0xff] }
 0x29f   :  { %v6172_v40 = vpop.eup %6171  ;;  %4598 = vst [vmem:[%s10191_s3 + $0x200] sm:$0xff] %v4326_v15  ;;  %v4342_v35 = vadd.f32 0.5, %v4070_v33  ;;  %v4071_v59 = vmul.f32 0.5, %v6170_v16  ;;  %6187 = vtanh.f32 %v3563_v51  ;;  %v3579_v49 = vmul.f32 0.5, %v3249_v23 }
 0x2a0   :  { %v6174_v18 = vpop.eup %6173  ;;  %4600 = vst [vmem:[%s10191_s3 + $0x210] sm:$0xff] %v4328_v19  ;;  %v4344_v50 = vadd.f32 0.5, %v4072_v46  ;;  %v4073_v7 = vmul.f32 0.5, %v6172_v40  ;;  %6189 = vtanh.f32 %v3577_v25  ;;  %v3090_v6 = vadd.f32 %v9581_v52, %v10342_v27 }
 0x2a1   :  { %v6176_v47 = vpop.eup %6175  ;;  %4614 = vst [vmem:[%s10191_s3 + $0x280] sm:$0xff] %v4342_v35  ;;  %v4343_v15 = vadd.f32 0.5, %v4071_v59  ;;  %v4087_v60 = vmul.f32 0.5, %v6174_v18  ;;  %6191 = vtanh.f32 %v3579_v49  ;;  %v3251_v48 = vadd.f32 %v9592_v21, %v10342_v27 }
 0x2a2   :  { %4616 = vst [vmem:[%s10191_s3 + $0x290] sm:$0xff] %v4344_v50  ;;  %v4345_v40 = vadd.f32 0.5, %v4073_v7  ;;  %v4089_v25 = vmul.f32 0.5, %v6176_v47  ;;  %v3578_v20 = vmul.f32 0.5, %v3090_v6  ;;  %v3094_v52 = vadd.f32 %v9594_v56, %v10343_v42  ;;  %v10344_v50 = vld [vmem:[#allocation12_spill] sm:$0xff] }
 0x2a3   :  { %4615 = vst [vmem:[%s10191_s3 + $0x288] sm:$0xff] %v4343_v15  ;;  %v4359_v51 = vadd.f32 0.5, %v4087_v60  ;;  %v3580_v2 = vmul.f32 0.5, %v3251_v48  ;;  %v3255_v33 = vadd.f32 %v9606_v26, %v10343_v42  ;;  %v3096_v21 = vadd.f32 %v9599_v57, %v10343_v42 }
 0x2a4   :  { %v6178_v23 = vpop.eup %6177  ;;  %4617 = vst [vmem:[%s10191_s3 + $0x298] sm:$0xff] %v4345_v40  ;;  %v4361_v16 = vadd.f32 0.5, %v4089_v25  ;;  %6193 = vtanh.f32 %v3578_v20  ;;  %v3594_v56 = vmul.f32 0.5, %v3094_v52  ;;  %v3257_v19 = vadd.f32 %v9613_v39, %v10343_v42 }
 0x2a5   :  { %v6180_v46 = vpop.eup %6179  ;;  %4631 = vst [vmem:[%s10191_s3 + $0x308] sm:$0xff] %v4359_v51  ;;  %v4088_v26 = vmul.f32 0.5, %v6178_v23  ;;  %6195 = vtanh.f32 %v3580_v2  ;;  %v3596_v35 = vmul.f32 0.5, %v3255_v33  ;;  %v3595_v57 = vmul.f32 0.5, %v3096_v21 }
 0x2a6   :  { %v6182_v59 = vpop.eup %6181  ;;  %4633 = vst [vmem:[%s10191_s3 + $0x318] sm:$0xff] %v4361_v16  ;;  %v4090_v49 = vmul.f32 0.5, %v6180_v46  ;;  %6197 = vtanh.f32 %v3594_v56  ;;  %v3597_v18 = vmul.f32 0.5, %v3257_v19  ;;  %v3100_v39 = vadd.f32 %v9620_v5, %v10344_v50 }
 0x2a7   :  { %v6184_v7 = vpop.eup %6183  ;;  %v4360_v6 = vadd.f32 0.5, %v4088_v26  ;;  %v4104_v47 = vmul.f32 0.5, %v6182_v59  ;;  %6199 = vtanh.f32 %v3596_v35  ;;  %v3261_v15 = vadd.f32 %v9636_v61, %v10344_v50 }
 0x2a8   :  { %v6186_v60 = vpop.eup %6185  ;;  %v4362_v48 = vadd.f32 0.5, %v4090_v49  ;;  %v4106_v40 = vmul.f32 0.5, %v6184_v7  ;;  %6201 = vtanh.f32 %v3595_v57  ;;  %v3611_v25 = vmul.f32 0.5, %v3100_v39  ;;  %v10345_v57 = vld [vmem:[#allocation13_spill] sm:$0xff] }
 0x2a9   :  { %v6188_v20 = vpop.eup %6187  ;;  %4632 = vst [vmem:[%s10191_s3 + $0x310] sm:$0xff] %v4360_v6  ;;  %v4376_v52 = vadd.f32 0.5, %v4104_v47  ;;  %v4105_v51 = vmul.f32 0.5, %v6186_v60  ;;  %6203 = vtanh.f32 %v3597_v18  ;;  %v3613_v5 = vmul.f32 0.5, %v3261_v15 }
 0x2aa   :  { %v6190_v2 = vpop.eup %6189  ;;  %4634 = vst [vmem:[%s10191_s3 + $0x320] sm:$0xff] %v4362_v48  ;;  %v4378_v61 = vadd.f32 0.5, %v4106_v40  ;;  %v4107_v33 = vmul.f32 0.5, %v6188_v20  ;;  %6205 = vtanh.f32 %v3611_v25  ;;  %v3102_v21 = vadd.f32 %v9629_v55, %v10344_v50  ;;  %v10346_v25 = vld [vmem:[#allocation14_spill] sm:$0xff]  ;;  %v10347_v20 = vld [vmem:[#allocation19_spill] sm:$0xff] }
 0x2ab   :  { %v6192_v23 = vpop.eup %6191  ;;  %4648 = vst [vmem:[%s10191_s3 + $0x390] sm:$0xff] %v4376_v52  ;;  %v4377_v16 = vadd.f32 0.5, %v4105_v51  ;;  %v4121_v56 = vmul.f32 0.5, %v6190_v2  ;;  %6207 = vtanh.f32 %v3613_v5  ;;  %v3263_v19 = vadd.f32 %v9641_v41, %v10344_v50 }
 0x2ac   :  { %4650 = vst [vmem:[%s10191_s3 + $0x3a0] sm:$0xff] %v4378_v61  ;;  %v4379_v46 = vadd.f32 0.5, %v4107_v33  ;;  %v4123_v26 = vmul.f32 0.5, %v6192_v23  ;;  %v3612_v35 = vmul.f32 0.5, %v3102_v21  ;;  %v3106_v55 = vadd.f32 %v9648_v9, %v10345_v57 }
 0x2ad   :  { %4649 = vst [vmem:[%s10191_s3 + $0x398] sm:$0xff] %v4377_v16  ;;  %v4393_v59 = vadd.f32 0.5, %v4121_v56  ;;  %v3614_v49 = vmul.f32 0.5, %v3263_v19  ;;  %v3267_v18 = vadd.f32 %v9654_v62, %v10345_v57  ;;  %v3108_v41 = vadd.f32 %v9652_v38, %v10345_v57 }
 0x2ae   :  { %v6194_v39 = vpop.eup %6193  ;;  %4651 = vst [vmem:[%s10191_s3 + $0x3a8] sm:$0xff] %v4379_v46  ;;  %v4395_v7 = vadd.f32 0.5, %v4123_v26  ;;  %6209 = vtanh.f32 %v3612_v35  ;;  %v3628_v9 = vmul.f32 0.5, %v3106_v55  ;;  %v3269_v6 = vadd.f32 %v9659_v34, %v10345_v57 }
 0x2af   :  { %v6196_v47 = vpop.eup %6195  ;;  %4665 = vst [vmem:[%s10191_s3 + $0x418] sm:$0xff] %v4393_v59  ;;  %v4122_v62 = vmul.f32 0.5, %v6194_v39  ;;  %6211 = vtanh.f32 %v3614_v49  ;;  %v3630_v15 = vmul.f32 0.5, %v3267_v18  ;;  %v3629_v38 = vmul.f32 0.5, %v3108_v41 }
 0x2b0   :  { %v6198_v60 = vpop.eup %6197  ;;  %4667 = vst [vmem:[%s10191_s3 + $0x428] sm:$0xff] %v4395_v7  ;;  %v4124_v48 = vmul.f32 0.5, %v6196_v47  ;;  %6213 = vtanh.f32 %v3628_v9  ;;  %v3631_v40 = vmul.f32 0.5, %v3269_v6  ;;  %v3112_v34 = vadd.f32 %v10347_v20, %v10346_v25  ;;  %v10348_v6 = vld [vmem:[#allocation15_spill] sm:$0xff] }
 0x2b1   :  { %v6200_v52 = vpop.eup %6199  ;;  %v4394_v51 = vadd.f32 0.5, %v4122_v62  ;;  %v4138_v5 = vmul.f32 0.5, %v6198_v60  ;;  %6215 = vtanh.f32 %v3630_v15  ;;  %v3273_v2 = vadd.f32 %v9680_v43, %v10346_v25 }
 0x2b2   :  { %v6202_v61 = vpop.eup %6201  ;;  %v4396_v33 = vadd.f32 0.5, %v4124_v48  ;;  %v4140_v21 = vmul.f32 0.5, %v6200_v52  ;;  %6217 = vtanh.f32 %v3629_v38  ;;  %v3645_v23 = vmul.f32 0.5, %v3112_v34 }
 0x2b3   :  { %v6204_v16 = vpop.eup %6203  ;;  %4666 = vst [vmem:[%s10191_s3 + $0x420] sm:$0xff] %v4394_v51  ;;  %v4410_v56 = vadd.f32 0.5, %v4138_v5  ;;  %v4139_v19 = vmul.f32 0.5, %v6202_v61  ;;  %6219 = vtanh.f32 %v3631_v40  ;;  %v3647_v46 = vmul.f32 0.5, %v3273_v2  ;;  %v10350_v61 = vld [vmem:[#allocation16_spill] sm:$0xff] }
 0x2b4   :  { %v6206_v26 = vpop.eup %6205  ;;  %4668 = vst [vmem:[%s10191_s3 + $0x430] sm:$0xff] %v4396_v33  ;;  %v4412_v43 = vadd.f32 0.5, %v4140_v21  ;;  %v4141_v35 = vmul.f32 0.5, %v6204_v16  ;;  %6221 = vtanh.f32 %v3645_v23  ;;  %v3114_v55 = vadd.f32 %v9673_v58, %v10346_v25 }
 0x2b5   :  { %v6208_v59 = vpop.eup %6207  ;;  %4682 = vst [vmem:[%s10191_s3 + $0x4a0] sm:$0xff] %v4410_v56  ;;  %v4411_v49 = vadd.f32 0.5, %v4139_v19  ;;  %v4155_v18 = vmul.f32 0.5, %v6206_v26  ;;  %6223 = vtanh.f32 %v3647_v46  ;;  %v3275_v41 = vadd.f32 %v9689_v10, %v10346_v25  ;;  %v10349_v10 = vld [vmem:[#allocation20_spill] sm:$0xff] }
 0x2b6   :  { %4684 = vst [vmem:[%s10191_s3 + $0x4b0] sm:$0xff] %v4412_v43  ;;  %v4413_v39 = vadd.f32 0.5, %v4141_v35  ;;  %v4157_v7 = vmul.f32 0.5, %v6208_v59  ;;  %v3646_v9 = vmul.f32 0.5, %v3114_v55  ;;  %v3118_v58 = vadd.f32 %v9696_v3, %v10348_v6 }
 0x2b7   :  { %4683 = vst [vmem:[%s10191_s3 + $0x4a8] sm:$0xff] %v4411_v49  ;;  %v4427_v47 = vadd.f32 0.5, %v4155_v18  ;;  %v3648_v62 = vmul.f32 0.5, %v3275_v41  ;;  %v3279_v15 = vadd.f32 %v9708_v32, %v10348_v6  ;;  %v3120_v38 = vadd.f32 %v10349_v10, %v10348_v6  ;;  %v10351_v18 = vld [vmem:[#allocation21_spill] sm:$0xff] }
 0x2b8   :  { %v6210_v60 = vpop.eup %6209  ;;  %4685 = vst [vmem:[%s10191_s3 + $0x4b8] sm:$0xff] %v4413_v39  ;;  %v4429_v48 = vadd.f32 0.5, %v4157_v7  ;;  %6225 = vtanh.f32 %v3646_v9  ;;  %v3662_v3 = vmul.f32 0.5, %v3118_v58  ;;  %v3281_v40 = vadd.f32 %v9712_v29, %v10348_v6  ;;  %v10352_v10 = vld [vmem:[#allocation17_spill] sm:$0xff] }
 0x2b9   :  { %v6212_v20 = vpop.eup %6211  ;;  %4699 = vst [vmem:[%s10191_s3 + $0x528] sm:$0xff] %v4427_v47  ;;  %v4156_v32 = vmul.f32 0.5, %v6210_v60  ;;  %6227 = vtanh.f32 %v3648_v62  ;;  %v3664_v34 = vmul.f32 0.5, %v3279_v15  ;;  %v3663_v52 = vmul.f32 0.5, %v3120_v38 }
 0x2ba   :  { %v6214_v51 = vpop.eup %6213  ;;  %4701 = vst [vmem:[%s10191_s3 + $0x538] sm:$0xff] %v4429_v48  ;;  %v4158_v5 = vmul.f32 0.5, %v6212_v20  ;;  %6229 = vtanh.f32 %v3662_v3  ;;  %v3665_v2 = vmul.f32 0.5, %v3281_v40  ;;  %v3124_v29 = vadd.f32 %v9714_v12, %v10350_v61 }
 0x2bb   :  { %v6216_v33 = vpop.eup %6215  ;;  %v4428_v21 = vadd.f32 0.5, %v4156_v32  ;;  %v4172_v23 = vmul.f32 0.5, %v6214_v51  ;;  %6231 = vtanh.f32 %v3664_v34  ;;  %v3126_v16 = vadd.f32 %v9719_v37, %v10350_v61  ;;  %v10353_v32 = vld [vmem:[#allocation22_spill] sm:$0xff] }
 0x2bc   :  { %v6218_v56 = vpop.eup %6217  ;;  %v4430_v19 = vadd.f32 0.5, %v4158_v5  ;;  %v4174_v46 = vmul.f32 0.5, %v6216_v33  ;;  %6233 = vtanh.f32 %v3663_v52  ;;  %v3679_v26 = vmul.f32 0.5, %v3124_v29  ;;  %v10354_v33 = vld [vmem:[#allocation18_spill] sm:$0xff] }
 0x2bd   :  { %v6220_v43 = vpop.eup %6219  ;;  %4700 = vst [vmem:[%s10191_s3 + $0x530] sm:$0xff] %v4428_v21  ;;  %v4444_v35 = vadd.f32 0.5, %v4172_v23  ;;  %v4173_v55 = vmul.f32 0.5, %v6218_v56  ;;  %6235 = vtanh.f32 %v3665_v2  ;;  %v3680_v12 = vmul.f32 0.5, %v3126_v16 }
 0x2be   :  { %v6222_v59 = vpop.eup %6221  ;;  %4702 = vst [vmem:[%s10191_s3 + $0x540] sm:$0xff] %v4430_v19  ;;  %v4446_v37 = vadd.f32 0.5, %v4174_v46  ;;  %v4175_v49 = vmul.f32 0.5, %v6220_v43  ;;  %6237 = vtanh.f32 %v3679_v26  ;;  %v3285_v41 = vadd.f32 %v10351_v18, %v10350_v61 }
 0x2bf   :  { %v6224_v39 = vpop.eup %6223  ;;  %4716 = vst [vmem:[%s10191_s3 + $0x5b0] sm:$0xff] %v4444_v35  ;;  %v4445_v7 = vadd.f32 0.5, %v4173_v55  ;;  %v4189_v9 = vmul.f32 0.5, %v6222_v59  ;;  %6239 = vtanh.f32 %v3680_v12  ;;  %v3287_v58 = vadd.f32 %v9733_v0, %v10350_v61 }
 0x2c0   :  { %4718 = vst [vmem:[%s10191_s3 + $0x5c0] sm:$0xff] %v4446_v37  ;;  %v4447_v47 = vadd.f32 0.5, %v4175_v49  ;;  %v4191_v62 = vmul.f32 0.5, %v6224_v39  ;;  %v3681_v15 = vmul.f32 0.5, %v3285_v41  ;;  %v3130_v38 = vadd.f32 %v9740_v24, %v10352_v10 }
 0x2c1   :  { %4717 = vst [vmem:[%s10191_s3 + $0x5b8] sm:$0xff] %v4445_v7  ;;  %v4461_v60 = vadd.f32 0.5, %v4189_v9  ;;  %v3682_v48 = vmul.f32 0.5, %v3287_v58  ;;  %v3132_v3 = vadd.f32 %v9749_v13, %v10352_v10  ;;  %v3291_v0 = vadd.f32 %v9756_v1, %v10352_v10 }
 0x2c2   :  { %v6226_v40 = vpop.eup %6225  ;;  %4719 = vst [vmem:[%s10191_s3 + $0x5c8] sm:$0xff] %v4447_v47  ;;  %v4463_v20 = vadd.f32 0.5, %v4191_v62  ;;  %6241 = vtanh.f32 %v3681_v15  ;;  %v3696_v24 = vmul.f32 0.5, %v3130_v38  ;;  %v3293_v34 = vadd.f32 %v10353_v32, %v10352_v10  ;;  %v10355_v15 = vld [vmem:[#allocation4_spill] sm:$0xff] }
 0x2c3   :  { %v6228_v52 = vpop.eup %6227  ;;  %4733 = vst [vmem:[%s10191_s3 + $0x638] sm:$0xff] %v4461_v60  ;;  %v4190_v13 = vmul.f32 0.5, %v6226_v40  ;;  %6243 = vtanh.f32 %v3682_v48  ;;  %v3697_v51 = vmul.f32 0.5, %v3132_v3  ;;  %v3698_v1 = vmul.f32 0.5, %v3291_v0  ;;  %v10357_v3 = vld [vmem:[#allocation3_spill] sm:$0xff] }
 0x2c4   :  { %v6230_v5 = vpop.eup %6229  ;;  %4735 = vst [vmem:[%s10191_s3 + $0x648] sm:$0xff] %v4463_v20  ;;  %v4192_v2 = vmul.f32 0.5, %v6228_v52  ;;  %6245 = vtanh.f32 %v3696_v24  ;;  %v3699_v29 = vmul.f32 0.5, %v3293_v34  ;;  %v3136_v21 = vadd.f32 %v9768_v30, %v10354_v33 }
 0x2c5   :  { %v6232_v23 = vpop.eup %6231  ;;  %v4462_v16 = vadd.f32 0.5, %v4190_v13  ;;  %v4206_v56 = vmul.f32 0.5, %v6230_v5  ;;  %6247 = vtanh.f32 %v3697_v51  ;;  %v3138_v19 = vadd.f32 %v9772_v28, %v10354_v33 }
 0x2c6   :  { %v6234_v46 = vpop.eup %6233  ;;  %v4464_v26 = vadd.f32 0.5, %v4192_v2  ;;  %v4208_v43 = vmul.f32 0.5, %v6232_v23  ;;  %6249 = vtanh.f32 %v3698_v1  ;;  %v3713_v35 = vmul.f32 0.5, %v3136_v21  ;;  %v10358_v1 = vld [vmem:[#allocation23_spill] sm:$0xff]  ;;  %v10360_v21 = vld [vmem:[#allocation24_spill] sm:$0xff] }
 0x2c7   :  { %v6236_v55 = vpop.eup %6235  ;;  %4734 = vst [vmem:[%s10191_s3 + $0x640] sm:$0xff] %v4462_v16  ;;  %v4478_v12 = vadd.f32 0.5, %v4206_v56  ;;  %v4207_v59 = vmul.f32 0.5, %v6234_v46  ;;  %6251 = vtanh.f32 %v3699_v29  ;;  %v3714_v30 = vmul.f32 0.5, %v3138_v19  ;;  %v10359_v29 = vld [vmem:[#allocation5_spill] sm:$0xff] }
 0x2c8   :  { %v6238_v37 = vpop.eup %6237  ;;  %4736 = vst [vmem:[%s10191_s3 + $0x650] sm:$0xff] %v4464_v26  ;;  %v4480_v28 = vadd.f32 0.5, %v4208_v43  ;;  %v4209_v49 = vmul.f32 0.5, %v6236_v55  ;;  %6253 = vtanh.f32 %v3713_v35  ;;  %v3297_v18 = vadd.f32 %v9774_v11, %v10354_v33  ;;  %v10356_v11 = vld [vmem:[#allocation6_spill] sm:$0xff] }
 0x2c9   :  { %v6240_v41 = vpop.eup %6239  ;;  %4750 = vst [vmem:[%s10191_s3 + $0x6c0] sm:$0xff] %v4478_v12  ;;  %v4479_v39 = vadd.f32 0.5, %v4207_v59  ;;  %v4223_v7 = vmul.f32 0.5, %v6238_v37  ;;  %6255 = vtanh.f32 %v3714_v30  ;;  %v3299_v9 = vadd.f32 %v9779_v54, %v10354_v33 }
 0x2ca   :  { %4752 = vst [vmem:[%s10191_s3 + $0x6d0] sm:$0xff] %v4480_v28  ;;  %v4481_v58 = vadd.f32 0.5, %v4209_v49  ;;  %v4224_v47 = vmul.f32 0.5, %v6240_v41  ;;  %v3715_v62 = vmul.f32 0.5, %v3297_v18  ;;  %v3373_v38 = vadd.f32 %v10356_v11, %v10355_v15 }
 0x2cb   :  { %4751 = vst [vmem:[%s10191_s3 + $0x6c8] sm:$0xff] %v4479_v39  ;;  %v4495_v60 = vadd.f32 0.5, %v4223_v7  ;;  %v3716_v48 = vmul.f32 0.5, %v3299_v9  ;;  %v3368_v0 = vadd.f32 %v9793_v8, %v10357_v3  ;;  %v3413_v54 = vadd.f32 %v9800_v44, %v10344_v50 }
 0x2cc   :  { %v6242_v40 = vpop.eup %6241  ;;  %4753 = vst [vmem:[%s10191_s3 + $0x6d8] sm:$0xff] %v4481_v58  ;;  %v4496_v20 = vadd.f32 0.5, %v4224_v47  ;;  %6257 = vtanh.f32 %v3715_v62  ;;  %v3479_v24 = vmul.f32 0.5, %v3373_v38  ;;  %v3408_v32 = vadd.f32 %v9809_v53, %v10343_v42  ;;  %v10361_v58 = vld [vmem:[#allocation7_spill] sm:$0xff] }
 0x2cd   :  { %v6244_v34 = vpop.eup %6243  ;;  %4767 = vst [vmem:[%s10191_s3 + $0x748] sm:$0xff] %v4495_v60  ;;  %v4225_v8 = vmul.f32 0.5, %v6242_v40  ;;  %6259 = vtanh.f32 %v3716_v48  ;;  %v3462_v52 = vmul.f32 0.5, %v3368_v0  ;;  %v3615_v44 = vmul.f32 0.5, %v3413_v54  ;;  %v10363_v40 = vld [vmem:[#allocation9_spill] sm:$0xff] }
 0x2ce   :  { %v6246_v50 = vpop.eup %6245  ;;  %4768 = vst [vmem:[%s10191_s3 + $0x750] sm:$0xff] %v4496_v20  ;;  %v4226_v13 = vmul.f32 0.5, %v6244_v34  ;;  %6261 = vtanh.f32 %v3479_v24  ;;  %v3598_v51 = vmul.f32 0.5, %v3408_v32  ;;  %v3383_v53 = vadd.f32 %v10358_v1, %v10331_v45  ;;  %v10364_v20 = vld [vmem:[#allocation25_spill] sm:$0xff] }
 0x2cf   :  { %v6248_v42 = vpop.eup %6247  ;;  %v4497_v5 = vadd.f32 0.5, %v4225_v8  ;;  %v4240_v2 = vmul.f32 0.5, %v6246_v50  ;;  %6263 = vtanh.f32 %v3462_v52  ;;  %v3378_v23 = vadd.f32 %v10360_v21, %v10359_v29  ;;  %v10366_v21 = vld [vmem:[#allocation27_spill] sm:$0xff] }
 0x2d0   :  { %v6250_v16 = vpop.eup %6249  ;;  %v4498_v56 = vadd.f32 0.5, %v4226_v13  ;;  %v4241_v19 = vmul.f32 0.5, %v6248_v42  ;;  %6265 = vtanh.f32 %v3615_v44  ;;  %v3513_v46 = vmul.f32 0.5, %v3383_v53  ;;  %v10365_v53 = vld [vmem:[#allocation26_spill] sm:$0xff] }
 0x2d1   :  { %v6252_v26 = vpop.eup %6251  ;;  %4769 = vst [vmem:[%s10191_s3 + $0x758] sm:$0xff] %v4497_v5  ;;  %v4512_v43 = vadd.f32 0.5, %v4240_v2  ;;  %v4242_v35 = vmul.f32 0.5, %v6250_v16  ;;  %6267 = vtanh.f32 %v3598_v51  ;;  %v3496_v45 = vmul.f32 0.5, %v3378_v23 }
 0x2d2   :  { %v6254_v55 = vpop.eup %6253  ;;  %4770 = vst [vmem:[%s10191_s3 + $0x760] sm:$0xff] %v4498_v56  ;;  %v4513_v12 = vadd.f32 0.5, %v4241_v19  ;;  %v4243_v59 = vmul.f32 0.5, %v6252_v26  ;;  %6269 = vtanh.f32 %v3513_v46  ;;  %v3423_v30 = vadd.f32 %v9828_v63, %v10346_v25 }
 0x2d3   :  { %v6256_v37 = vpop.eup %6255  ;;  %4784 = vst [vmem:[%s10191_s3 + $0x7d0] sm:$0xff] %v4512_v43  ;;  %v4514_v28 = vadd.f32 0.5, %v4242_v35  ;;  %v4257_v49 = vmul.f32 0.5, %v6254_v55  ;;  %6271 = vtanh.f32 %v3496_v45  ;;  %v3418_v18 = vadd.f32 %v9832_v36, %v10345_v57  ;;  %v10362_v36 = vld [vmem:[#allocation8_spill] sm:$0xff] }
 0x2d4   :  { %4785 = vst [vmem:[%s10191_s3 + $0x7d8] sm:$0xff] %v4513_v12  ;;  %v4515_v41 = vadd.f32 0.5, %v4243_v59  ;;  %v4258_v39 = vmul.f32 0.5, %v6256_v37  ;;  %v3649_v7 = vmul.f32 0.5, %v3423_v30  ;;  %v3393_v63 = vadd.f32 %v9834_v17, %v10336_v22 }
 0x2d5   :  { %4786 = vst [vmem:[%s10191_s3 + $0x7e0] sm:$0xff] %v4514_v28  ;;  %v4529_v25 = vadd.f32 0.5, %v4257_v49  ;;  %v3632_v9 = vmul.f32 0.5, %v3418_v18  ;;  %v3388_v47 = vadd.f32 %v9839_v14, %v10361_v58  ;;  %v3433_v57 = vadd.f32 %v10362_v36, %v10350_v61 }
 0x2d6   :  { %v6258_v62 = vpop.eup %6257  ;;  %4787 = vst [vmem:[%s10191_s3 + $0x7e8] sm:$0xff] %v4515_v41  ;;  %v4530_v15 = vadd.f32 0.5, %v4258_v39  ;;  %6273 = vtanh.f32 %v3649_v7  ;;  %v3547_v22 = vmul.f32 0.5, %v3393_v63  ;;  %v3428_v17 = vadd.f32 %v9853_v31, %v10348_v6 }
 0x2d7   :  { %v6260_v11 = vpop.eup %6259  ;;  %4801 = vst [vmem:[%s10191_s3 + $0x858] sm:$0xff] %v4529_v25  ;;  %v4259_v14 = vmul.f32 0.5, %v6258_v62  ;;  %6275 = vtanh.f32 %v3632_v9  ;;  %v3530_v38 = vmul.f32 0.5, %v3388_v47  ;;  %v3683_v61 = vmul.f32 0.5, %v3433_v57 }
 0x2d8   :  { %v6262_v60 = vpop.eup %6261  ;;  %4802 = vst [vmem:[%s10191_s3 + $0x860] sm:$0xff] %v4530_v15  ;;  %v4260_v48 = vmul.f32 0.5, %v6260_v11  ;;  %6277 = vtanh.f32 %v3547_v22  ;;  %v3666_v3 = vmul.f32 0.5, %v3428_v17  ;;  %v3403_v31 = vadd.f32 %v9860_v4, %v10342_v27 }
 0x2d9   :  { %v6264_v6 = vpop.eup %6263  ;;  %v4531_v0 = vadd.f32 0.5, %v4259_v14  ;;  %v4023_v54 = vmul.f32 0.5, %v6262_v60  ;;  %6279 = vtanh.f32 %v3530_v38  ;;  %v3398_v24 = vadd.f32 %v10364_v20, %v10363_v40 }
 0x2da   :  { %v6266_v32 = vpop.eup %6265  ;;  %v4532_v34 = vadd.f32 0.5, %v4260_v48  ;;  %v4006_v8 = vmul.f32 0.5, %v6264_v6  ;;  %6281 = vtanh.f32 %v3683_v61  ;;  %v3581_v52 = vmul.f32 0.5, %v3403_v31 }
 0x2db   :  { %v6268_v44 = vpop.eup %6267  ;;  %4803 = vst [vmem:[%s10191_s3 + $0x868] sm:$0xff] %v4531_v0  ;;  %v4295_v50 = vadd.f32 0.5, %v4023_v54  ;;  %v4159_v13 = vmul.f32 0.5, %v6266_v32  ;;  %6283 = vtanh.f32 %v3666_v3  ;;  %v3564_v4 = vmul.f32 0.5, %v3398_v24 }
 0x2dc   :  { %v6270_v27 = vpop.eup %6269  ;;  %4804 = vst [vmem:[%s10191_s3 + $0x870] sm:$0xff] %v4532_v34  ;;  %v4278_v51 = vadd.f32 0.5, %v4006_v8  ;;  %v4142_v1 = vmul.f32 0.5, %v6268_v44  ;;  %6285 = vtanh.f32 %v3581_v52  ;;  %v3443_v42 = vadd.f32 %v10365_v53, %v10354_v33 }
 0x2dd   :  { %v6272_v5 = vpop.eup %6271  ;;  %4567 = vst [vmem:[%s10191_s3 + $0x108] sm:$0xff] %v4295_v50  ;;  %v4431_v2 = vadd.f32 0.5, %v4159_v13  ;;  %v4057_v29 = vmul.f32 0.5, %v6270_v27  ;;  %6287 = vtanh.f32 %v3564_v4  ;;  %v3438_v23 = vadd.f32 %v10366_v21, %v10352_v10 }
 0x2de   :  { %4550 = vst [vmem:[%s10191_s3 + $0x80] sm:$0xff] %v4278_v51  ;;  %v4414_v16 = vadd.f32 0.5, %v4142_v1  ;;  %v4040_v56 = vmul.f32 0.5, %v6272_v5  ;;  %v3717_v19 = vmul.f32 0.5, %v3443_v42 }
 0x2df   :  { %4703 = vst [vmem:[%s10191_s3 + $0x548] sm:$0xff] %v4431_v2  ;;  %v4329_v33 = vadd.f32 0.5, %v4057_v29  ;;  %v3700_v46 = vmul.f32 0.5, %v3438_v23 }
 0x2e0   :  { %v6274_v26 = vpop.eup %6273  ;;  %4686 = vst [vmem:[%s10191_s3 + $0x4c0] sm:$0xff] %v4414_v16  ;;  %v4312_v43 = vadd.f32 0.5, %v4040_v56  ;;  %6289 = vtanh.f32 %v3717_v19 }
 0x2e1   :  { %v6276_v10 = vpop.eup %6275  ;;  %4601 = vst [vmem:[%s10191_s3 + $0x218] sm:$0xff] %v4329_v33  ;;  %v4193_v35 = vmul.f32 0.5, %v6274_v26  ;;  %6291 = vtanh.f32 %v3700_v46 }
 0x2e2   :  { %v6278_v45 = vpop.eup %6277  ;;  %4584 = vst [vmem:[%s10191_s3 + $0x190] sm:$0xff] %v4312_v43  ;;  %v4176_v55 = vmul.f32 0.5, %v6276_v10 }
 0x2e3   :  { %v6280_v12 = vpop.eup %6279  ;;  %v4465_v59 = vadd.f32 0.5, %v4193_v35  ;;  %v4091_v30 = vmul.f32 0.5, %v6278_v45 }
 0x2e4   :  { %v6282_v37 = vpop.eup %6281  ;;  %v4448_v28 = vadd.f32 0.5, %v4176_v55  ;;  %v4074_v49 = vmul.f32 0.5, %v6280_v12 }
 0x2e5   :  { %v6284_v18 = vpop.eup %6283  ;;  %4737 = vst [vmem:[%s10191_s3 + $0x658] sm:$0xff] %v4465_v59  ;;  %v4363_v41 = vadd.f32 0.5, %v4091_v30  ;;  %v4227_v39 = vmul.f32 0.5, %v6282_v37 }
 0x2e6   :  { %v6286_v7 = vpop.eup %6285  ;;  %4720 = vst [vmem:[%s10191_s3 + $0x5d0] sm:$0xff] %v4448_v28  ;;  %v4346_v63 = vadd.f32 0.5, %v4074_v49  ;;  %v4210_v25 = vmul.f32 0.5, %v6284_v18 }
 0x2e7   :  { %v6288_v9 = vpop.eup %6287  ;;  %4635 = vst [vmem:[%s10191_s3 + $0x328] sm:$0xff] %v4363_v41  ;;  %v4499_v58 = vadd.f32 0.5, %v4227_v39  ;;  %v4125_v47 = vmul.f32 0.5, %v6286_v7 }
 0x2e8   :  { %4618 = vst [vmem:[%s10191_s3 + $0x2a0] sm:$0xff] %v4346_v63  ;;  %v4482_v36 = vadd.f32 0.5, %v4210_v25  ;;  %v4108_v57 = vmul.f32 0.5, %v6288_v9 }
 0x2e9   :  { %4771 = vst [vmem:[%s10191_s3 + $0x768] sm:$0xff] %v4499_v58  ;;  %v4397_v62 = vadd.f32 0.5, %v4125_v47 }
 0x2ea   :  { %v6290_v15 = vpop.eup %6289  ;;  %4754 = vst [vmem:[%s10191_s3 + $0x6e0] sm:$0xff] %v4482_v36  ;;  %v4380_v22 = vadd.f32 0.5, %v4108_v57 }
 0x2eb   :  { %v6292_v17 = vpop.eup %6291  ;;  %4669 = vst [vmem:[%s10191_s3 + $0x438] sm:$0xff] %v4397_v62  ;;  %v4261_v11 = vmul.f32 0.5, %v6290_v15 }
 0x2ec   :  { %4652 = vst [vmem:[%s10191_s3 + $0x3b0] sm:$0xff] %v4380_v22  ;;  %v4244_v14 = vmul.f32 0.5, %v6292_v17 }
 0x2ed   :  { %v4533_v38 = vadd.f32 0.5, %v4261_v11 }
 0x2ee   :  { %v4516_v61 = vadd.f32 0.5, %v4244_v14 }
 0x2ef   :  { %4805 = vst [vmem:[%s10191_s3 + $0x878] sm:$0xff] %v4533_v38 }
 0x2f0   :  { %4788 = vst [vmem:[%s10191_s3 + $0x7f0] sm:$0xff] %v4516_v61 }

</bundles_post_ra>
